<compile_context>
chip_gen: v7x
topology: tpu7x:2x2x1
jax: 0.10.0
libtpu: 0.0.40
codegen_flags: <defaults>
</compile_context>

<pallas_src>
import functools
import math

import jax
import jax.numpy as jnp
from jax.experimental import pallas as pl
from jax.experimental.pallas import tpu as pltpu

LN_EPS = 1e-5                      # nn.LayerNorm default eps
_GELU_C = math.sqrt(2.0 / math.pi)


# ----------------------------- shared math helpers -----------------------------
def _layernorm(x, w, b, eps=LN_EPS):
    # two-pass statistics (mean, then centered second moment) -- safer than E[x^2]-E[x]^2
    m = jnp.mean(x, axis=-1, keepdims=True)
    xc = x - m
    var = jnp.mean(xc * xc, axis=-1, keepdims=True)
    return xc * jax.lax.rsqrt(var + eps) * w + b


def _gelu_tanh(x):
    # tanh approximation (EUP-friendly); |diff| from exact erf GELU ~1e-3
    return 0.5 * x * (1.0 + jnp.tanh(_GELU_C * (x + 0.044715 * (x * x * x))))


def _gelu_exact(x):  # reference only (runs outside Pallas)
    return 0.5 * x * (1.0 + jax.lax.erf(x / math.sqrt(2.0)))


# ----------------------------- fused decoder kernel -----------------------------
def decoder_kernel(x_ref, lnp_ref, qkv_w_ref, proj_w_ref, fc1_w_ref, fc1_b_ref, fc2_w_ref,
                   norm_w_ref, norm_b_ref, head_w_ref, head_b_ref,
                   x1_ref, cls_ref, acc_ref,
                   *, num_heads, bblk, n_tokens, r_out):
    """Grid = (batch_blocks, depth).  acc_ref carries the residual stream across depth."""
    d = pl.program_id(1)

    # Load the input activations into the VMEM-resident residual only at the first layer.
    @pl.when(d == 0)
    def _load_x():
        acc_ref[...] = x_ref[0].astype(jnp.float32)

    x = acc_ref[...]                                   # (M, D) f32, M = bblk * N
    M, D = x.shape
    nh = num_heads
    hd = D // nh
    N = n_tokens

    lnp = lnp_ref[0]                                   # (8, D) packed per-layer vectors
    ln1_w, ln1_b = lnp[0], lnp[1]
    ln2_w, ln2_b = lnp[2], lnp[3]
    proj_b, fc2_b = lnp[4], lnp[5]

    # ---- Attention branch (q-scale already folded into the qkv weight columns) ----
    h = _layernorm(x, ln1_w, ln1_b)
    qkv = jnp.dot(h.astype(jnp.bfloat16), qkv_w_ref[0],
                  preferred_element_type=jnp.float32)  # (M, 3D)
    # cast to bf16 BEFORE the head-major relayout -> half the bytes moved
    qkv = qkv.astype(jnp.bfloat16).reshape(bblk, N, 3 * nh, hd)
    qkv = jnp.transpose(qkv, (0, 2, 1, 3))             # (bblk, 3*nh, N, hd)
    Z = bblk * nh
    q = qkv[:, 0 * nh:1 * nh].reshape(Z, N, hd)        # collapse (batch, head) -> one dim
    k = qkv[:, 1 * nh:2 * nh].reshape(Z, N, hd)
    v = qkv[:, 2 * nh:3 * nh].reshape(Z, N, hd)

    s = jnp.einsum("zqd,zkd->zqk", q, k,
                   preferred_element_type=jnp.float32)  # (Z, N, N)
    s = s - jnp.max(s, axis=-1, keepdims=True)
    p = jnp.exp(s)
    l = jnp.sum(p, axis=-1, keepdims=True)              # (Z, N, 1)
    ctx = jnp.einsum("zqk,zkd->zqd", p.astype(jnp.bfloat16), v,
                     preferred_element_type=jnp.float32)  # (Z, N, hd)
    # normalize the small context instead of the (Z, N, N) scores; EUP reciprocal
    ctx = ctx * pl.reciprocal(l, approx=True)
    ctx = jnp.transpose(ctx.reshape(bblk, nh, N, hd), (0, 2, 1, 3)).reshape(M, D)

    attn = jnp.dot(ctx.astype(jnp.bfloat16), proj_w_ref[0],
                   preferred_element_type=jnp.float32) + proj_b
    x = x + attn

    # ---- MLP branch ----
    h2 = _layernorm(x, ln2_w, ln2_b)
    h2 = jnp.dot(h2.astype(jnp.bfloat16), fc1_w_ref[0],
                 preferred_element_type=jnp.float32) + fc1_b_ref[0, 0]
    h2 = _gelu_tanh(h2)
    h2 = jnp.dot(h2.astype(jnp.bfloat16), fc2_w_ref[0],
                 preferred_element_type=jnp.float32) + fc2_b
    x = x + h2

    acc_ref[...] = x                                    # carry residual to the next layer

    # ---- Final LayerNorm + head, fused at the last depth step, selected tokens only ----
    @pl.when(d == pl.num_programs(1) - 1)
    def _head():
        norm_w = norm_w_ref[0]
        norm_b = norm_b_ref[0]
        hw = head_w_ref[...]                            # (D, Cp) bf16, lane-dense padded
        hb = head_b_ref[0]                              # (Cp,) f32
        Cp = hw.shape[1]
        xb = x.reshape(bblk, N, D)

        # x1: last r_out tokens of each batch element (r_out == N when return_token_num==0)
        x1 = xb[:, N - r_out:, :].reshape(bblk * r_out, D)
        y1 = jnp.dot(_layernorm(x1, norm_w, norm_b).astype(jnp.bfloat16), hw,
                     preferred_element_type=jnp.float32) + hb
        x1_ref[...] = y1.reshape(bblk, r_out, Cp).astype(x1_ref.dtype)

        # x_cls: token 0 of each batch element
        xc = xb[:, 0:1, :].reshape(bblk, D)
        yc = jnp.dot(_layernorm(xc, norm_w, norm_b).astype(jnp.bfloat16), hw,
                     preferred_element_type=jnp.float32) + hb
        cls_ref[...] = yc.reshape(bblk, 1, Cp).astype(cls_ref.dtype)


# ----------------------------- Pallas wrapper -----------------------------
def _pick_batch_block(batch, n_tokens, target_rows=256):
    """Fold batch into the matmul M dim: smallest batch block reaching `target_rows` rows;
    otherwise keep >= 2 grid blocks (v7x megacore); otherwise the whole batch."""
    divisors = [d for d in range(1, batch + 1) if batch % d == 0]
    for d in divisors:
        if d * n_tokens >= target_rows:
            return d
    for d in reversed(divisors):
        if batch // d >= 2:
            return d
    return batch


def run_decoder(x, p, return_token_num, num_heads, batch_block=None):
    B, N, D = x.shape
    depth = p["qkv_w"].shape[0]
    H = p["fc1_w"].shape[-1]
    Cp = p["head_w"].shape[-1]
    r_out = return_token_num if return_token_num > 0 else N

    bblk = batch_block if batch_block is not None else _pick_batch_block(B, N)
    assert B % bblk == 0
    n_blocks = B // bblk
    M = bblk * N
    xf = x.reshape(n_blocks, M, D)                       # batch folded into matmul rows

    wmap = lambda b, d: (d, 0, 0)                        # per-depth stacked weights
    cmap = lambda b, d: (0, 0)                           # grid-invariant norm/head params
    in_specs = [
        pl.BlockSpec((1, M, D), lambda b, d: (b, 0, 0)),          # x (read at depth==0)
        pl.BlockSpec((1, 8, D), wmap),                            # packed LN/bias vectors
        pl.BlockSpec((1, D, 3 * D), wmap),                        # qkv weight (scale folded)
        pl.BlockSpec((1, D, D), wmap),                            # attn proj weight
        pl.BlockSpec((1, D, H), wmap),                            # fc1 weight
        pl.BlockSpec((1, 1, H), wmap),                            # fc1 bias
        pl.BlockSpec((1, H, D), wmap),                            # fc2 weight
        pl.BlockSpec((1, D), cmap),                               # final norm weight
        pl.BlockSpec((1, D), cmap),                               # final norm bias
        pl.BlockSpec((D, Cp), cmap),                              # head weight (padded)
        pl.BlockSpec((1, Cp), cmap),                              # head bias (padded)
    ]
    out_specs = [
        pl.BlockSpec((bblk, r_out, Cp), lambda b, d: (b, 0, 0)),  # x1 tokens
        pl.BlockSpec((bblk, 1, Cp), lambda b, d: (b, 0, 0)),      # cls token
    ]
    out_shape = [
        jax.ShapeDtypeStruct((B, r_out, Cp), x.dtype),
        jax.ShapeDtypeStruct((B, 1, Cp), x.dtype),
    ]

    kern = functools.partial(decoder_kernel, num_heads=num_heads, bblk=bblk,
                             n_tokens=N, r_out=r_out)
    y1, ycls = pl.pallas_call(
        kern,
        out_shape=out_shape,
        grid=(n_blocks, depth),
        in_specs=in_specs,
        out_specs=out_specs,
        scratch_shapes=[pltpu.VMEM((M, D), jnp.float32)],          # residual carried in VMEM
        compiler_params=pltpu.CompilerParams(
            dimension_semantics=("parallel", "arbitrary"),
            vmem_limit_bytes=32 * 1024 * 1024),
    )(xf, p["lnp"], p["qkv_w"], p["proj_w"], p["fc1_w"], p["fc1_b"], p["fc2_w"],
      p["norm_w"], p["norm_b"], p["head_w"], p["head_b"])
    return y1, ycls


def decoder_forward(x, kparams, return_token_num, num_heads, num_classes):
    """Mirrors PretrainVisionTransformerDecoder.forward(x, return_token_num)."""
    y1, ycls = run_decoder(x, kparams, return_token_num, num_heads)
    x1 = y1[..., :num_classes]          # drop lane padding of the class dim
    x_cls = ycls[:, 0, :num_classes]
    return x1, x_cls


# ----------------------------- parameter init / kernel-prep -----------------------------
def _xavier(key, out_dim, in_dim):
    bound = math.sqrt(6.0 / (in_dim + out_dim))
    return jax.random.uniform(key, (out_dim, in_dim), jnp.float32, -bound, bound)


def init_params(key, depth, D, H, C):
    """f32 parameters, stored pre-transposed for row-major x @ W (PyTorch init semantics)."""
    blocks = []
    for _ in range(depth):
        key, k0, k1, k2, k3 = jax.random.split(key, 5)
        blocks.append(dict(
            ln1_w=jnp.ones((1, D), jnp.float32), ln1_b=jnp.zeros((1, D), jnp.float32),
            qkv_w=_xavier(k0, 3 * D, D).T,             # (D, 3D); qkv_bias=False
            proj_w=_xavier(k1, D, D).T, proj_b=jnp.zeros((1, D), jnp.float32),
            ln2_w=jnp.ones((1, D), jnp.float32), ln2_b=jnp.zeros((1, D), jnp.float32),
            fc1_w=_xavier(k2, H, D).T, fc1_b=jnp.zeros((1, H), jnp.float32),
            fc2_w=_xavier(k3, D, H).T, fc2_b=jnp.zeros((1, D), jnp.float32),
        ))
    key, kh = jax.random.split(key)
    return dict(
        blocks=blocks,
        norm_w=jnp.ones((1, D), jnp.float32), norm_b=jnp.zeros((1, D), jnp.float32),
        head_w=_xavier(kh, C, D).T, head_b=jnp.zeros((1, C), jnp.float32),
    )


def prepare_params(params, num_heads, lane=128):
    """Kernel-ready params: per-layer weights stacked over depth, bf16 matmul weights
    (f32 LN params / biases), q-scale folded into the qkv weight, small per-layer vectors
    packed into one (depth, 8, D) array, head weight/bias zero-padded to a 128-lane class
    dim."""
    D = params["norm_w"].shape[-1]
    hd = D // num_heads
    scale = hd ** -0.5
    bf = lambda w: w.astype(jnp.bfloat16)

    qkv_w, proj_w, fc1_w, fc1_b, fc2_w, lnp = [], [], [], [], [], []
    for p in params["blocks"]:
        qkv_w.append(p["qkv_w"].at[:, :D].multiply(scale))   # fold q scale (f32, pre-cast)
        proj_w.append(p["proj_w"])
        fc1_w.append(p["fc1_w"])
        fc1_b.append(p["fc1_b"])                             # (1, H)
        fc2_w.append(p["fc2_w"])
        pack = jnp.zeros((8, D), jnp.float32)
        pack = pack.at[0].set(p["ln1_w"][0]).at[1].set(p["ln1_b"][0])
        pack = pack.at[2].set(p["ln2_w"][0]).at[3].set(p["ln2_b"][0])
        pack = pack.at[4].set(p["proj_b"][0]).at[5].set(p["fc2_b"][0])
        lnp.append(pack)

    C = params["head_w"].shape[1]
    Cp = ((C + lane - 1) // lane) * lane
    head_w = jnp.zeros((D, Cp), jnp.float32).at[:, :C].set(params["head_w"])
    head_b = jnp.zeros((1, Cp), jnp.float32).at[:, :C].set(params["head_b"])

    return dict(
        lnp=jnp.stack(lnp),                    # (depth, 8, D)  f32
        qkv_w=bf(jnp.stack(qkv_w)),            # (depth, D, 3D) bf16
        proj_w=bf(jnp.stack(proj_w)),          # (depth, D, D)  bf16
        fc1_w=bf(jnp.stack(fc1_w)),            # (depth, D, H)  bf16
        fc1_b=jnp.stack(fc1_b),                # (depth, 1, H)  f32
        fc2_w=bf(jnp.stack(fc2_w)),            # (depth, H, D)  bf16
        norm_w=params["norm_w"], norm_b=params["norm_b"],
        head_w=bf(head_w), head_b=head_b,
    )


# ----------------------------- pure-JAX f32 reference -----------------------------
def ref_forward(x, params, return_token_num, num_heads):
    for p in params["blocks"]:
        B, N, D = x.shape
        hd = D // num_heads
        scale = hd ** -0.5
        h = _layernorm(x, p["ln1_w"][0], p["ln1_b"][0])
        qkv = h @ p["qkv_w"]
        q = qkv[..., :D].reshape(B, N, num_heads, hd) * scale
        k = qkv[..., D:2 * D].reshape(B, N, num_heads, hd)
        v = qkv[..., 2 * D:].reshape(B, N, num_heads, hd)
        a = jax.nn.softmax(jnp.einsum("bqhd,bkhd->bhqk", q, k), axis=-1)
        ctx = jnp.einsum("bhqk,bkhd->bqhd", a, v).reshape(B, N, D)
        x = x + ctx @ p["proj_w"] + p["proj_b"][0]
        h2 = _layernorm(x, p["ln2_w"][0], p["ln2_b"][0])
        h2 = _gelu_exact(h2 @ p["fc1_w"] + p["fc1_b"][0])
        x = x + h2 @ p["fc2_w"] + p["fc2_b"][0]

    def head(z):
        return (_layernorm(z, params["norm_w"][0], params["norm_b"][0])
                @ params["head_w"] + params["head_b"][0])

    x1 = head(x[:, -return_token_num:]) if return_token_num > 0 else head(x)
    x_cls = head(x[:, 0])
    return x1, x_cls


# ----------------------------- main -----------------------------
if __name__ == "__main__":
    B, N, D = 2, 16, 256               # batch, seq (num_patches), embed_dim (lane-aligned)
    num_heads = 2                      # head_dim = 128 (lane-aligned head splits)
    depth = 2
    patch_size = 4
    num_classes = 3 * patch_size ** 2  # 48, matches the module's assert
    mlp_ratio = 4.0
    H = int(D * mlp_ratio)             # 1024
    return_token_num = 6

    assert num_classes == 3 * patch_size ** 2

    key = jax.random.PRNGKey(0)
    kx, kp = jax.random.split(key)
    x = jax.random.normal(kx, (B, N, D), jnp.float32)
    params = init_params(kp, depth, D, H, num_classes)        # f32 "PyTorch-like" params
    kparams = prepare_params(params, num_heads)               # stacked / bf16 / padded

    fwd = jax.jit(decoder_forward, static_argnums=(2, 3, 4))
    x1, x_cls = fwd(x, kparams, return_token_num, num_heads, num_classes)
    (x1, x_cls) = jax.block_until_ready((x1, x_cls))

    assert x1.shape == (B, return_token_num, num_classes)
    assert x_cls.shape == (B, num_classes)

    # f32 / exact-GELU / exact-softmax reference; the gap vs. the kernel is the intentional
    # bf16 matmuls + approx reciprocal + tanh GELU (all well inside this tolerance).
    r1, rcls = ref_forward(x, params, return_token_num, num_heads)
    assert jnp.allclose(x1, r1, atol=5e-2, rtol=5e-2)
    assert jnp.allclose(x_cls, rcls, atol=5e-2, rtol=5e-2)

    print("KERNEL_OK")
</pallas_src>

<mosaic_0001>
module attributes {stable_mosaic.version = 11 : i64} {
  func.func @decoder_kernel(%arg0: i32, %arg1: i32, %arg2: memref<1x16x256xf32, #tpu.memory_space<vmem>>, %arg3: memref<1x8x256xf32, #tpu.memory_space<vmem>>, %arg4: memref<1x256x768xbf16, #tpu.memory_space<vmem>>, %arg5: memref<1x256x256xbf16, #tpu.memory_space<vmem>>, %arg6: memref<1x256x1024xbf16, #tpu.memory_space<vmem>>, %arg7: memref<1x1x1024xf32, #tpu.memory_space<vmem>>, %arg8: memref<1x1024x256xbf16, #tpu.memory_space<vmem>>, %arg9: memref<1x256xf32, #tpu.memory_space<vmem>>, %arg10: memref<1x256xf32, #tpu.memory_space<vmem>>, %arg11: memref<256x128xbf16, #tpu.memory_space<vmem>>, %arg12: memref<1x128xf32, #tpu.memory_space<vmem>>, %arg13: memref<1x6x128xf32, #tpu.memory_space<vmem>>, %arg14: memref<1x1x128xf32, #tpu.memory_space<vmem>>, %arg15: memref<16x256xf32, #tpu.memory_space<vmem>>) attributes {dimension_semantics = [#tpu.dimension_semantics<parallel>, #tpu.dimension_semantics<arbitrary>], iteration_bounds = array<i64: 2, 2>, scalar_prefetch = 0 : i64, scratch_operands = 1 : i64, tpu.core_type = #tpu.core_type<tc>, window_params = [{transform_indices = @transform_0, window_bounds = array<i64: 1, 16, 256>}, {transform_indices = @transform_1, window_bounds = array<i64: 1, 8, 256>}, {transform_indices = @transform_2, window_bounds = array<i64: 1, 256, 768>}, {transform_indices = @transform_3, window_bounds = array<i64: 1, 256, 256>}, {transform_indices = @transform_4, window_bounds = array<i64: 1, 256, 1024>}, {transform_indices = @transform_5, window_bounds = array<i64: 1, 1, 1024>}, {transform_indices = @transform_6, window_bounds = array<i64: 1, 1024, 256>}, {pipeline_mode = #tpu.pipeline_mode<synchronous>, transform_indices = @transform_7, window_bounds = array<i64: 1, 256>}, {pipeline_mode = #tpu.pipeline_mode<synchronous>, transform_indices = @transform_8, window_bounds = array<i64: 1, 256>}, {pipeline_mode = #tpu.pipeline_mode<synchronous>, transform_indices = @transform_9, window_bounds = array<i64: 256, 128>}, {pipeline_mode = #tpu.pipeline_mode<synchronous>, transform_indices = @transform_10, window_bounds = array<i64: 1, 128>}, {transform_indices = @transform_11, window_bounds = array<i64: 1, 6, 128>}, {transform_indices = @transform_12, window_bounds = array<i64: 1, 1, 128>}]} {
    %c0_i32 = arith.constant 0 : i32
    %0 = arith.cmpi eq, %arg1, %c0_i32 : i32
    %1 = arith.extui %0 : i1 to i32
    %c0_i32_0 = arith.constant 0 : i32
    %2 = arith.cmpi ne, %1, %c0_i32_0 : i32
    scf.if %2 {
      %c0_44 = arith.constant 0 : index
      %c0_45 = arith.constant 0 : index
      %c0_46 = arith.constant 0 : index
      %133 = vector.load %arg2[%c0_44, %c0_45, %c0_46] : memref<1x16x256xf32, #tpu.memory_space<vmem>>, vector<1x16x256xf32>
      %134 = vector.shape_cast %133 : vector<1x16x256xf32> to vector<16x256xf32>
      %c0_47 = arith.constant 0 : index
      %c0_48 = arith.constant 0 : index
      %135 = vector.load %arg15[%c0_47, %c0_48] : memref<16x256xf32, #tpu.memory_space<vmem>>, vector<16x256xf32>
      tpu.vector_store %arg15[%c0_47, %c0_48], %134 {strides = array<i32>} : memref<16x256xf32, #tpu.memory_space<vmem>>, vector<16x256xf32>,
    } else {
    }
    %c0 = arith.constant 0 : index
    %c0_1 = arith.constant 0 : index
    %3 = vector.load %arg15[%c0, %c0_1] : memref<16x256xf32, #tpu.memory_space<vmem>>, vector<16x256xf32>
    %c0_2 = arith.constant 0 : index
    %c0_3 = arith.constant 0 : index
    %c0_4 = arith.constant 0 : index
    %4 = vector.load %arg3[%c0_2, %c0_3, %c0_4] : memref<1x8x256xf32, #tpu.memory_space<vmem>>, vector<1x8x256xf32>
    %5 = vector.shape_cast %4 : vector<1x8x256xf32> to vector<8x256xf32>
    %6 = vector.extract_strided_slice %5 {offsets = [0, 0], sizes = [1, 256], strides = [1, 1]} : vector<8x256xf32> to vector<1x256xf32>
    %7 = vector.shape_cast %6 : vector<1x256xf32> to vector<256xf32>
    %8 = vector.extract_strided_slice %5 {offsets = [1, 0], sizes = [1, 256], strides = [1, 1]} : vector<8x256xf32> to vector<1x256xf32>
    %9 = vector.shape_cast %8 : vector<1x256xf32> to vector<256xf32>
    %10 = vector.extract_strided_slice %5 {offsets = [2, 0], sizes = [1, 256], strides = [1, 1]} : vector<8x256xf32> to vector<1x256xf32>
    %11 = vector.shape_cast %10 : vector<1x256xf32> to vector<256xf32>
    %12 = vector.extract_strided_slice %5 {offsets = [3, 0], sizes = [1, 256], strides = [1, 1]} : vector<8x256xf32> to vector<1x256xf32>
    %13 = vector.shape_cast %12 : vector<1x256xf32> to vector<256xf32>
    %14 = vector.extract_strided_slice %5 {offsets = [4, 0], sizes = [1, 256], strides = [1, 1]} : vector<8x256xf32> to vector<1x256xf32>
    %15 = vector.shape_cast %14 : vector<1x256xf32> to vector<256xf32>
    %16 = vector.extract_strided_slice %5 {offsets = [5, 0], sizes = [1, 256], strides = [1, 1]} : vector<8x256xf32> to vector<1x256xf32>
    %17 = vector.shape_cast %16 : vector<1x256xf32> to vector<256xf32>
    %cst = arith.constant dense<0.000000e+00> : vector<16xf32>
    %18 = vector.multi_reduction <add>, %3, %cst [1] : vector<16x256xf32> to vector<16xf32>
    %19 = vector.shape_cast %18 : vector<16xf32> to vector<16x1xf32>
    %cst_5 = arith.constant 2.560000e+02 : f32
    %20 = vector.broadcast %cst_5 : f32 to vector<16x1xf32>
    %21 = arith.divf %19, %20 : vector<16x1xf32>
    %22 = vector.broadcast %21 : vector<16x1xf32> to vector<16x256xf32>
    %23 = arith.subf %3, %22 : vector<16x256xf32>
    %24 = arith.mulf %23, %23 : vector<16x256xf32>
    %cst_6 = arith.constant dense<0.000000e+00> : vector<16xf32>
    %25 = vector.multi_reduction <add>, %24, %cst_6 [1] : vector<16x256xf32> to vector<16xf32>
    %26 = vector.shape_cast %25 : vector<16xf32> to vector<16x1xf32>
    %cst_7 = arith.constant 2.560000e+02 : f32
    %27 = vector.broadcast %cst_7 : f32 to vector<16x1xf32>
    %28 = arith.divf %26, %27 : vector<16x1xf32>
    %cst_8 = arith.constant 9.99999974E-6 : f32
    %29 = vector.broadcast %cst_8 : f32 to vector<16x1xf32>
    %30 = arith.addf %28, %29 : vector<16x1xf32>
    %31 = math.rsqrt %30 : vector<16x1xf32>
    %32 = vector.broadcast %31 : vector<16x1xf32> to vector<16x256xf32>
    %33 = arith.mulf %23, %32 : vector<16x256xf32>
    %34 = vector.shape_cast %7 : vector<256xf32> to vector<1x256xf32>
    %35 = vector.broadcast %34 : vector<1x256xf32> to vector<16x256xf32>
    %36 = arith.mulf %33, %35 : vector<16x256xf32>
    %37 = vector.shape_cast %9 : vector<256xf32> to vector<1x256xf32>
    %38 = vector.broadcast %37 : vector<1x256xf32> to vector<16x256xf32>
    %39 = arith.addf %36, %38 : vector<16x256xf32>
    %40 = arith.truncf %39 : vector<16x256xf32> to vector<16x256xbf16>
    %c0_9 = arith.constant 0 : index
    %c0_10 = arith.constant 0 : index
    %c0_11 = arith.constant 0 : index
    %41 = vector.load %arg4[%c0_9, %c0_10, %c0_11] : memref<1x256x768xbf16, #tpu.memory_space<vmem>>, vector<1x256x768xbf16>
    %42 = vector.shape_cast %41 : vector<1x256x768xbf16> to vector<256x768xbf16>
    %cst_12 = arith.constant dense<0.000000e+00> : vector<16x768xf32>
    %43 = tpu.matmul %40, %42, %cst_12 {dimension_numbers = #tpu.dot_dimension_numbers<[1], [0], [0], [1], [0, 0, 1, 1], [], []>} : vector<16x256xbf16>, vector<256x768xbf16>, vector<16x768xf32> -> vector<16x768xf32>
    %44 = arith.truncf %43 : vector<16x768xf32> to vector<16x768xbf16>
    %45 = vector.shape_cast %44 : vector<16x768xbf16> to vector<1x16x6x128xbf16>
    %46 = tpu.transpose %45, [0, 2, 1, 3] : vector<1x16x6x128xbf16> -> vector<1x6x16x128xbf16>
    %47 = vector.extract_strided_slice %46 {offsets = [0, 0, 0, 0], sizes = [1, 2, 16, 128], strides = [1, 1, 1, 1]} : vector<1x6x16x128xbf16> to vector<1x2x16x128xbf16>
    %48 = vector.shape_cast %47 : vector<1x2x16x128xbf16> to vector<2x16x128xbf16>
    %49 = vector.extract_strided_slice %46 {offsets = [0, 2, 0, 0], sizes = [1, 2, 16, 128], strides = [1, 1, 1, 1]} : vector<1x6x16x128xbf16> to vector<1x2x16x128xbf16>
    %50 = vector.shape_cast %49 : vector<1x2x16x128xbf16> to vector<2x16x128xbf16>
    %51 = vector.extract_strided_slice %46 {offsets = [0, 4, 0, 0], sizes = [1, 2, 16, 128], strides = [1, 1, 1, 1]} : vector<1x6x16x128xbf16> to vector<1x2x16x128xbf16>
    %52 = vector.shape_cast %51 : vector<1x2x16x128xbf16> to vector<2x16x128xbf16>
    "tpu.trace_start"() <{level = 10 : i32, message = "zqd,zkd->zqk"}> : () -> ()
    %cst_13 = arith.constant dense<0.000000e+00> : vector<2x16x16xf32>
    %53 = tpu.matmul %48, %50, %cst_13 {dimension_numbers = #tpu.dot_dimension_numbers<[2], [2], [1], [1], [0, 0, 0, 1, 1, 1], [0], [0]>} : vector<2x16x128xbf16>, vector<2x16x128xbf16>, vector<2x16x16xf32> -> vector<2x16x16xf32>
    "tpu.trace_stop"() : () -> ()
    %cst_14 = arith.constant dense<0xFF800000> : vector<2x16xf32>
    %54 = vector.multi_reduction <maximumf>, %53, %cst_14 [2] : vector<2x16x16xf32> to vector<2x16xf32>
    %55 = vector.shape_cast %54 : vector<2x16xf32> to vector<2x16x1xf32>
    %56 = vector.broadcast %55 : vector<2x16x1xf32> to vector<2x16x16xf32>
    %57 = arith.subf %53, %56 : vector<2x16x16xf32>
    %58 = math.exp %57 : vector<2x16x16xf32>
    %cst_15 = arith.constant dense<0.000000e+00> : vector<2x16xf32>
    %59 = vector.multi_reduction <add>, %58, %cst_15 [2] : vector<2x16x16xf32> to vector<2x16xf32>
    %60 = vector.shape_cast %59 : vector<2x16xf32> to vector<2x16x1xf32>
    %61 = arith.truncf %58 : vector<2x16x16xf32> to vector<2x16x16xbf16>
    "tpu.trace_start"() <{level = 10 : i32, message = "zqk,zkd->zqd"}> : () -> ()
    %cst_16 = arith.constant dense<0.000000e+00> : vector<2x16x128xf32>
    %62 = tpu.matmul %61, %52, %cst_16 {dimension_numbers = #tpu.dot_dimension_numbers<[2], [1], [1], [2], [0, 0, 0, 1, 1, 2], [0], [0]>} : vector<2x16x16xbf16>, vector<2x16x128xbf16>, vector<2x16x128xf32> -> vector<2x16x128xf32>
    "tpu.trace_stop"() : () -> ()
    %63 = tpu.reciprocal %60 {approx = true} : vector<2x16x1xf32> -> vector<2x16x1xf32>
    %64 = vector.broadcast %63 : vector<2x16x1xf32> to vector<2x16x128xf32>
    %65 = arith.mulf %62, %64 : vector<2x16x128xf32>
    %66 = vector.shape_cast %65 : vector<2x16x128xf32> to vector<1x2x16x128xf32>
    %67 = tpu.transpose %66, [0, 2, 1, 3] : vector<1x2x16x128xf32> -> vector<1x16x2x128xf32>
    %68 = vector.shape_cast %67 : vector<1x16x2x128xf32> to vector<16x256xf32>
    %69 = arith.truncf %68 : vector<16x256xf32> to vector<16x256xbf16>
    %c0_17 = arith.constant 0 : index
    %c0_18 = arith.constant 0 : index
    %c0_19 = arith.constant 0 : index
    %70 = vector.load %arg5[%c0_17, %c0_18, %c0_19] : memref<1x256x256xbf16, #tpu.memory_space<vmem>>, vector<1x256x256xbf16>
    %71 = vector.shape_cast %70 : vector<1x256x256xbf16> to vector<256x256xbf16>
    %cst_20 = arith.constant dense<0.000000e+00> : vector<16x256xf32>
    %72 = tpu.matmul %69, %71, %cst_20 {dimension_numbers = #tpu.dot_dimension_numbers<[1], [0], [0], [1], [0, 0, 1, 1], [], []>} : vector<16x256xbf16>, vector<256x256xbf16>, vector<16x256xf32> -> vector<16x256xf32>
    %73 = vector.shape_cast %15 : vector<256xf32> to vector<1x256xf32>
    %74 = vector.broadcast %73 : vector<1x256xf32> to vector<16x256xf32>
    %75 = arith.addf %72, %74 : vector<16x256xf32>
    %76 = arith.addf %3, %75 : vector<16x256xf32>
    %cst_21 = arith.constant dense<0.000000e+00> : vector<16xf32>
    %77 = vector.multi_reduction <add>, %76, %cst_21 [1] : vector<16x256xf32> to vector<16xf32>
    %78 = vector.shape_cast %77 : vector<16xf32> to vector<16x1xf32>
    %cst_22 = arith.constant 2.560000e+02 : f32
    %79 = vector.broadcast %cst_22 : f32 to vector<16x1xf32>
    %80 = arith.divf %78, %79 : vector<16x1xf32>
    %81 = vector.broadcast %80 : vector<16x1xf32> to vector<16x256xf32>
    %82 = arith.subf %76, %81 : vector<16x256xf32>
    %83 = arith.mulf %82, %82 : vector<16x256xf32>
    %cst_23 = arith.constant dense<0.000000e+00> : vector<16xf32>
    %84 = vector.multi_reduction <add>, %83, %cst_23 [1] : vector<16x256xf32> to vector<16xf32>
    %85 = vector.shape_cast %84 : vector<16xf32> to vector<16x1xf32>
    %cst_24 = arith.constant 2.560000e+02 : f32
    %86 = vector.broadcast %cst_24 : f32 to vector<16x1xf32>
    %87 = arith.divf %85, %86 : vector<16x1xf32>
    %cst_25 = arith.constant 9.99999974E-6 : f32
    %88 = vector.broadcast %cst_25 : f32 to vector<16x1xf32>
    %89 = arith.addf %87, %88 : vector<16x1xf32>
    %90 = math.rsqrt %89 : vector<16x1xf32>
    %91 = vector.broadcast %90 : vector<16x1xf32> to vector<16x256xf32>
    %92 = arith.mulf %82, %91 : vector<16x256xf32>
    %93 = vector.shape_cast %11 : vector<256xf32> to vector<1x256xf32>
    %94 = vector.broadcast %93 : vector<1x256xf32> to vector<16x256xf32>
    %95 = arith.mulf %92, %94 : vector<16x256xf32>
    %96 = vector.shape_cast %13 : vector<256xf32> to vector<1x256xf32>
    %97 = vector.broadcast %96 : vector<1x256xf32> to vector<16x256xf32>
    %98 = arith.addf %95, %97 : vector<16x256xf32>
    %99 = arith.truncf %98 : vector<16x256xf32> to vector<16x256xbf16>
    %c0_26 = arith.constant 0 : index
    %c0_27 = arith.constant 0 : index
    %c0_28 = arith.constant 0 : index
    %100 = vector.load %arg6[%c0_26, %c0_27, %c0_28] : memref<1x256x1024xbf16, #tpu.memory_space<vmem>>, vector<1x256x1024xbf16>
    %101 = vector.shape_cast %100 : vector<1x256x1024xbf16> to vector<256x1024xbf16>
    %cst_29 = arith.constant dense<0.000000e+00> : vector<16x1024xf32>
    %102 = tpu.matmul %99, %101, %cst_29 {dimension_numbers = #tpu.dot_dimension_numbers<[1], [0], [0], [1], [0, 0, 1, 1], [], []>} : vector<16x256xbf16>, vector<256x1024xbf16>, vector<16x1024xf32> -> vector<16x1024xf32>
    %c0_30 = arith.constant 0 : index
    %c0_31 = arith.constant 0 : index
    %c0_32 = arith.constant 0 : index
    %103 = vector.load %arg7[%c0_30, %c0_31, %c0_32] : memref<1x1x1024xf32, #tpu.memory_space<vmem>>, vector<1x1x1024xf32>
    %104 = vector.shape_cast %103 : vector<1x1x1024xf32> to vector<1024xf32>
    %105 = vector.shape_cast %104 : vector<1024xf32> to vector<1x1024xf32>
    %106 = vector.broadcast %105 : vector<1x1024xf32> to vector<16x1024xf32>
    %107 = arith.addf %102, %106 : vector<16x1024xf32>
    %cst_33 = arith.constant 5.000000e-01 : f32
    %108 = vector.broadcast %cst_33 : f32 to vector<16x1024xf32>
    %109 = arith.mulf %108, %107 : vector<16x1024xf32>
    %110 = arith.mulf %107, %107 : vector<16x1024xf32>
    %111 = arith.mulf %110, %107 : vector<16x1024xf32>
    %cst_34 = arith.constant 4.471500e-02 : f32
    %112 = vector.broadcast %cst_34 : f32 to vector<16x1024xf32>
    %113 = arith.mulf %112, %111 : vector<16x1024xf32>
    %114 = arith.addf %107, %113 : vector<16x1024xf32>
    %cst_35 = arith.constant 0.797884583 : f32
    %115 = vector.broadcast %cst_35 : f32 to vector<16x1024xf32>
    %116 = arith.mulf %115, %114 : vector<16x1024xf32>
    %117 = math.tanh %116 : vector<16x1024xf32>
    %cst_36 = arith.constant 1.000000e+00 : f32
    %118 = vector.broadcast %cst_36 : f32 to vector<16x1024xf32>
    %119 = arith.addf %118, %117 : vector<16x1024xf32>
    %120 = arith.mulf %109, %119 : vector<16x1024xf32>
    %121 = arith.truncf %120 : vector<16x1024xf32> to vector<16x1024xbf16>
    %c0_37 = arith.constant 0 : index
    %c0_38 = arith.constant 0 : index
    %c0_39 = arith.constant 0 : index
    %122 = vector.load %arg8[%c0_37, %c0_38, %c0_39] : memref<1x1024x256xbf16, #tpu.memory_space<vmem>>, vector<1x1024x256xbf16>
    %123 = vector.shape_cast %122 : vector<1x1024x256xbf16> to vector<1024x256xbf16>
    %cst_40 = arith.constant dense<0.000000e+00> : vector<16x256xf32>
    %124 = tpu.matmul %121, %123, %cst_40 {dimension_numbers = #tpu.dot_dimension_numbers<[1], [0], [0], [1], [0, 0, 1, 1], [], []>} : vector<16x1024xbf16>, vector<1024x256xbf16>, vector<16x256xf32> -> vector<16x256xf32>
    %125 = vector.shape_cast %17 : vector<256xf32> to vector<1x256xf32>
    %126 = vector.broadcast %125 : vector<1x256xf32> to vector<16x256xf32>
    %127 = arith.addf %124, %126 : vector<16x256xf32>
    %128 = arith.addf %76, %127 : vector<16x256xf32>
    %c0_41 = arith.constant 0 : index
    %c0_42 = arith.constant 0 : index
    %129 = vector.load %arg15[%c0_41, %c0_42] : memref<16x256xf32, #tpu.memory_space<vmem>>, vector<16x256xf32>
    tpu.vector_store %arg15[%c0_41, %c0_42], %128 {strides = array<i32>} : memref<16x256xf32, #tpu.memory_space<vmem>>, vector<16x256xf32>,
    %c1_i32 = arith.constant 1 : i32
    %130 = arith.cmpi eq, %arg1, %c1_i32 : i32
    %131 = arith.extui %130 : i1 to i32
    %c0_i32_43 = arith.constant 0 : i32
    %132 = arith.cmpi ne, %131, %c0_i32_43 : i32
    scf.if %132 {
      %c0_44 = arith.constant 0 : index
      %c0_45 = arith.constant 0 : index
      %133 = vector.load %arg9[%c0_44, %c0_45] : memref<1x256xf32, #tpu.memory_space<vmem>>, vector<1x256xf32>
      %134 = vector.shape_cast %133 : vector<1x256xf32> to vector<256xf32>
      %c0_46 = arith.constant 0 : index
      %c0_47 = arith.constant 0 : index
      %135 = vector.load %arg10[%c0_46, %c0_47] : memref<1x256xf32, #tpu.memory_space<vmem>>, vector<1x256xf32>
      %136 = vector.shape_cast %135 : vector<1x256xf32> to vector<256xf32>
      %c0_48 = arith.constant 0 : index
      %c0_49 = arith.constant 0 : index
      %137 = vector.load %arg11[%c0_48, %c0_49] : memref<256x128xbf16, #tpu.memory_space<vmem>>, vector<256x128xbf16>
      %c0_50 = arith.constant 0 : index
      %c0_51 = arith.constant 0 : index
      %138 = vector.load %arg12[%c0_50, %c0_51] : memref<1x128xf32, #tpu.memory_space<vmem>>, vector<1x128xf32>
      %139 = vector.shape_cast %138 : vector<1x128xf32> to vector<128xf32>
      %140 = vector.shape_cast %128 : vector<16x256xf32> to vector<1x16x256xf32>
      %141 = vector.extract_strided_slice %140 {offsets = [0, 10, 0], sizes = [1, 6, 256], strides = [1, 1, 1]} : vector<1x16x256xf32> to vector<1x6x256xf32>
      %142 = vector.shape_cast %141 : vector<1x6x256xf32> to vector<6x256xf32>
      %cst_52 = arith.constant dense<0.000000e+00> : vector<6xf32>
      %143 = vector.multi_reduction <add>, %142, %cst_52 [1] : vector<6x256xf32> to vector<6xf32>
      %144 = vector.shape_cast %143 : vector<6xf32> to vector<6x1xf32>
      %cst_53 = arith.constant 2.560000e+02 : f32
      %145 = vector.broadcast %cst_53 : f32 to vector<6x1xf32>
      %146 = arith.divf %144, %145 : vector<6x1xf32>
      %147 = vector.broadcast %146 : vector<6x1xf32> to vector<6x256xf32>
      %148 = arith.subf %142, %147 : vector<6x256xf32>
      %149 = arith.mulf %148, %148 : vector<6x256xf32>
      %cst_54 = arith.constant dense<0.000000e+00> : vector<6xf32>
      %150 = vector.multi_reduction <add>, %149, %cst_54 [1] : vector<6x256xf32> to vector<6xf32>
      %151 = vector.shape_cast %150 : vector<6xf32> to vector<6x1xf32>
      %cst_55 = arith.constant 2.560000e+02 : f32
      %152 = vector.broadcast %cst_55 : f32 to vector<6x1xf32>
      %153 = arith.divf %151, %152 : vector<6x1xf32>
      %cst_56 = arith.constant 9.99999974E-6 : f32
      %154 = vector.broadcast %cst_56 : f32 to vector<6x1xf32>
      %155 = arith.addf %153, %154 : vector<6x1xf32>
      %156 = math.rsqrt %155 : vector<6x1xf32>
      %157 = vector.broadcast %156 : vector<6x1xf32> to vector<6x256xf32>
      %158 = arith.mulf %148, %157 : vector<6x256xf32>
      %159 = vector.shape_cast %134 : vector<256xf32> to vector<1x256xf32>
      %160 = vector.broadcast %159 : vector<1x256xf32> to vector<6x256xf32>
      %161 = arith.mulf %158, %160 : vector<6x256xf32>
      %162 = vector.shape_cast %136 : vector<256xf32> to vector<1x256xf32>
      %163 = vector.broadcast %162 : vector<1x256xf32> to vector<6x256xf32>
      %164 = arith.addf %161, %163 : vector<6x256xf32>
      %165 = arith.truncf %164 : vector<6x256xf32> to vector<6x256xbf16>
      %cst_57 = arith.constant dense<0.000000e+00> : vector<6x128xf32>
      %166 = tpu.matmul %165, %137, %cst_57 {dimension_numbers = #tpu.dot_dimension_numbers<[1], [0], [0], [1], [0, 0, 1, 1], [], []>} : vector<6x256xbf16>, vector<256x128xbf16>, vector<6x128xf32> -> vector<6x128xf32>
      %167 = vector.shape_cast %139 : vector<128xf32> to vector<1x128xf32>
      %168 = vector.broadcast %167 : vector<1x128xf32> to vector<6x128xf32>
      %169 = arith.addf %166, %168 : vector<6x128xf32>
      %170 = vector.shape_cast %169 : vector<6x128xf32> to vector<1x6x128xf32>
      %c0_58 = arith.constant 0 : index
      %c0_59 = arith.constant 0 : index
      %c0_60 = arith.constant 0 : index
      %171 = vector.load %arg13[%c0_58, %c0_59, %c0_60] : memref<1x6x128xf32, #tpu.memory_space<vmem>>, vector<1x6x128xf32>
      tpu.vector_store %arg13[%c0_58, %c0_59, %c0_60], %170 {strides = array<i32>} : memref<1x6x128xf32, #tpu.memory_space<vmem>>, vector<1x6x128xf32>,
      %172 = vector.extract_strided_slice %140 {offsets = [0, 0, 0], sizes = [1, 1, 256], strides = [1, 1, 1]} : vector<1x16x256xf32> to vector<1x1x256xf32>
      %173 = vector.shape_cast %172 : vector<1x1x256xf32> to vector<1x256xf32>
      %cst_61 = arith.constant dense<0.000000e+00> : vector<1xf32>
      %174 = vector.multi_reduction <add>, %173, %cst_61 [1] : vector<1x256xf32> to vector<1xf32>
      %175 = vector.shape_cast %174 : vector<1xf32> to vector<1x1xf32>
      %cst_62 = arith.constant 2.560000e+02 : f32
      %176 = vector.broadcast %cst_62 : f32 to vector<1x1xf32>
      %177 = arith.divf %175, %176 : vector<1x1xf32>
      %178 = vector.broadcast %177 : vector<1x1xf32> to vector<1x256xf32>
      %179 = arith.subf %173, %178 : vector<1x256xf32>
      %180 = arith.mulf %179, %179 : vector<1x256xf32>
      %cst_63 = arith.constant dense<0.000000e+00> : vector<1xf32>
      %181 = vector.multi_reduction <add>, %180, %cst_63 [1] : vector<1x256xf32> to vector<1xf32>
      %182 = vector.shape_cast %181 : vector<1xf32> to vector<1x1xf32>
      %cst_64 = arith.constant 2.560000e+02 : f32
      %183 = vector.broadcast %cst_64 : f32 to vector<1x1xf32>
      %184 = arith.divf %182, %183 : vector<1x1xf32>
      %cst_65 = arith.constant 9.99999974E-6 : f32
      %185 = vector.broadcast %cst_65 : f32 to vector<1x1xf32>
      %186 = arith.addf %184, %185 : vector<1x1xf32>
      %187 = math.rsqrt %186 : vector<1x1xf32>
      %188 = vector.broadcast %187 : vector<1x1xf32> to vector<1x256xf32>
      %189 = arith.mulf %179, %188 : vector<1x256xf32>
      %190 = vector.shape_cast %134 : vector<256xf32> to vector<1x256xf32>
      %191 = arith.mulf %189, %190 : vector<1x256xf32>
      %192 = vector.shape_cast %136 : vector<256xf32> to vector<1x256xf32>
      %193 = arith.addf %191, %192 : vector<1x256xf32>
      %194 = arith.truncf %193 : vector<1x256xf32> to vector<1x256xbf16>
      %cst_66 = arith.constant dense<0.000000e+00> : vector<1x128xf32>
      %195 = tpu.matmul %194, %137, %cst_66 {dimension_numbers = #tpu.dot_dimension_numbers<[1], [0], [0], [1], [0, 0, 1, 1], [], []>} : vector<1x256xbf16>, vector<256x128xbf16>, vector<1x128xf32> -> vector<1x128xf32>
      %196 = vector.shape_cast %139 : vector<128xf32> to vector<1x128xf32>
      %197 = arith.addf %195, %196 : vector<1x128xf32>
      %198 = vector.shape_cast %197 : vector<1x128xf32> to vector<1x1x128xf32>
      %c0_67 = arith.constant 0 : index
      %c0_68 = arith.constant 0 : index
      %c0_69 = arith.constant 0 : index
      %199 = vector.load %arg14[%c0_67, %c0_68, %c0_69] : memref<1x1x128xf32, #tpu.memory_space<vmem>>, vector<1x1x128xf32>
      tpu.vector_store %arg14[%c0_67, %c0_68, %c0_69], %198 {strides = array<i32>} : memref<1x1x128xf32, #tpu.memory_space<vmem>>, vector<1x1x128xf32>,
    } else {
    }
    return
  }
  func.func @transform_0(%arg0: i32, %arg1: i32) -> (i32, i32, i32) {
    %c0_i32 = arith.constant 0 : i32
    %c0_i32_0 = arith.constant 0 : i32
    %c0_i32_1 = arith.constant 0 : i32
    return %arg0, %c0_i32, %c0_i32_0 : i32, i32, i32
  }
  func.func @transform_1(%arg0: i32, %arg1: i32) -> (i32, i32, i32) {
    %c0_i32 = arith.constant 0 : i32
    %c0_i32_0 = arith.constant 0 : i32
    %c0_i32_1 = arith.constant 0 : i32
    return %arg1, %c0_i32, %c0_i32_0 : i32, i32, i32
  }
  func.func @transform_2(%arg0: i32, %arg1: i32) -> (i32, i32, i32) {
    %c0_i32 = arith.constant 0 : i32
    %c0_i32_0 = arith.constant 0 : i32
    %c0_i32_1 = arith.constant 0 : i32
    return %arg1, %c0_i32, %c0_i32_0 : i32, i32, i32
  }
  func.func @transform_3(%arg0: i32, %arg1: i32) -> (i32, i32, i32) {
    %c0_i32 = arith.constant 0 : i32
    %c0_i32_0 = arith.constant 0 : i32
    %c0_i32_1 = arith.constant 0 : i32
    return %arg1, %c0_i32, %c0_i32_0 : i32, i32, i32
  }
  func.func @transform_4(%arg0: i32, %arg1: i32) -> (i32, i32, i32) {
    %c0_i32 = arith.constant 0 : i32
    %c0_i32_0 = arith.constant 0 : i32
    %c0_i32_1 = arith.constant 0 : i32
    return %arg1, %c0_i32, %c0_i32_0 : i32, i32, i32
  }
  func.func @transform_5(%arg0: i32, %arg1: i32) -> (i32, i32, i32) {
    %c0_i32 = arith.constant 0 : i32
    %c0_i32_0 = arith.constant 0 : i32
    %c0_i32_1 = arith.constant 0 : i32
    return %arg1, %c0_i32, %c0_i32_0 : i32, i32, i32
  }
  func.func @transform_6(%arg0: i32, %arg1: i32) -> (i32, i32, i32) {
    %c0_i32 = arith.constant 0 : i32
    %c0_i32_0 = arith.constant 0 : i32
    %c0_i32_1 = arith.constant 0 : i32
    return %arg1, %c0_i32, %c0_i32_0 : i32, i32, i32
  }
  func.func @transform_7(%arg0: i32, %arg1: i32) -> (i32, i32) {
    %c0_i32 = arith.constant 0 : i32
    %c0_i32_0 = arith.constant 0 : i32
    %c0_i32_1 = arith.constant 0 : i32
    return %c0_i32, %c0_i32_0 : i32, i32
  }
  func.func @transform_8(%arg0: i32, %arg1: i32) -> (i32, i32) {
    %c0_i32 = arith.constant 0 : i32
    %c0_i32_0 = arith.constant 0 : i32
    %c0_i32_1 = arith.constant 0 : i32
    return %c0_i32, %c0_i32_0 : i32, i32
  }
  func.func @transform_9(%arg0: i32, %arg1: i32) -> (i32, i32) {
    %c0_i32 = arith.constant 0 : i32
    %c0_i32_0 = arith.constant 0 : i32
    %c0_i32_1 = arith.constant 0 : i32
    return %c0_i32, %c0_i32_0 : i32, i32
  }
  func.func @transform_10(%arg0: i32, %arg1: i32) -> (i32, i32) {
    %c0_i32 = arith.constant 0 : i32
    %c0_i32_0 = arith.constant 0 : i32
    %c0_i32_1 = arith.constant 0 : i32
    return %c0_i32, %c0_i32_0 : i32, i32
  }
  func.func @transform_11(%arg0: i32, %arg1: i32) -> (i32, i32, i32) {
    %c0_i32 = arith.constant 0 : i32
    %c0_i32_0 = arith.constant 0 : i32
    %c0_i32_1 = arith.constant 0 : i32
    return %arg0, %c0_i32, %c0_i32_0 : i32, i32, i32
  }
  func.func @transform_12(%arg0: i32, %arg1: i32) -> (i32, i32, i32) {
    %c0_i32 = arith.constant 0 : i32
    %c0_i32_0 = arith.constant 0 : i32
    %c0_i32_1 = arith.constant 0 : i32
    return %arg0, %c0_i32, %c0_i32_0 : i32, i32, i32
  }
}

</mosaic_0001>

<bundles_post_ra>
// kernel: decoder_forward.1
= control target key start
LH: loop header
LB: loop body
LE: loop exit
PB: predicated region body
PF: predicated region fallthrough
CT: control target
= control target key end

     0   :  { %s8183_s0 = inlined_call_operand.hbm [shape: f32[2,16,256], index: 0, kind: input, shape index: {}]   ;;  %s8184_s1 = inlined_call_operand.hbm [shape: f32[2,8,256], index: 1, kind: input, shape index: {}]   ;;  %s8185_s2 = inlined_call_operand.hbm [shape: bf16[2,256,768], index: 2, kind: input, shape index: {}]   ;;  %s8186_s3 = inlined_call_operand.hbm [shape: bf16[2,256,256], index: 3, kind: input, shape index: {}]   ;;  %s8187_s4 = inlined_call_operand.hbm [shape: bf16[2,256,1024], index: 4, kind: input, shape index: {}]   ;;  %s8188_s5 = inlined_call_operand.hbm [shape: f32[2,1,1024], index: 5, kind: input, shape index: {}]   ;;  %s8189_s6 = inlined_call_operand.hbm [shape: bf16[2,1024,256], index: 6, kind: input, shape index: {}]   ;;  %s8190_s7 = inlined_call_operand.vmem [shape: f32[1,256], index: 7, kind: input, shape index: {}]   ;;  %s8191_s8 = inlined_call_operand.vmem [shape: f32[1,256], index: 8, kind: input, shape index: {}]   ;;  %s8192_s9 = inlined_call_operand.hbm [shape: bf16[256,128], index: 9, kind: input, shape index: {}]   ;;  %s8193_s10 = inlined_call_operand.vmem [shape: f32[1,128], index: 10, kind: input, shape index: {}]   ;;  %s8194_s11 = inlined_call_operand.vmem [shape: f32[2,6,128], index: 11, kind: output, shape index: {0}]   ;;  %s8195_s12 = inlined_call_operand.hbm [shape: f32[2,1,128], index: 12, kind: output, shape index: {1}]  }
   0x1   :  { %8221 = sst [smem:[#allocation33_spill]] %s8183_s0 }
   0x2   :  { %8222 = sst [smem:[#allocation34_spill]] %s8184_s1 }
   0x3   :  { %8223 = sst [smem:[#allocation35_spill]] %s8185_s2 }
   0x4   :  { %8224 = sst [smem:[#allocation36_spill]] %s8186_s3 }
   0x5   :  { %8225 = sst [smem:[#allocation37_spill]] %s8187_s4 }
   0x6   :  { %8226 = sst [smem:[#allocation38_spill]] %s8188_s5 }
   0x7   :  { %8227 = sst [smem:[#allocation39_spill]] %s8189_s6 }
   0x8   :  { %8228 = sst [smem:[#allocation40_spill]] %s8190_s7 }
   0x9   :  { %8229 = sst [smem:[#allocation41_spill]] %s8191_s8 }
   0xa   :  { %8230 = sst [smem:[#allocation42_spill]] %s8192_s9 }
   0xb   :  { %8231 = sst [smem:[#allocation43_spill]] %s8193_s10 }
   0xc   :  { %8232 = sst [smem:[#allocation44_spill]] %s8194_s11 }
   0xd   :  { %8233 = sst [smem:[#allocation45_spill]] %s8195_s12 }
   0xe   :  { %18 = vsyncpa [#allocation4], 0 }
   0xf   :  { %20 = vsyncpa [#allocation4 + $0x1], 0 }
  0x10   :  { %21 = vsyncpa [#allocation7], 0 }
  0x11   :  { %23 = vsyncpa [#allocation7 + $0x1], 0 }
  0x12   :  { %24 = vsyncpa [#allocation10], 0 }
  0x13   :  { %26 = vsyncpa [#allocation10 + $0x1], 0 }
  0x14   :  { %27 = vsyncpa [#allocation13], 0 }
  0x15   :  { %29 = vsyncpa [#allocation13 + $0x1], 0 }
  0x16   :  { %30 = vsyncpa [#allocation16], 0 }
  0x17   :  { %31 = vsyncpa [#allocation5], 0 }
  0x18   :  { %33 = vsyncpa [#allocation5 + $0x1], 0  ;;  %s6860_s21 = smov 0   ;;  %s6862_s22 = smov 0  }
  0x19   :  { %s6864_s23 = smov 0   ;;  %s6866_s24 = smov 0  }
  0x1a   :  { %s6868_s25 = smov 0   ;;  %s6870_s26 = smov 0  }
  0x1b   :  { %s6872_s27 = smov 0   ;;  %s6874_s28 = smov 0  }
  0x1c   :  { %s6876_s29 = smov 0   ;;  %s6878_s30 = smov 0  }
  0x1d   :  { %s6880_s13 = smov 0  }
  0x1e LB: > { %8234 = sst [smem:[#allocation24_spill]] %s6737_s23  ;;  %s48_s14 = sadd.s32 1, %s6761_s29  ;;  %s6769_s13 = sphi %s6880_s13, %s39_s13   ;;  %s6765_s30 = sphi %s6878_s30, %s8302_s30   ;;  %s6761_s29 = sphi %s6876_s29, %s8309_s29   ;;  %s6757_s28 = sphi %s6874_s28, %s8300_s28   ;;  %s6753_s27 = sphi %s6872_s27, %s8308_s27   ;;  %s6749_s26 = sphi %s6870_s26, %s8307_s26   ;;  %s6745_s25 = sphi %s6868_s25, %s8306_s25   ;;  %s6741_s24 = sphi %s6866_s24, %s8305_s24   ;;  %s6737_s23 = sphi %s6864_s23, %s8298_s23   ;;  %s6733_s22 = sphi %s6862_s22, %s8304_s22   ;;  %s6729_s21 = sphi %s6860_s21, %s8303_s21  }
  0x1f   : > { %8235 = sst [smem:[#allocation25_spill]] %s6753_s27  ;;  %p8200_p0 = scmp.eq.s32.totalorder %s6769_s13, 0 }
  0x20   : > { %8236 = sst [smem:[#allocation26_spill]] %s6757_s28  ;;  %p6917_p1 = scmp.ge.s32.totalorder %s48_s14, 2 }
  0x21   : > { %8237 = sst [smem:[#allocation27_spill]] %s6765_s30  ;;  %s84_s16 = sadd.s32 1, %s6737_s23 }
  0x22   : > { %s8238_s15 = scalar_select %p6917_p1, 1, 0 }
  0x23   : > { %p91_p2 = scmp.ne.s32.totalorder %s6737_s23, %s6733_s22  ;;  %s8311_s14 = smov (%p6917_p1, %s48_s14), 0 }
  0x24   : > { %8239 = sst [smem:[#allocation28_spill]] %s8311_s14  ;;  %p8199_p4 = scmp.lt.s32.totalorder %s6769_s13, 4 }
  0x25   : > { %p93_p3 = por %p91_p2, %p8200_p0  ;;  %s81_s17 = ssub.s32 %s6761_s29, %s8311_s14 }
  0x26   : > { %s6934_s18 = sand.u32 1, %s6769_s13   ;;  %p82_p5 = scmp.eq.s32.totalorder %s81_s17, 0 }
  0x27   : > { %s6937_s19 = sand.u32 1, %s6737_s23   ;;  %s5667_s20 = sshll.u32 %s6761_s29, 8 }
  0x28   : > { %s6941_s12 = scalar_select %p82_p5, %s6737_s23, %s84_s16  }
  0x29   : > { %s5226_s10 = sshll.u32 %s6937_s19, 4  ;;  %s8241_s1 = sld [smem:[#allocation34_spill]] }
  0x2a   : > { %8240 = sst [smem:[#allocation29_spill]] %s6941_s12  ;;  %p6951_p6 = pnand %p8199_p4, %p93_p3 }
  0x2b   : > { %s434_s17 = scalar_lea.vmem [#allocation6], %s5226_s10 }
  0x2c   : > { %s8242_s14 = scalar_select %p6951_p6, 1, 0 }
  0x2d   : > { %s442_s11 = sshll.u32 %s434_s17, 4  ;;  %p6962_p8 = pneg %p6951_p6  ;;  %s6955_s11 = int_to_ptr.vmem [resolvable:$true] %s442_s11 }
  0x2f   : > { %s6947_s27 = scalar_lea.hbm %s8241_s1, %s5667_s20  ;;  %s6398_s23 = scalar_lea.hbm %s8241_s1, 512 }
  0x30   : > { %s6393_s12 = scalar_lea.hbm %s6947_s27, 256  ;;  %p6399_p11 = scmp.lt.u32.totalorder %s6947_s27, %s8241_s1 }
  0x31   : > { %p6394_p7 = scmp.ne.s32.totalorder %s6947_s27, %s6393_s12  ;;  %p6400_p12 = scmp.lt.u32.totalorder %s6398_s23, %s6393_s12 }
  0x32   : > { %s8243_s7 = scalar_select %p6962_p8, 1, 0 }
  0x33   : > { %p6396_p9 = pnand %p6962_p8, %p6394_p7  ;;  %p6401_p13 = por %p6400_p12, %p6399_p11 }
  0x34   : > { %p6402_p2 = scmp.lt.u32.totalorder %s6393_s12, %s6947_s27 }
  0x35   : > { %p6397_p10 = pneg %p6396_p9 }
  0x36   : > { %p6403_p3 = por %p6402_p2, %p6401_p13 }
  0x38   : > { %p6404_p5 = pnand %p6403_p3, %p6397_p10 }
  0x3a   : > { %6407 = shalt.err (!%p6404_p5)
}
  0x3b   : > { %s6408_s16 = scalar_lea.vmem %s6955_s11, 256  ;;  %s6771_s8 = smov [#allocation6]  }
  0x3c   : > { %p6409_p7 = scmp.ne.s32.totalorder %s6955_s11, %s6408_s16  ;;  %s6413_s20 = sshll.u32 %s6771_s8, 4  ;;  %s6414_s20 = int_to_ptr.vmem [resolvable:$false] %s6413_s20 }
  0x3d   : > { %s6415_s10 = scalar_lea.vmem %s6414_s20, 512  ;;  %p6416_p0 = scmp.lt.s32.totalorder %s6955_s11, %s6414_s20 }
  0x3e   : > { %p6411_p9 = pnand %p6409_p7, %p6962_p8  ;;  %p6417_p1 = scmp.lt.s32.totalorder %s6415_s10, %s6408_s16 }
  0x40   : > { %p6412_p4 = pneg %p6411_p9  ;;  %p6418_p11 = por %p6417_p1, %p6416_p0 }
  0x42   : > { %p6419_p12 = pnand %p6418_p11, %p6412_p4 }
  0x44   : > { %6422 = shalt.err (!%p6419_p12)
}
  0x45   : > { %s8244_s12 = scalar_lea.sflag [#allocation7], %s6934_s18  ;;  %s5230_s23 = sshll.u32 %s6937_s19, 8 }
  0x46   : > { %5797 = dma.hbm_to_vmem [thread:$0]  (!%p6951_p6), %s6947_s27, 256, %s6955_s11, %s8244_s12  }
  0x47   : > { %s5668_s17 = sshll.u32 %s6761_s29, 12  ;;  %s8245_s3 = sld [smem:[#allocation36_spill]] }
  0x48   : > { %s474_s20 = scalar_lea.vmem [#allocation9], %s5230_s23  ;;  %s8210_s28 = scalar_lea.sflag [#allocation10], %s6934_s18 }
  0x49   : > { %s481_s10 = sshll.u32 %s474_s20, 4  ;;  %s6994_s10 = int_to_ptr.vmem [resolvable:$true] %s481_s10 }
  0x4d   : > { %s6992_s16 = scalar_lea.hbm %s8245_s3, %s5668_s17  ;;  %s6428_s1 = scalar_lea.hbm %s8245_s3, 8192 }
  0x4e   : > { %s6423_s6 = scalar_lea.hbm %s6992_s16, 4096  ;;  %p6429_p10 = scmp.lt.u32.totalorder %s6992_s16, %s8245_s3 }
  0x4f   : > { %p6424_p0 = scmp.ne.s32.totalorder %s6992_s16, %s6423_s6  ;;  %p6430_p13 = scmp.lt.u32.totalorder %s6428_s1, %s6423_s6 }
  0x50   : > { %p6432_p3 = scmp.lt.u32.totalorder %s6423_s6, %s6992_s16 }
  0x51   : > { %p6426_p1 = pnand %p6424_p0, %p6962_p8  ;;  %p6431_p2 = por %p6430_p13, %p6429_p10 }
  0x53   : > { %p6427_p4 = pneg %p6426_p1  ;;  %p6433_p5 = por %p6432_p3, %p6431_p2 }
  0x55   : > { %p6434_p7 = pnand %p6433_p5, %p6427_p4 }
  0x57   : > { %6437 = shalt.err (!%p6434_p7)
}
  0x58   : > { %s6438_s23 = scalar_lea.vmem %s6994_s10, 4096  ;;  %s6772_s8 = smov [#allocation9]  }
  0x59   : > { %p6439_p9 = scmp.ne.s32.totalorder %s6994_s10, %s6438_s23  ;;  %s6443_s20 = sshll.u32 %s6772_s8, 4  ;;  %s6444_s20 = int_to_ptr.vmem [resolvable:$false] %s6443_s20 }
  0x5a   : > { %s6445_s11 = scalar_lea.vmem %s6444_s20, 8192  ;;  %p6446_p0 = scmp.lt.s32.totalorder %s6994_s10, %s6444_s20 }
  0x5b   : > { %p6441_p11 = pnand %p6439_p9, %p6962_p8  ;;  %p6447_p1 = scmp.lt.s32.totalorder %s6445_s11, %s6438_s23 }
  0x5d   : > { %p6442_p12 = pneg %p6441_p11  ;;  %p6448_p10 = por %p6447_p1, %p6446_p0 }
  0x5f   : > { %p6449_p13 = pnand %p6448_p10, %p6442_p12 }
  0x61   : > { %6452 = shalt.err (!%p6449_p13)
}
  0x62   : > { %s8205_s6 = smov 128   ;;  %s8209_s27 = smov 8  }
  0x63   : > { %5803 = dma.hbm_to_vmem [thread:$0]  (!%p6951_p6), %s6992_s16, 4096, %s6994_s10, %s8210_s28, %s8205_s6, %s8205_s6, %s8209_s27  }
  0x64   : > { %s5236_s1 = sshll.u32 %s6937_s19, 3  ;;  %s5670_s12 = sshll.u32 %s6761_s29, 7 }
  0x65   : > { %s8246_s5 = sld [smem:[#allocation38_spill]]  ;;  %s516_s20 = scalar_lea.vmem [#allocation12], %s5236_s1 }
  0x66   : > { %s524_s11 = sshll.u32 %s516_s20, 4  ;;  %s8208_s3 = scalar_lea.sflag [#allocation13], %s6934_s18  ;;  %s525_s11 = int_to_ptr.vmem [resolvable:$true] %s524_s11 }
  0x6b   : > { %s7028_s8 = scalar_lea.hbm %s8246_s5, %s5670_s12  ;;  %s6458_s6 = scalar_lea.hbm %s8246_s5, 256 }
  0x6c   : > { %s6453_s4 = scalar_lea.hbm %s7028_s8, 128  ;;  %p6459_p5 = scmp.lt.u32.totalorder %s7028_s8, %s8246_s5 }
  0x6d   : > { %p6454_p4 = scmp.ne.s32.totalorder %s7028_s8, %s6453_s4  ;;  %p6460_p7 = scmp.lt.u32.totalorder %s6458_s6, %s6453_s4 }
  0x6e   : > { %p6462_p11 = scmp.lt.u32.totalorder %s6453_s4, %s7028_s8 }
  0x6f   : > { %p6456_p2 = pnand %p6454_p4, %p6962_p8  ;;  %p6461_p9 = por %p6460_p7, %p6459_p5 }
  0x71   : > { %p6457_p3 = pneg %p6456_p2  ;;  %p6463_p12 = por %p6462_p11, %p6461_p9 }
  0x73   : > { %p6464_p0 = pnand %p6463_p12, %p6457_p3 }
  0x75   : > { %6467 = shalt.err (!%p6464_p0)
}
  0x76   : > { %s6468_s1 = scalar_lea.vmem %s525_s11, 128  ;;  %s6775_s23 = smov [#allocation12]  }
  0x77   : > { %p6469_p1 = scmp.ne.s32.totalorder %s525_s11, %s6468_s1  ;;  %s6473_s20 = sshll.u32 %s6775_s23, 4  ;;  %s6474_s20 = int_to_ptr.vmem [resolvable:$false] %s6473_s20 }
  0x78   : > { %s6475_s16 = scalar_lea.vmem %s6474_s20, 256  ;;  %p6476_p4 = scmp.lt.s32.totalorder %s525_s11, %s6474_s20 }
  0x79   : > { %p6471_p10 = pnand %p6469_p1, %p6962_p8  ;;  %p6477_p2 = scmp.lt.s32.totalorder %s6475_s16, %s6468_s1 }
  0x7b   : > { %p6472_p13 = pneg %p6471_p10  ;;  %p6478_p6 = por %p6477_p2, %p6476_p4 }
  0x7d   : > { %p6479_p5 = pnand %p6478_p6, %p6472_p13 }
  0x7f   : > { %6482 = shalt.err (!%p6479_p5)
}
  0x80   : > { %p8247_p7 = scmp.ne.s32.totalorder %s8242_s14, 0  ;;  %s7051_s4 = sadd.s32 4294967295, %s6769_s13  }
  0x81   : > { %s5219_s6 = sadd.s32 4294967294, %s6769_s13   ;;  %p71_p6 = scmp.ne.s32.totalorder %s6745_s25, %s6741_s24 }
  0x82   : > { %5809 = dma.hbm_to_vmem [thread:$0]  (!%p8247_p7), %s7028_s8, 128, %s525_s11, %s8208_s3  }
  0x83   : > { %p8211_p3 = scmp.eq.s32.totalorder %s7051_s4, 0  ;;  %p97_p9 = scmp.ne.s32.totalorder %s6733_s22, %s6729_s21 }
  0x84   : > { %p367_p12 = scmp.eq.s32.totalorder %s5219_s6, 3  ;;  %p5220_p13 = scmp.ge.s32.totalorder %s6769_s13, 1 }
  0x85   : > { %p7062_p0 = por %p8211_p3, %p71_p6  ;;  %p7068_p1 = por %p97_p9, %p8211_p3 }
  0x86   : > { %p7072_p10 = por %p367_p12, %p71_p6  ;;  %p374_p4 = scmp.lt.s32.totalorder %s6769_s13, 5 }
  0x87   : > { %s8248_s8 = scalar_select %p7062_p0, 1, 0 }
  0x88   : > { %s8249_s11 = scalar_select %p7068_p1, 1, 0 }
  0x89   : > { %s8250_s10 = scalar_select %p7072_p10, 1, 0 }
  0x8a   : > { %p7078_p2 = pnand %p5220_p13, %p374_p4  ;;  %s6776_s17 = smov [#allocation15]  }
  0x8b   : > { %8251 = sst [smem:[#allocation30_spill]] %s8250_s10  ;;  %s392_s12 = sshll.u32 %s6776_s17, 4  ;;  %s393_s12 = int_to_ptr.vmem [resolvable:$true] %s392_s12 }
  0x8c   : > { %s8252_s21 = scalar_select %p7078_p2, 1, 0 }
  0x8d   : > { %p5787_p5 = pneg %p7078_p2  ;;  %s51_s23 = sadd.s32 1, %s6765_s30 }
  0x8e   : > { %s8254_s9 = sld [smem:[#allocation42_spill]] }
  0x8f   : > { %p7086_p9 = pnand %p5787_p5, %p8211_p3 }
  0x91   : > { %p6485_p13 = pneg %p7086_p9 }
  0x94   : > { %s6483_s3 = scalar_lea.hbm %s8254_s9, 2048 }
  0x95   : > { %p6484_p12 = scmp.ne.s32.totalorder %s8254_s9, %s6483_s3  ;;  %p6490_p5 = scmp.lt.u32.totalorder %s6483_s3, %s8254_s9 }
  0x97   : > { %p6486_p4 = pnand %p6485_p13, %p6484_p12 }
  0x99   : > { %p6487_p11 = pneg %p6486_p4 }
  0x9b   : > { %p6492_p3 = pnand %p6490_p5, %p6487_p11 }
  0x9d   : > { %6495 = shalt.err (!%p6492_p3)
}
  0x9e   : > { %s6496_s20 = scalar_lea.vmem %s393_s12, 2048  ;;  %p6504_p0 = scmp.lt.s32.totalorder %s393_s12, %s393_s12 }
  0x9f   : > { %p6497_p6 = scmp.ne.s32.totalorder %s393_s12, %s6496_s20  ;;  %p6505_p2 = scmp.lt.s32.totalorder %s6496_s20, %s6496_s20 }
  0xa1   : > { %p6499_p10 = pnand %p6497_p6, %p6485_p13  ;;  %p6506_p7 = por %p6505_p2, %p6504_p0 }
  0xa3   : > { %p6500_p1 = pneg %p6499_p10 }
  0xa5   : > { %p6507_p8 = pnand %p6506_p7, %p6500_p1 }
  0xa7   : > { %6510 = shalt.err (!%p6507_p8)
}
  0xa8   : > { %s6777_s28 = smov 64   ;;  %s6778_s3 = smov 4  }
  0xa9   : > { %5790 = dma.hbm_to_vmem [thread:$0]  (!%p7086_p9), %s8254_s9, 2048, %s393_s12, [#allocation16], %s6777_s28, %s6777_s28, %s6778_s3  }
  0xaa   : > { %p8255_p8 = scmp.ne.s32.totalorder %s8238_s15, 0  ;;  %p8256_p7 = scmp.ne.s32.totalorder %s6749_s26, %s6745_s25 }
  0xab   : > { %p8257_p3 = scmp.eq.s32.totalorder %s6769_s13, 0  ;;  %p8260_p1 = scmp.eq.s32.totalorder %s7051_s4, 3 }
  0xac   : > { %s8313_s23 = smov (!%p8255_p8, %s51_s23), %s6765_s30  ;;  %p8259_p0 = pmov %p8256_p7 }
  0xad   : > { %p7118_p11 = por %p8257_p3, %p8256_p7  ;;  %p53_p2 = scmp.ge.s32.totalorder %s8313_s23, 2 }
  0xae   : > { %p7127_p10 = por %p8260_p1, %p8259_p0  ;;  %s409_s12 = sand.u32 1, %s6749_s26  }
  0xaf   : > { %s5223_s15 = sshll.u32 %s409_s12, 5  ;;  %s8315_s23 = smov (%p53_p2, %s8313_s23), 0 }
  0xb0   : > { %s8261_s1 = scalar_select %p7127_p10, 1, 0 }
  0xb1   : > { %8262 = sst [smem:[#allocation31_spill]] %s8315_s23  ;;  %s5666_s16 = sshll.u32 %s6765_s30, 9 }
  0xb2   : > { %s55_s6 = ssub.s32 %s6765_s30, %s8315_s23  ;;  %s8263_s0 = sld [smem:[#allocation33_spill]] }
  0xb3   : > { %p56_p9 = scmp.eq.s32.totalorder %s55_s6, 0  ;;  %s413_s5 = scalar_lea.vmem [#allocation3], %s5223_s15 }
  0xb4   : > { %s420_s27 = sshll.u32 %s413_s5, 4  ;;  %p8264_p6 = scmp.lt.s32.totalorder %s6769_s13, 4  ;;  %s7142_s27 = int_to_ptr.vmem [resolvable:$true] %s420_s27 }
  0xb5   : > { %s8266_s23 = sadd.s32 1, %s6749_s26  ;;  %s5764_s17 = smul.u32 768, %s6937_s19 }
  0xb6   : > { %p7148_p12 = pnand %p8264_p6, %p7118_p11  ;;  %s7158_s28 = scalar_lea.sflag [#allocation4], %s409_s12 }
  0xb8   : > { %s7140_s3 = scalar_lea.hbm %s8263_s0, %s5666_s16  ;;  %p6513_p4 = pneg %p7148_p12 }
  0xb9   : > { %s7155_s16 = scalar_select %p56_p9, %s6749_s26, %s8266_s23  }
  0xba   : > { %s6511_s6 = scalar_lea.hbm %s7140_s3, 512  ;;  %s6516_s5 = scalar_lea.hbm %s8263_s0, 1024 }
  0xbb   : > { %8267 = sst [smem:[#allocation32_spill]] %s7155_s16  ;;  %p6512_p13 = scmp.ne.s32.totalorder %s7140_s3, %s6511_s6 }
  0xbc   : > { %p6517_p7 = scmp.lt.u32.totalorder %s7140_s3, %s8263_s0  ;;  %p6518_p3 = scmp.lt.u32.totalorder %s6516_s5, %s6511_s6 }
  0xbd   : > { %p6514_p5 = pnand %p6513_p4, %p6512_p13  ;;  %p6520_p0 = scmp.lt.u32.totalorder %s6511_s6, %s7140_s3 }
  0xbe   : > { %p6519_p11 = por %p6518_p3, %p6517_p7 }
  0xbf   : > { %p6515_p8 = pneg %p6514_p5 }
  0xc0   : > { %p6521_p1 = por %p6520_p0, %p6519_p11 }
  0xc2   : > { %p6522_p2 = pnand %p6521_p1, %p6515_p8 }
  0xc4   : > { %6525 = shalt.err (!%p6522_p2)
}
  0xc5   : > { %s6526_s23 = scalar_lea.vmem %s7142_s27, 512  ;;  %s6779_s12 = smov [#allocation3]  }
  0xc6   : > { %p6527_p9 = scmp.ne.s32.totalorder %s7142_s27, %s6526_s23  ;;  %s6531_s20 = sshll.u32 %s6779_s12, 4  ;;  %s6532_s20 = int_to_ptr.vmem [resolvable:$false] %s6531_s20 }
  0xc7   : > { %s6533_s30 = scalar_lea.vmem %s6532_s20, 1024  ;;  %p6534_p5 = scmp.lt.s32.totalorder %s7142_s27, %s6532_s20 }
  0xc8   : > { %p6529_p6 = pnand %p6527_p9, %p6513_p4  ;;  %p6535_p7 = scmp.lt.s32.totalorder %s6533_s30, %s6526_s23 }
  0xca   : > { %p6530_p13 = pneg %p6529_p6  ;;  %p6536_p3 = por %p6535_p7, %p6534_p5 }
  0xcc   : > { %p6537_p11 = pnand %p6536_p3, %p6530_p13 }
  0xce   : > { %6540 = shalt.err (!%p6537_p11)
}
  0xcf   : > { %s6780_s10 = smov 256   ;;  %s6781_s6 = smov 16  }
  0xd0   : > { %5794 = dma.hbm_to_vmem [thread:$0]  (!%p7148_p12), %s7140_s3, 512, %s7142_s27, %s7158_s28, %s6780_s10, %s6780_s10, %s6781_s6  }
  0xd1   : > { %s5765_s15 = smul.u32 12288, %s6761_s29  ;;  %s453_s5 = scalar_lea.vmem [#allocation8], %s5764_s17 }
  0xd2   : > { %s460_s12 = sshll.u32 %s453_s5, 4  ;;  %s8268_s2 = sld [smem:[#allocation35_spill]]  ;;  %s7194_s12 = int_to_ptr.vmem [resolvable:$true] %s460_s12 }
  0xd3   : > { %s5233_s0 = sshll.u32 %s6937_s19, 10  ;;  %p8269_p8 = scmp.ne.s32.totalorder %s8243_s7, 0 }
  0xd8   : > { %s7192_s30 = scalar_lea.hbm %s8268_s2, %s5765_s15  ;;  %s6546_s27 = scalar_lea.hbm %s8268_s2, 24576 }
  0xd9   : > { %s6541_s16 = scalar_lea.hbm %s7192_s30, 12288  ;;  %p6547_p1 = scmp.lt.u32.totalorder %s7192_s30, %s8268_s2 }
  0xda   : > { %p6542_p4 = scmp.ne.s32.totalorder %s7192_s30, %s6541_s16  ;;  %p6548_p2 = scmp.lt.u32.totalorder %s6546_s27, %s6541_s16 }
  0xdb   : > { %p6550_p6 = scmp.lt.u32.totalorder %s6541_s16, %s7192_s30 }
  0xdc   : > { %p6544_p12 = pnand %p6542_p4, %p8269_p8  ;;  %p6549_p9 = por %p6548_p2, %p6547_p1 }
  0xde   : > { %p6545_p0 = pneg %p6544_p12  ;;  %p6551_p13 = por %p6550_p6, %p6549_p9 }
  0xe0   : > { %p6552_p5 = pnand %p6551_p13, %p6545_p0 }
  0xe2   : > { %6555 = shalt.err (!%p6552_p5)
}
  0xe3   : > { %s6556_s10 = scalar_lea.vmem %s7194_s12, 12288  ;;  %s6782_s6 = smov [#allocation8]  }
  0xe4   : > { %p6557_p7 = scmp.ne.s32.totalorder %s7194_s12, %s6556_s10  ;;  %s6561_s15 = sshll.u32 %s6782_s6, 4  ;;  %s6562_s15 = int_to_ptr.vmem [resolvable:$false] %s6561_s15 }
  0xe5   : > { %s6563_s5 = scalar_lea.vmem %s6562_s15, 24576  ;;  %p6564_p4 = scmp.lt.s32.totalorder %s7194_s12, %s6562_s15 }
  0xe6   : > { %p6559_p3 = pnand %p6557_p7, %p8269_p8  ;;  %p6565_p12 = scmp.lt.s32.totalorder %s6563_s5, %s6556_s10 }
  0xe8   : > { %p6560_p11 = pneg %p6559_p3  ;;  %p6566_p1 = por %p6565_p12, %p6564_p4 }
  0xea   : > { %p6567_p2 = pnand %p6566_p1, %p6560_p11 }
  0xec   : > { %6570 = shalt.err (!%p6567_p2)
}
  0xed   : > { %s6783_s16 = smov 384   ;;  %s6784_s23 = smov 24  }
  0xee   : > { %p8270_p0 = scmp.ne.s32.totalorder %s8242_s14, 0  ;;  %s8271_s20 = scalar_lea.sflag [#allocation7], %s6934_s18 }
  0xef   : > { %s5669_s9 = sshll.u32 %s6761_s29, 14  ;;  %s8272_s17 = sld [smem:[#allocation37_spill]] }
  0xf0   : > { %5800 = dma.hbm_to_vmem [thread:$0]  (!%p8270_p0), %s7192_s30, 12288, %s7194_s12, %s8271_s20, %s6783_s16, %s6783_s16, %s6784_s23  }
  0xf1   : > { %s495_s10 = scalar_lea.vmem [#allocation11], %s5233_s0 }
  0xf2   : > { %s502_s6 = sshll.u32 %s495_s10, 4  ;;  %s7230_s6 = int_to_ptr.vmem [resolvable:$true] %s502_s6 }
  0xf5   : > { %s7226_s28 = scalar_lea.hbm %s8272_s17, %s5669_s9  ;;  %s6576_s5 = scalar_lea.hbm %s8272_s17, 32768 }
  0xf6   : > { %s6571_s15 = scalar_lea.hbm %s7226_s28, 16384  ;;  %p6577_p5 = scmp.lt.u32.totalorder %s7226_s28, %s8272_s17 }
  0xf7   : > { %p6572_p9 = scmp.ne.s32.totalorder %s7226_s28, %s6571_s15  ;;  %p6578_p7 = scmp.lt.u32.totalorder %s6576_s5, %s6571_s15 }
  0xf8   : > { %p6580_p11 = scmp.lt.u32.totalorder %s6571_s15, %s7226_s28 }
  0xf9   : > { %p6574_p6 = pnand %p6572_p9, %p8269_p8  ;;  %p6579_p3 = por %p6578_p7, %p6577_p5 }
  0xfb   : > { %p6575_p13 = pneg %p6574_p6  ;;  %p6581_p4 = por %p6580_p11, %p6579_p3 }
  0xfd   : > { %p6582_p12 = pnand %p6581_p4, %p6575_p13 }
  0xff   : > { %6585 = shalt.err (!%p6582_p12)
}
 0x100   : > { %s6586_s20 = scalar_lea.vmem %s7230_s6, 16384  ;;  %s6785_s3 = smov [#allocation11]  }
 0x101   : > { %p6587_p1 = scmp.ne.s32.totalorder %s7230_s6, %s6586_s20  ;;  %s6591_s27 = sshll.u32 %s6785_s3, 4  ;;  %s6592_s27 = int_to_ptr.vmem [resolvable:$false] %s6591_s27 }
 0x102   : > { %s6593_s10 = scalar_lea.vmem %s6592_s27, 32768  ;;  %p6594_p6 = scmp.lt.s32.totalorder %s7230_s6, %s6592_s27 }
 0x103   : > { %p6589_p2 = pnand %p6587_p1, %p8269_p8  ;;  %p6595_p10 = scmp.lt.s32.totalorder %s6593_s10, %s6586_s20 }
 0x105   : > { %p6590_p9 = pneg %p6589_p2  ;;  %p6596_p5 = por %p6595_p10, %p6594_p6 }
 0x107   : > { %p6597_p7 = pnand %p6596_p5, %p6590_p9 }
 0x109   : > { %6600 = shalt.err (!%p6597_p7)
}
 0x10a   : > { %s6786_s15 = smov 512   ;;  %s6787_s12 = smov 32  }
 0x10b   : > { %s8273_s30 = scalar_lea.sflag [#allocation10], %s6934_s18  ;;  %s8274_s23 = sld [smem:[#allocation39_spill]] }
 0x10c   : > { %5806 = dma.hbm_to_vmem [thread:$0]  (!%p8270_p0), %s7226_s28, 16384, %s7230_s6, %s8273_s30, %s6786_s15, %s6786_s15, %s6787_s12  }
 0x10d   : > { %s535_s27 = scalar_lea.vmem [#allocation14], %s5233_s0 }
 0x10e   : > { %s542_s10 = sshll.u32 %s535_s27, 4  ;;  %s7264_s10 = int_to_ptr.vmem [resolvable:$true] %s542_s10 }
 0x111   : > { %s8275_s3 = smov %s8274_s23  ;;  %s7260_s20 = scalar_lea.hbm %s8274_s23, %s5669_s9 }
 0x112   : > { %s6601_s2 = scalar_lea.hbm %s7260_s20, 16384  ;;  %s6606_s15 = scalar_lea.hbm %s8275_s3, 32768 }
 0x113   : > { %p6602_p10 = scmp.ne.s32.totalorder %s7260_s20, %s6601_s2  ;;  %p6607_p11 = scmp.lt.u32.totalorder %s7260_s20, %s8275_s3 }
 0x114   : > { %p6608_p4 = scmp.lt.u32.totalorder %s6606_s15, %s6601_s2  ;;  %p6610_p1 = scmp.lt.u32.totalorder %s6601_s2, %s7260_s20 }
 0x115   : > { %p6604_p13 = pnand %p6602_p10, %p8269_p8 }
 0x116   : > { %p6609_p12 = por %p6608_p4, %p6607_p11 }
 0x117   : > { %p6605_p3 = pneg %p6604_p13 }
 0x118   : > { %p6611_p2 = por %p6610_p1, %p6609_p12 }
 0x11a   : > { %p6612_p9 = pnand %p6611_p2, %p6605_p3 }
 0x11c   : > { %6615 = shalt.err (!%p6612_p9)
}
 0x11d   : > { %s6616_s0 = scalar_lea.vmem %s7264_s10, 16384  ;;  %s6788_s19 = smov [#allocation14]  }
 0x11e   : > { %p6617_p6 = scmp.ne.s32.totalorder %s7264_s10, %s6616_s0  ;;  %s6621_s30 = sshll.u32 %s6788_s19, 4  ;;  %s6622_s30 = int_to_ptr.vmem [resolvable:$false] %s6621_s30 }
 0x11f   : > { %s6623_s5 = scalar_lea.vmem %s6622_s30, 32768  ;;  %p6624_p10 = scmp.lt.s32.totalorder %s7264_s10, %s6622_s30 }
 0x120   : > { %p6619_p5 = pnand %p6617_p6, %p8269_p8  ;;  %p6625_p13 = scmp.lt.s32.totalorder %s6623_s5, %s6616_s0 }
 0x122   : > { %p6620_p7 = pneg %p6619_p5  ;;  %p6626_p11 = por %p6625_p13, %p6624_p10 }
 0x124   : > { %p6627_p4 = pnand %p6626_p11, %p6620_p7 }
 0x126   : > { %6630 = shalt.err (!%p6627_p4)
}
 0x127   : > { %s8276_s2 = smov 8   ;;  %s8277_s16 = smov 128  }
 0x128   : > { %s8278_s23 = scalar_lea.sflag [#allocation13], %s6934_s18  ;;  %p8279_p8 = scmp.ne.s32.totalorder %s8252_s21, 0 }
 0x129   : > { %5812 = dma.hbm_to_vmem [thread:$0]  (!%p8270_p0), %s7260_s20, 16384, %s7264_s10, %s8278_s23, %s8277_s16, %s8277_s16, %s8276_s2  }
 0x12a   : > { %554 = sbr.rel (%p8279_p8) target bundleno = 3423 (0xd5f), region = 64  ;;  %s7295_s7 = sand.u32 (!%p8279_p8), 1, %s6745_s25  }
 0x12b   : > { %s5243_s27 = sshll.u32 (!%p8279_p8), %s7295_s7, 5  ;;  %s557_s28 = scalar_lea.sflag (!%p8279_p8), [#allocation4], %s7295_s7 }
 0x12c   : > { %s7299_s14 = scalar_lea.vmem (!%p8279_p8), [#allocation3], %s5243_s27  ;;  %p8280_p3 = scmp.ne.s32.totalorder (!%p8279_p8), %s8248_s8, 0 }
 0x131   : > { %6704 = dma.done.wait (%p8280_p3), %s557_s28, 512  }
 0x132   : > { %6706 = vsyncadd (%p8280_p3), %s557_s28, 4294966784  ;;  %s565_s18 = sand.u32 1, %s7051_s4   ;;  %s567_s21 = sand.u32 1, %s6733_s22  }
 0x133   : > { %s5244_s20 = sshll.u32 %s567_s21, 4  ;;  %s566_s10 = scalar_lea.sflag [#allocation7], %s565_s18 }
 0x134   : > { %s7307_s6 = scalar_lea.vmem [#allocation6], %s5244_s20  ;;  %p8281_p0 = scmp.ne.s32.totalorder %s8249_s11, 0 }
 0x136   : > { %6708 = dma.done.wait (%p8281_p0), %s566_s10, 12544  }
 0x137   : > { %6710 = vsyncadd (%p8281_p0), %s566_s10, 4294954752  ;;  %s5766_s15 = smul.u32 768, %s567_s21  ;;  %s5245_s9 = sshll.u32 %s567_s21, 8 }
 0x138   : > { %s584_s8 = scalar_lea.sflag [#allocation10], %s565_s18  ;;  %s7315_s0 = scalar_lea.vmem [#allocation9], %s5245_s9 }
 0x139   : > { %s7313_s12 = scalar_lea.vmem [#allocation8], %s5766_s15 }
 0x13a   : > { %6712 = dma.done.wait (%p8281_p0), %s584_s8, 20480  }
 0x13b   : > { %6714 = vsyncadd (%p8281_p0), %s584_s8, 4294946816  ;;  %s5246_s19 = sshll.u32 %s567_s21, 10  ;;  %s5247_s30 = sshll.u32 %s567_s21, 3 }
 0x13c   : > { %s7321_s5 = scalar_lea.vmem [#allocation11], %s5246_s19  ;;  %s602_s2 = scalar_lea.sflag [#allocation13], %s565_s18 }
 0x13d   : > { %s7323_s16 = scalar_lea.vmem [#allocation12], %s5247_s30 }
 0x13e   : > { %6716 = dma.done.wait (%p8281_p0), %s602_s2, 16512  }
 0x13f   : > { %6718 = vsyncadd (%p8281_p0), %s602_s2, 4294950784  ;;  %s7329_s23 = scalar_lea.vmem [#allocation14], %s5246_s19  ;;  %p8282_p12 = scmp.eq.s32.totalorder %s7051_s4, 0 }
 0x141   : > { %6720 = dma.done.wait (%p8282_p12), [#allocation16], 2048   ;;  %p8283_p1 = pmov %p8282_p12 }
 0x142   : > { %s8284_s27 = sld [smem:[#allocation26_spill]]  ;;  %s8285_s20 = sld [smem:[#allocation44_spill]] }
 0x143   : > { %6722 = vsyncadd (%p8283_p1), [#allocation16], 4294965248  ;;  %s691_s11 = scalar_lea.vmem [#allocation17], %s7295_s7  ;;  %s8286_s15 = sld [smem:[#allocation25_spill]] }
 0x148   : > { %p692_p2 = scmp.lt.s32.totalorder %s8284_s27, 1 }
 0x149   : > { %p5251_p9 = scmp.ne.s32.totalorder %s8286_s15, 0 }
 0x14a   : > { %s8317_s27 = smov (!%p692_p2, %s8284_s27), 1  ;;  %v701_v0 = vld [vmem:[%s7299_s14] sm:$0xff] (!%p5251_p9)  ;;  %v702_v1 = vld [vmem:[%s7299_s14 + $0x8] sm:$0xff] (!%p5251_p9)  ;;  %v703_v2 = vld [vmem:[%s7299_s14 + $0x10] sm:$0xff] (!%p5251_p9) }
 0x14b   : > { %s5250_s28 = sshll.u32 %s8317_s27, 3  ;;  %700 = sbr.rel (%p5251_p9) target bundleno = 338 (0x152), region = 100  ;;  %705 = vst [vmem:[#allocation2] sm:$0xff] (!%p5251_p9), %v701_v0  ;;  %706 = vst [vmem:[#allocation2 + $0x8] sm:$0xff] (!%p5251_p9), %v702_v1  ;;  %v704_v3 = vld [vmem:[%s7299_s14 + $0x18] sm:$0xff] (!%p5251_p9) }
 0x14c   : > { %s7340_s10 = scalar_lea.vmem %s8285_s20, %s5250_s28  ;;  %707 = vst [vmem:[#allocation2 + $0x10] sm:$0xff] (!%p5251_p9), %v703_v2  ;;  %708 = vst [vmem:[#allocation2 + $0x18] sm:$0xff] (!%p5251_p9), %v704_v3 }
 0x152 PF: > { %v709_v4 = vld [vmem:[#allocation2] sm:$0xff]  ;;  %v710_v5 = vld [vmem:[#allocation2 + $0x8] sm:$0xff]  ;;  %v748_v61 = vlaneseq  ;;  %vm6790_vm0 = vmmov 0   ;;  %vm1889_vm1 = vcmask 130048   ;;  %s8287_s4 = sld [smem:[#allocation25_spill]] }
 0x153   : > { %v711_v6 = vld [vmem:[#allocation2 + $0x10] sm:$0xff]  ;;  %v715_v7 = vadd.f32 %v710_v5, %v709_v4  ;;  %v712_v8 = vld [vmem:[#allocation2 + $0x18] sm:$0xff]  ;;  %v5975_v56 = vld [vmem:[%s7313_s12 + $0xc] ss:$24 sps:$4 sm:$0xff]  }
 0x154   : > { %v718_v9 = vadd.f32 %v712_v8, %v711_v6  ;;  %v5925_v10 = vld [vmem:[%s7313_s12 + $0x4] ss:$24 sps:$4 sm:$0xff]   ;;  %v5927_v11 = vld [vmem:[%s7313_s12] ss:$24 sps:$4 sm:$0xff]   ;;  %v5928_v12 = vld [vmem:[%s7313_s12 + $0x34] ss:$24 sps:$4 sm:$0xff]  }
 0x155   : > { %716 = vadd.xlane.f32.xlu0 %v715_v7  ;;  %1350 = vmatprep.subr.bf16.mxu1 %v5925_v10  ;;  %v5930_v13 = vld [vmem:[%s7313_s12 + $0x30] ss:$24 sps:$4 sm:$0xff]   ;;  %v5931_v14 = vld [vmem:[%s7313_s12 + $0x64] ss:$24 sps:$4 sm:$0xff]   ;;  %v5933_v15 = vld [vmem:[%s7313_s12 + $0x60] ss:$24 sps:$4 sm:$0xff]  }
 0x156   : > { %1351 = vmatpush1.bf16.msra.mxu1 %v5927_v11  ;;  %v5934_v16 = vld [vmem:[%s7313_s12 + $0x94] ss:$24 sps:$4 sm:$0xff]   ;;  %v5936_v17 = vld [vmem:[%s7313_s12 + $0x90] ss:$24 sps:$4 sm:$0xff]   ;;  %v5937_v18 = vld [vmem:[%s7313_s12 + $0xc4] ss:$24 sps:$4 sm:$0xff]  }
 0x157   : > { %1352 = vmatprep.subr.bf16.mxu1 %v5928_v12  ;;  %v5939_v19 = vld [vmem:[%s7313_s12 + $0xc0] ss:$24 sps:$4 sm:$0xff]   ;;  %v5940_v20 = vld [vmem:[%s7313_s12 + $0xf4] ss:$24 sps:$4 sm:$0xff]   ;;  %v5942_v21 = vld [vmem:[%s7313_s12 + $0xf0] ss:$24 sps:$4 sm:$0xff]  }
 0x158   : > { %v5943_v22 = vld [vmem:[%s7313_s12 + $0x124] ss:$24 sps:$4 sm:$0xff]   ;;  %v5945_v23 = vld [vmem:[%s7313_s12 + $0x120] ss:$24 sps:$4 sm:$0xff]   ;;  %v5946_v24 = vld [vmem:[%s7313_s12 + $0x154] ss:$24 sps:$4 sm:$0xff]  }
 0x159   : > { %719 = vadd.xlane.f32.xlu0 %v718_v9  ;;  %v5948_v25 = vld [vmem:[%s7313_s12 + $0x150] ss:$24 sps:$4 sm:$0xff]   ;;  %v5949_v26 = vld [vmem:[%s7313_s12 + $0x184] ss:$24 sps:$4 sm:$0xff]   ;;  %v5951_v27 = vld [vmem:[%s7313_s12 + $0x180] ss:$24 sps:$4 sm:$0xff]  }
 0x15a   : > { %1353 = vmatpush1.bf16.msra.mxu1 %v5930_v13  ;;  %v5952_v28 = vld [vmem:[%s7313_s12 + $0x1b4] ss:$24 sps:$4 sm:$0xff]   ;;  %v5954_v43 = vld [vmem:[%s7313_s12 + $0x1b0] ss:$24 sps:$4 sm:$0xff]   ;;  %v5955_v44 = vld [vmem:[%s7313_s12 + $0x1e4] ss:$24 sps:$4 sm:$0xff]  }
 0x15b   : > { %1354 = vmatprep.subr.bf16.mxu1 %v5931_v14  ;;  %v5957_v45 = vld [vmem:[%s7313_s12 + $0x1e0] ss:$24 sps:$4 sm:$0xff]   ;;  %v5958_v46 = vld [vmem:[%s7313_s12 + $0x214] ss:$24 sps:$4 sm:$0xff]   ;;  %v5960_v47 = vld [vmem:[%s7313_s12 + $0x210] ss:$24 sps:$4 sm:$0xff]  }
 0x15c   : > { %v5961_v48 = vld [vmem:[%s7313_s12 + $0x244] ss:$24 sps:$4 sm:$0xff]   ;;  %v5963_v49 = vld [vmem:[%s7313_s12 + $0x240] ss:$24 sps:$4 sm:$0xff]   ;;  %v5964_v50 = vld [vmem:[%s7313_s12 + $0x274] ss:$24 sps:$4 sm:$0xff]  }
 0x15d   : > { %v5966_v51 = vld [vmem:[%s7313_s12 + $0x270] ss:$24 sps:$4 sm:$0xff]   ;;  %v5967_v52 = vld [vmem:[%s7313_s12 + $0x2a4] ss:$24 sps:$4 sm:$0xff]   ;;  %v5969_v53 = vld [vmem:[%s7313_s12 + $0x2a0] ss:$24 sps:$4 sm:$0xff]  }
 0x15e   : > { %1355 = vmatpush1.bf16.msra.mxu1 %v5933_v15  ;;  %v5970_v54 = vld [vmem:[%s7313_s12 + $0x2d4] ss:$24 sps:$4 sm:$0xff]   ;;  %v5972_v55 = vld [vmem:[%s7313_s12 + $0x2d0] ss:$24 sps:$4 sm:$0xff]   ;;  %v7381_v0 = vshrl.u32 %v748_v61, 7  ;;  %p5646_p6 = scmp.ne.s32.totalorder %s8287_s4, 1 }
 0x15f   : > { %1356 = vmatprep.subr.bf16.mxu1 %v5934_v16  ;;  %v7387_v2 = vld [vmem:[%s7307_s6 + $0x8] sm:$0xff]  ;;  %v7390_v3 = vld [vmem:[%s7307_s6] sm:$0xff]  ;;  %vm4692_vm2 = vcmask (!%p5646_p6), 1047554   ;;  %vm4890_vm3 = vcmask (!%p5646_p6), 1040384   ;;  %s8288_s9 = sld [smem:[#allocation40_spill]] (!%p5646_p6) }
 0x160   : > { %v7384_v1 = vsub.s32 0, %v7381_v0  ;;  %v6027_v61 = vld [vmem:[%s7313_s12 + $0x70] ss:$24 sps:$4 sm:$0xff]  }
 0x162   : > { %1357 = vmatpush1.bf16.msra.mxu1 %v5936_v17  ;;  %v755_v7 = vrot.slane %v7387_v2, %v7384_v1  ;;  %v751_v9 = vrot.slane %v7390_v3, %v7384_v1 }
 0x163   : > { %1358 = vmatprep.subr.bf16.mxu1 %v5937_v18 }
 0x166   : > { %1359 = vmatpush1.bf16.msra.mxu1 %v5939_v19 }
 0x167   : > { %1360 = vmatprep.subr.bf16.mxu1 %v5940_v20 }
 0x16a   : > { %1361 = vmatpush1.bf16.msra.mxu1 %v5942_v21 }
 0x16b   : > { %1362 = vmatprep.subr.bf16.mxu1 %v5943_v22 }
 0x16e   : > { %1363 = vmatpush1.bf16.msra.mxu1 %v5945_v23 }
 0x16f   : > { %1364 = vmatprep.subr.bf16.mxu1 %v5946_v24  ;;  %v5973_v24 = vld [vmem:[%s7313_s12 + $0x8] ss:$24 sps:$4 sm:$0xff]  }
 0x172   : > { %1365 = vmatpush1.bf16.msra.mxu1 %v5948_v25 }
 0x173   : > { %1366 = vmatprep.subr.bf16.mxu1 %v5949_v26  ;;  %v5978_v26 = vld [vmem:[%s7313_s12 + $0x3c] ss:$24 sps:$4 sm:$0xff]  }
 0x176   : > { %1367 = vmatpush1.bf16.msra.mxu1 %v5951_v27  ;;  %v5976_v27 = vld [vmem:[%s7313_s12 + $0x38] ss:$24 sps:$4 sm:$0xff]  }
 0x177   : > { %1368 = vmatprep.subr.bf16.mxu1 %v5952_v28  ;;  %v5981_v28 = vld [vmem:[%s7313_s12 + $0x6c] ss:$24 sps:$4 sm:$0xff]  }
 0x17a   : > { %1369 = vmatpush1.bf16.msra.mxu1 %v5954_v43  ;;  %v6000_v43 = vld [vmem:[%s7313_s12 + $0x1b8] ss:$24 sps:$4 sm:$0xff]  }
 0x17b   : > { %1370 = vmatprep.subr.bf16.mxu1 %v5955_v44  ;;  %v6005_v44 = vld [vmem:[%s7313_s12 + $0x1ec] ss:$24 sps:$4 sm:$0xff]  }
 0x17e   : > { %1371 = vmatpush1.bf16.msra.mxu1 %v5957_v45  ;;  %v6003_v45 = vld [vmem:[%s7313_s12 + $0x1e8] ss:$24 sps:$4 sm:$0xff]  }
 0x17f   : > { %1372 = vmatprep.subr.bf16.mxu1 %v5958_v46  ;;  %v6008_v46 = vld [vmem:[%s7313_s12 + $0x21c] ss:$24 sps:$4 sm:$0xff]  }
 0x182   : > { %1373 = vmatpush1.bf16.msra.mxu1 %v5960_v47  ;;  %v6006_v47 = vld [vmem:[%s7313_s12 + $0x218] ss:$24 sps:$4 sm:$0xff]  }
 0x183   : > { %1374 = vmatprep.subr.bf16.mxu1 %v5961_v48  ;;  %v6011_v48 = vld [vmem:[%s7313_s12 + $0x24c] ss:$24 sps:$4 sm:$0xff]  }
 0x186   : > { %1375 = vmatpush1.bf16.msra.mxu1 %v5963_v49  ;;  %v6009_v49 = vld [vmem:[%s7313_s12 + $0x248] ss:$24 sps:$4 sm:$0xff]  }
 0x187   : > { %1376 = vmatprep.subr.bf16.mxu1 %v5964_v50  ;;  %v6014_v50 = vld [vmem:[%s7313_s12 + $0x27c] ss:$24 sps:$4 sm:$0xff]  }
 0x18a   : > { %1377 = vmatpush1.bf16.msra.mxu1 %v5966_v51  ;;  %v6012_v51 = vld [vmem:[%s7313_s12 + $0x278] ss:$24 sps:$4 sm:$0xff]  }
 0x18b   : > { %1378 = vmatprep.subr.bf16.mxu1 %v5967_v52  ;;  %v6017_v52 = vld [vmem:[%s7313_s12 + $0x2ac] ss:$24 sps:$4 sm:$0xff]  }
 0x18e   : > { %1379 = vmatpush1.bf16.msra.mxu1 %v5969_v53  ;;  %v6015_v53 = vld [vmem:[%s7313_s12 + $0x2a8] ss:$24 sps:$4 sm:$0xff]  }
 0x18f   : > { %1380 = vmatprep.subr.bf16.mxu1 %v5970_v54  ;;  %v6020_v54 = vld [vmem:[%s7313_s12 + $0x2dc] ss:$24 sps:$4 sm:$0xff]  }
 0x192   : > { %1381 = vmatpush1.bf16.msra.mxu1 %v5972_v55  ;;  %v6018_v55 = vld [vmem:[%s7313_s12 + $0x2d8] ss:$24 sps:$4 sm:$0xff]  }
 0x193   : > { %1393 = vmatprep.subr.bf16.mxu1 %v5975_v56  ;;  %v6023_v56 = vld [vmem:[%s7313_s12 + $0x14] ss:$24 sps:$4 sm:$0xff]  }
 0x1e2   : > { %v717_v29 = vpop.xlane.xlu0 %716 }
 0x1e3   : > { %v722_v30 = vmul.f32 0.00390625, %v717_v29  ;;  %v5979_v29 = vld [vmem:[%s7313_s12 + $0x68] ss:$24 sps:$4 sm:$0xff]  }
 0x1e5   : > { %v724_v31 = vsub.f32 %v709_v4, %v722_v30  ;;  %v725_v32 = vsub.f32 %v710_v5, %v722_v30  ;;  %v7393_v5 = vsub.s32 1, %v7381_v0  ;;  %v5984_v30 = vld [vmem:[%s7313_s12 + $0x9c] ss:$24 sps:$4 sm:$0xff]  }
 0x1e6   : > { %v720_v33 = vpop.xlane.xlu0 %719 }
 0x1e7   : > { %v723_v34 = vmul.f32 0.00390625, %v720_v33  ;;  %v728_v35 = vmul.f32 %v724_v31, %v724_v31  ;;  %v729_v36 = vmul.f32 %v725_v32, %v725_v32  ;;  %v767_v11 = vrot.slane %v7387_v2, %v7393_v5  ;;  %v5985_v33 = vld [vmem:[%s7313_s12 + $0xc8] ss:$24 sps:$4 sm:$0xff]  }
 0x1e8   : > { %v763_v12 = vrot.slane %v7390_v3, %v7393_v5 }
 0x1e9   : > { %v726_v37 = vsub.f32 %v711_v6, %v723_v34  ;;  %v727_v38 = vsub.f32 %v712_v8, %v723_v34  ;;  %v732_v39 = vadd.f32 %v729_v36, %v728_v35  ;;  %v5990_v34 = vld [vmem:[%s7313_s12 + $0xfc] ss:$24 sps:$4 sm:$0xff]   ;;  %v5988_v35 = vld [vmem:[%s7313_s12 + $0xf8] ss:$24 sps:$4 sm:$0xff]   ;;  %v5993_v36 = vld [vmem:[%s7313_s12 + $0x12c] ss:$24 sps:$4 sm:$0xff]  }
 0x1eb   : > { %733 = vadd.xlane.f32.xlu1 %v732_v39  ;;  %v730_v40 = vmul.f32 %v726_v37, %v726_v37  ;;  %v731_v41 = vmul.f32 %v727_v38, %v727_v38  ;;  %v5994_v39 = vld [vmem:[%s7313_s12 + $0x158] ss:$24 sps:$4 sm:$0xff]  }
 0x1ed   : > { %v735_v42 = vadd.f32 %v731_v41, %v730_v40  ;;  %v5999_v40 = vld [vmem:[%s7313_s12 + $0x18c] ss:$24 sps:$4 sm:$0xff]   ;;  %v5997_v41 = vld [vmem:[%s7313_s12 + $0x188] ss:$24 sps:$4 sm:$0xff]  }
 0x1ef   : > { %736 = vadd.xlane.f32.xlu1 %v735_v42  ;;  %v6002_v42 = vld [vmem:[%s7313_s12 + $0x1bc] ss:$24 sps:$4 sm:$0xff]  }
 0x278   : > { %v734_v57 = vpop.xlane.xlu1 %733 }
 0x279   : > { %v738_v58 = vmul.f32 0.00390625, %v734_v57  ;;  %v6021_v57 = vld [vmem:[%s7313_s12 + $0x10] ss:$24 sps:$4 sm:$0xff]  }
 0x27b   : > { %v740_v59 = vadd.f32 1e-05, %v738_v58  ;;  %v6026_v58 = vld [vmem:[%s7313_s12 + $0x44] ss:$24 sps:$4 sm:$0xff]  }
 0x27c   : > { %v737_v60 = vpop.xlane.xlu1 %736 }
 0x27d   : > { %6309 = vrsqrt.f32 %v740_v59  ;;  %v739_v62 = vmul.f32 0.00390625, %v737_v60  ;;  %v6024_v59 = vld [vmem:[%s7313_s12 + $0x40] ss:$24 sps:$4 sm:$0xff]   ;;  %v6029_v60 = vld [vmem:[%s7313_s12 + $0x74] ss:$24 sps:$4 sm:$0xff]  }
 0x27f   : > { %v741_v63 = vadd.f32 1e-05, %v739_v62  ;;  %v6032_v62 = vld [vmem:[%s7313_s12 + $0xa4] ss:$24 sps:$4 sm:$0xff]  }
 0x281   : > { %6311 = vrsqrt.f32 %v741_v63  ;;  %v6030_v63 = vld [vmem:[%s7313_s12 + $0xa0] ss:$24 sps:$4 sm:$0xff]  }
 0x287   : > { %v6310_v4 = vpop.eup %6309 }
 0x288   : > { %v745_v6 = vmul.f32 %v6310_v4, %v725_v32  ;;  %v744_v8 = vmul.f32 %v6310_v4, %v724_v31  ;;  %v5982_v31 = vld [vmem:[%s7313_s12 + $0x98] ss:$24 sps:$4 sm:$0xff]   ;;  %v5987_v32 = vld [vmem:[%s7313_s12 + $0xcc] ss:$24 sps:$4 sm:$0xff]  }
 0x289   : > { %v6035_v4 = vld [vmem:[%s7313_s12 + $0xd4] ss:$24 sps:$4 sm:$0xff]  }
 0x28a   : > { %v757_v14 = vmul.f32 %v755_v7, %v745_v6  ;;  %v756_v16 = vmul.f32 %v751_v9, %v744_v8  ;;  %v6033_v6 = vld [vmem:[%s7313_s12 + $0xd0] ss:$24 sps:$4 sm:$0xff]   ;;  %v6036_v8 = vld [vmem:[%s7313_s12 + $0x100] ss:$24 sps:$4 sm:$0xff]  }
 0x28b   : > { %v6312_v10 = vpop.eup %6311 }
 0x28c   : > { %v747_v13 = vmul.f32 %v6312_v10, %v727_v38  ;;  %v746_v15 = vmul.f32 %v6312_v10, %v726_v37  ;;  %v769_v19 = vadd.f32 %v767_v11, %v757_v14  ;;  %v768_v21 = vadd.f32 %v763_v12, %v756_v16  ;;  %v5991_v37 = vld [vmem:[%s7313_s12 + $0x128] ss:$24 sps:$4 sm:$0xff]   ;;  %v5996_v38 = vld [vmem:[%s7313_s12 + $0x15c] ss:$24 sps:$4 sm:$0xff]  }
 0x28d   : > { %v6039_v10 = vld [vmem:[%s7313_s12 + $0x130] ss:$24 sps:$4 sm:$0xff]   ;;  %v6048_v16 = vld [vmem:[%s7313_s12 + $0x1c0] ss:$24 sps:$4 sm:$0xff]  }
 0x28e   : > { %v759_v17 = vmul.f32 %v755_v7, %v747_v13  ;;  %v758_v18 = vmul.f32 %v751_v9, %v746_v15  ;;  %v6038_v7 = vld [vmem:[%s7313_s12 + $0x104] ss:$24 sps:$4 sm:$0xff]   ;;  %v6041_v9 = vld [vmem:[%s7313_s12 + $0x134] ss:$24 sps:$4 sm:$0xff]   ;;  %v6045_v14 = vld [vmem:[%s7313_s12 + $0x190] ss:$24 sps:$4 sm:$0xff]  }
 0x28f   : > { %v6047_v13 = vld [vmem:[%s7313_s12 + $0x194] ss:$24 sps:$4 sm:$0xff]   ;;  %v6050_v15 = vld [vmem:[%s7313_s12 + $0x1c4] ss:$24 sps:$4 sm:$0xff]  }
 0x290   : > { %v771_v20 = vadd.f32 %v767_v11, %v759_v17  ;;  %v770_v22 = vadd.f32 %v763_v12, %v758_v18  ;;  %v6044_v11 = vld [vmem:[%s7313_s12 + $0x164] ss:$24 sps:$4 sm:$0xff]   ;;  %v6042_v12 = vld [vmem:[%s7313_s12 + $0x160] ss:$24 sps:$4 sm:$0xff]   ;;  %v6053_v17 = vld [vmem:[%s7313_s12 + $0x1f4] ss:$24 sps:$4 sm:$0xff]  }
 0x291   : > { %v6051_v18 = vld [vmem:[%s7313_s12 + $0x1f0] ss:$24 sps:$4 sm:$0xff]  }
 0x292   : > { %v7403_v23 = vpack.c.bf16 %v771_v20, %v769_v19  ;;  %v7406_v25 = vpack.c.bf16 %v770_v22, %v768_v21  ;;  %v6056_v19 = vld [vmem:[%s7313_s12 + $0x224] ss:$24 sps:$4 sm:$0xff]   ;;  %v6054_v20 = vld [vmem:[%s7313_s12 + $0x220] ss:$24 sps:$4 sm:$0xff]   ;;  %v6059_v21 = vld [vmem:[%s7313_s12 + $0x254] ss:$24 sps:$4 sm:$0xff]  }
 0x293   : > { %v6057_v22 = vld [vmem:[%s7313_s12 + $0x250] ss:$24 sps:$4 sm:$0xff]  }
 0x294   : > { %1382 = vmatprep.mubr.bf16.mxu1 %v7403_v23 }
 0x295   : > { %1383 = vmatmul.mubr.bf16.vlgmr.msra.gmra.mrb[0].mxu1 %v7406_v25 }
 0x296   : > { %1394 = vmatpush1.bf16.msra.mxu1 %v5973_v24  ;;  %1425 = vmatprep.mubr.bf16.mxu1 %v7403_v23  ;;  %v6060_v24 = vld [vmem:[%s7313_s12 + $0x280] ss:$24 sps:$4 sm:$0xff]  }
 0x297   : > { %1395 = vmatprep.subr.bf16.mxu1 %v5978_v26  ;;  %v6065_v26 = vld [vmem:[%s7313_s12 + $0x2b4] ss:$24 sps:$4 sm:$0xff]  }
 0x29a   : > { %1396 = vmatpush1.bf16.msra.mxu1 %v5976_v27  ;;  %v6063_v27 = vld [vmem:[%s7313_s12 + $0x2b0] ss:$24 sps:$4 sm:$0xff]  }
 0x29b   : > { %1397 = vmatprep.subr.bf16.mxu1 %v5981_v28  ;;  %v6068_v28 = vld [vmem:[%s7313_s12 + $0x2e4] ss:$24 sps:$4 sm:$0xff]  }
 0x29e   : > { %1398 = vmatpush1.bf16.msra.mxu1 %v5979_v29  ;;  %v6066_v29 = vld [vmem:[%s7313_s12 + $0x2e0] ss:$24 sps:$4 sm:$0xff]  }
 0x29f   : > { %1399 = vmatprep.subr.bf16.mxu1 %v5984_v30 }
 0x2a2   : > { %1400 = vmatpush1.bf16.msra.mxu1 %v5982_v31 }
 0x2a3   : > { %1401 = vmatprep.subr.bf16.mxu1 %v5987_v32 }
 0x2a6   : > { %1402 = vmatpush1.bf16.msra.mxu1 %v5985_v33 }
 0x2a7   : > { %1403 = vmatprep.subr.bf16.mxu1 %v5990_v34 }
 0x2aa   : > { %1404 = vmatpush1.bf16.msra.mxu1 %v5988_v35 }
 0x2ab   : > { %1405 = vmatprep.subr.bf16.mxu1 %v5993_v36 }
 0x2ae   : > { %1406 = vmatpush1.bf16.msra.mxu1 %v5991_v37 }
 0x2af   : > { %1407 = vmatprep.subr.bf16.mxu1 %v5996_v38 }
 0x2b2   : > { %1408 = vmatpush1.bf16.msra.mxu1 %v5994_v39 }
 0x2b3   : > { %1409 = vmatprep.subr.bf16.mxu1 %v5999_v40  ;;  %v6789_v40 = vmov 0.0  }
 0x2b4   : > { %5724 = vmatprep.subr.bf16.mxu0 %v6789_v40  ;;  %5726 = vmatprep.mubr.msk.bf16.mxu0 %vm6790_vm0, %v6789_v40 }
 0x2b6   : > { %1410 = vmatpush1.bf16.msra.mxu1 %v5997_v41 }
 0x2b7   : > { %1411 = vmatprep.subr.bf16.mxu1 %v6002_v42 }
 0x2ba   : > { %1412 = vmatpush1.bf16.msra.mxu1 %v6000_v43 }
 0x2bb   : > { %1413 = vmatprep.subr.bf16.mxu1 %v6005_v44 }
 0x2be   : > { %1414 = vmatpush1.bf16.msra.mxu1 %v6003_v45 }
 0x2bf   : > { %1415 = vmatprep.subr.bf16.mxu1 %v6008_v46 }
 0x2c2   : > { %1416 = vmatpush1.bf16.msra.mxu1 %v6006_v47 }
 0x2c3   : > { %1417 = vmatprep.subr.bf16.mxu1 %v6011_v48 }
 0x2c6   : > { %1418 = vmatpush1.bf16.msra.mxu1 %v6009_v49 }
 0x2c7   : > { %1419 = vmatprep.subr.bf16.mxu1 %v6014_v50  ;;  %v6791_v50 = vmov 1983009808  }
 0x2ca   : > { %1420 = vmatpush1.bf16.msra.mxu1 %v6012_v51  ;;  %v1518_v51 = vunpack.c.l.s4 %v6791_v50 }
 0x2cb   : > { %1421 = vmatprep.subr.bf16.mxu1 %v6017_v52 }
 0x2ce   : > { %1422 = vmatpush1.bf16.msra.mxu1 %v6015_v53  ;;  %v1519_v53 = vunpack.c.0.s8 %v1518_v51 }
 0x2cf   : > { %1423 = vmatprep.subr.bf16.mxu1 %v6020_v54  ;;  %v6792_v54 = vmov 1934713408  }
 0x2d2   : > { %1424 = vmatpush1.bf16.msra.mxu1 %v6018_v55  ;;  %v1549_v55 = vunpack.c.l.s4 %v6792_v54 }
 0x2d3   : > { %1436 = vmatprep.subr.bf16.mxu1 %v6023_v56  ;;  %v6793_v56 = vmov 0  }
 0x2d5   : > { %1426 = vmatmul.mubr.bf16.vlgmr.msra.gmra.mrb[4].mxu1 %v7406_v25 }
 0x2d6   : > { %1437 = vmatpush1.bf16.msra.mxu1 %v6021_v57  ;;  %1468 = vmatprep.mubr.bf16.mxu1 %v7403_v23  ;;  %v6062_v23 = vld [vmem:[%s7313_s12 + $0x284] ss:$24 sps:$4 sm:$0xff]   ;;  %v1510_v57 = vpack.i.b16 %v6793_v56, %v6793_v56 }
 0x2d7   : > { %1438 = vmatprep.subr.bf16.mxu1 %v6026_v58 }
 0x2da   : > { %1439 = vmatpush1.bf16.msra.mxu1 %v6024_v59 }
 0x2db   : > { %1440 = vmatprep.subr.bf16.mxu1 %v6029_v60 }
 0x2de   : > { %1441 = vmatpush1.bf16.msra.mxu1 %v6027_v61 }
 0x2df   : > { %1442 = vmatprep.subr.bf16.mxu1 %v6032_v62 }
 0x2e2   : > { %1443 = vmatpush1.bf16.msra.mxu1 %v6030_v63  ;;  %v7483_v63 = vsub.s32 %v1519_v53, %v7381_v0 }
 0x2e3   : > { %1444 = vmatprep.subr.bf16.mxu1 %v6035_v4  ;;  %v1550_v4 = vunpack.c.0.s8 %v1549_v55 }
 0x2e6   : > { %1445 = vmatpush1.bf16.msra.mxu1 %v6033_v6 }
 0x2e7   : > { %1446 = vmatprep.subr.bf16.mxu1 %v6038_v7 }
 0x2ea   : > { %1447 = vmatpush1.bf16.msra.mxu1 %v6036_v8 }
 0x2eb   : > { %1448 = vmatprep.subr.bf16.mxu1 %v6041_v9 }
 0x2ee   : > { %1449 = vmatpush1.bf16.msra.mxu1 %v6039_v10 }
 0x2ef   : > { %1450 = vmatprep.subr.bf16.mxu1 %v6044_v11 }
 0x2f2   : > { %1451 = vmatpush1.bf16.msra.mxu1 %v6042_v12 }
 0x2f3   : > { %1452 = vmatprep.subr.bf16.mxu1 %v6047_v13  ;;  %v7486_v13 = vsub.s32 %v1550_v4, %v7381_v0 }
 0x2f6   : > { %1453 = vmatpush1.bf16.msra.mxu1 %v6045_v14 }
 0x2f7   : > { %1454 = vmatprep.subr.bf16.mxu1 %v6050_v15 }
 0x2fa   : > { %1455 = vmatpush1.bf16.msra.mxu1 %v6048_v16 }
 0x2fb   : > { %1456 = vmatprep.subr.bf16.mxu1 %v6053_v17 }
 0x2fe   : > { %1457 = vmatpush1.bf16.msra.mxu1 %v6051_v18 }
 0x2ff   : > { %1458 = vmatprep.subr.bf16.mxu1 %v6056_v19 }
 0x302   : > { %1459 = vmatpush1.bf16.msra.mxu1 %v6054_v20 }
 0x303   : > { %1460 = vmatprep.subr.bf16.mxu1 %v6059_v21 }
 0x306   : > { %1461 = vmatpush1.bf16.msra.mxu1 %v6057_v22 }
 0x307   : > { %1462 = vmatprep.subr.bf16.mxu1 %v6062_v23 }
 0x30a   : > { %1463 = vmatpush1.bf16.msra.mxu1 %v6060_v24 }
 0x30b   : > { %1464 = vmatprep.subr.bf16.mxu1 %v6065_v26 }
 0x30e   : > { %1465 = vmatpush1.bf16.msra.mxu1 %v6063_v27 }
 0x30f   : > { %1466 = vmatprep.subr.bf16.mxu1 %v6068_v28 }
 0x312   : > { %1467 = vmatpush1.bf16.msra.mxu1 %v6066_v29 }
 0x313   : > { %5736 = vmatprep.subr.bf16.mxu1 %v6789_v40 }
 0x315   : > { %1469 = vmatmul.mubr.bf16.vlgmr.msra.gmra.mrb[8].mxu1 %v7406_v25 }
 0x316   : > { %5738 = vmatprep.mubr.msk.bf16.mxu1 %vm6790_vm0, %v6789_v40 }
 0x368   : > { %v1384_v30 = vpop.f32.mrb[0].mxu1 }
 0x369   : > { %v1386_v31 = vpop.f32.mrb[1].mxu1 }
 0x36a   : > { %v1388_v32 = vpop.f32.mrb[2].mxu1 }
 0x36b   : > { %v1479_v33 = vpack.c.bf16 %v1388_v32, %v1384_v30  ;;  %v1390_v34 = vpop.f32.mrb[3].mxu1 }
 0x36c   : > { %v1480_v35 = vpack.c.bf16 %v1390_v34, %v1386_v31 }
 0x36d   : > { %v1489_v36 = vshrl.u32 %v1479_v33, 16 }
 0x36e   : > { %v1487_v37 = vpack.i.b16 %v1480_v35, %v1479_v33  ;;  %v1490_v38 = vshrl.u32 %v1480_v35, 16 }
 0x370   : > { %v1491_v39 = vpack.i.b16 %v1490_v38, %v1489_v36 }
 0x3a8   : > { %v1427_v25 = vpop.f32.mrb[4].mxu1 }
 0x3a9   : > { %v1429_v41 = vpop.f32.mrb[5].mxu1 }
 0x3aa   : > { %v1431_v42 = vpop.f32.mrb[6].mxu1 }
 0x3ab   : > { %v1481_v43 = vpack.c.bf16 %v1431_v42, %v1427_v25  ;;  %v1433_v44 = vpop.f32.mrb[7].mxu1 }
 0x3ac   : > { %v1482_v45 = vpack.c.bf16 %v1433_v44, %v1429_v41 }
 0x3ad   : > { %v1497_v46 = vshrl.u32 %v1481_v43, 16 }
 0x3ae   : > { %v1495_v47 = vpack.i.b16 %v1482_v45, %v1481_v43  ;;  %v1498_v48 = vshrl.u32 %v1482_v45, 16 }
 0x3b0   : > { %v1499_v49 = vpack.i.b16 %v1498_v48, %v1497_v46  ;;  %v1531_v6 = vcombine.high %v1495_v47, %v1510_v57  ;;  %v1538_v14 = vrot.slane %v1495_v47, %v7483_v63 }
 0x3b2   : > { %v1545_v15 = vrot.slane %v1531_v6, %v7483_v63  ;;  %v1598_v16 = vcombine.high %v1499_v49, %v1510_v57  ;;  %v1605_v26 = vrot.slane %v1499_v49, %v7483_v63 }
 0x3b4   : > { %v1612_v27 = vrot.slane %v1598_v16, %v7483_v63 }
 0x3e8   : > { %v1470_v52 = vpop.f32.mrb[8].mxu1 }
 0x3e9   : > { %v1472_v58 = vpop.f32.mrb[9].mxu1 }
 0x3ea   : > { %v1474_v59 = vpop.f32.mrb[10].mxu1 }
 0x3eb   : > { %v1483_v60 = vpack.c.bf16 %v1474_v59, %v1470_v52  ;;  %v1476_v61 = vpop.f32.mrb[11].mxu1 }
 0x3ec   : > { %v1484_v62 = vpack.c.bf16 %v1476_v61, %v1472_v58 }
 0x3ed   : > { %v1505_v7 = vshrl.u32 %v1483_v60, 16 }
 0x3ee   : > { %v1503_v8 = vpack.i.b16 %v1484_v62, %v1483_v60  ;;  %v1506_v9 = vshrl.u32 %v1484_v62, 16 }
 0x3f0   : > { %v1507_v10 = vpack.i.b16 %v1506_v9, %v1505_v7  ;;  %v1515_v11 = vcombine.low %v1487_v37, %v1503_v8  ;;  %v1516_v12 = vcombine.high %v1487_v37, %v1503_v8 }
 0x3f2   : > { %v1523_v17 = vrot.slane %v1515_v11, %v7483_v63  ;;  %v1530_v18 = vrot.slane %v1516_v12, %v7483_v63  ;;  %v1582_v19 = vcombine.low %v1491_v39, %v1507_v10  ;;  %v1583_v20 = vcombine.high %v1491_v39, %v1507_v10 }
 0x3f4   : > { %v1546_v21 = vcombine.low %v1523_v17, %v1538_v14  ;;  %v1547_v22 = vcombine.high %v1523_v17, %v1538_v14  ;;  %v1562_v23 = vcombine.low %v1530_v18, %v1545_v15  ;;  %v1563_v24 = vcombine.high %v1530_v18, %v1545_v15 }
 0x3f5   : > { %v1590_v28 = vrot.slane %v1582_v19, %v7483_v63  ;;  %v1597_v29 = vrot.slane %v1583_v20, %v7483_v63 }
 0x3f6   : > { %v1554_v30 = vrot.slane %v1546_v21, %v7486_v13  ;;  %v1561_v31 = vrot.slane %v1547_v22, %v7486_v13  ;;  %v1570_v32 = vrot.slane %v1562_v23, %v7486_v13  ;;  %v1577_v33 = vrot.slane %v1563_v24, %v7486_v13 }
 0x3f7   : > { %v1613_v34 = vcombine.low %v1590_v28, %v1605_v26  ;;  %v1614_v35 = vcombine.high %v1590_v28, %v1605_v26  ;;  %v1629_v36 = vcombine.low %v1597_v29, %v1612_v27  ;;  %v1630_v37 = vcombine.high %v1597_v29, %v1612_v27 }
 0x3f8   : > { %v1649_v38 = vcombine.low %v1554_v30, %v1561_v31  ;;  %v5348_v39 = vcombine.high %v1554_v30, %v1561_v31  ;;  %v1665_v25 = vcombine.low %v1570_v32, %v1577_v33  ;;  %v5349_v41 = vcombine.high %v1570_v32, %v1577_v33 }
 0x3f9   : > { %v1621_v42 = vrot.slane %v1613_v34, %v7486_v13  ;;  %v1628_v43 = vrot.slane %v1614_v35, %v7486_v13  ;;  %v1637_v44 = vrot.slane %v1629_v36, %v7486_v13  ;;  %v1644_v45 = vrot.slane %v1630_v37, %v7486_v13 }
 0x3fa   : > { %v1656_v46 = vrot.slane %v1649_v38, %v7483_v63  ;;  %v1664_v47 = vrot.slane %v5348_v39, %v7483_v63  ;;  %v1672_v48 = vrot.slane %v1665_v25, %v7483_v63  ;;  %v1680_v49 = vrot.slane %v5349_v41, %v7483_v63 }
 0x3fb   : > { %v1716_v50 = vcombine.low %v1621_v42, %v1628_v43  ;;  %v5350_v51 = vcombine.high %v1621_v42, %v1628_v43  ;;  %v1732_v52 = vcombine.low %v1637_v44, %v1644_v45  ;;  %v5351_v53 = vcombine.high %v1637_v44, %v1644_v45 }
 0x3fc   : > { %v1681_v54 = vcombine.low %v1656_v46, %v1664_v47  ;;  %v1682_v55 = vcombine.high %v1656_v46, %v1664_v47  ;;  %v1697_v56 = vcombine.low %v1672_v48, %v1680_v49  ;;  %v1698_v57 = vcombine.high %v1672_v48, %v1680_v49 }
 0x3fd   : > { %v1723_v58 = vrot.slane %v1716_v50, %v7483_v63  ;;  %v1731_v59 = vrot.slane %v5350_v51, %v7483_v63  ;;  %v1739_v60 = vrot.slane %v1732_v52, %v7483_v63  ;;  %v1747_v61 = vrot.slane %v5351_v53, %v7483_v63 }
 0x3fe   : > { %v1689_v62 = vrot.slane %v1681_v54, %v7486_v13  ;;  %v1705_v4 = vrot.slane %v1697_v56, %v7486_v13  ;;  %v1696_v6 = vrot.slane %v1682_v55, %v7486_v13  ;;  %v1712_v7 = vrot.slane %v1698_v57, %v7486_v13 }
 0x3ff   : > { %v1748_v8 = vcombine.low %v1723_v58, %v1731_v59  ;;  %v1749_v9 = vcombine.high %v1723_v58, %v1731_v59  ;;  %v1764_v10 = vcombine.low %v1739_v60, %v1747_v61  ;;  %v1765_v11 = vcombine.high %v1739_v60, %v1747_v61 }
 0x400   : > { %v1714_v12 = vcombine.high %v1689_v62, %v1705_v4  ;;  %v1715_v14 = vcombine.low %v1696_v6, %v1712_v7  ;;  %v1713_v15 = vcombine.low %v1689_v62, %v1705_v4 }
 0x401   : > { %v1756_v16 = vrot.slane %v1748_v8, %v7486_v13  ;;  %v1772_v17 = vrot.slane %v1764_v10, %v7486_v13  ;;  %v1763_v18 = vrot.slane %v1749_v9, %v7486_v13  ;;  %v1779_v19 = vrot.slane %v1765_v11, %v7486_v13 }
 0x402   : > { %v1795_v23 = vshrl.u32 %v1714_v12, 16  ;;  %v1787_v29 = vshrl.u32 %v1713_v15, 16  ;;  %v1803_v31 = vshrl.u32 %v1715_v14, 16 }
 0x403   : > { %v1781_v20 = vcombine.high %v1756_v16, %v1772_v17  ;;  %v1782_v21 = vcombine.low %v1763_v18, %v1779_v19  ;;  %v1780_v22 = vcombine.low %v1756_v16, %v1772_v17  ;;  %v6072_v16 = vld [vmem:[%s7315_s0 + $0x10] ss:$8 sps:$4 sm:$0xff]   ;;  %v6077_v17 = vld [vmem:[%s7315_s0 + $0x24] ss:$8 sps:$4 sm:$0xff]   ;;  %v6075_v18 = vld [vmem:[%s7315_s0 + $0x20] ss:$8 sps:$4 sm:$0xff]  }
 0x404   : > { %v6080_v19 = vld [vmem:[%s7315_s0 + $0x34] ss:$8 sps:$4 sm:$0xff]  }
 0x405   : > { %v1793_v24 = vpack.i.b16 %v1781_v20, %v1714_v12  ;;  %v1796_v26 = vshrl.u32 %v1781_v20, 16  ;;  %v1801_v27 = vpack.i.b16 %v1782_v21, %v1715_v14  ;;  %v1785_v28 = vpack.i.b16 %v1780_v22, %v1713_v15  ;;  %v6069_v12 = vld [vmem:[%s7315_s0] ss:$8 sps:$4 sm:$0xff]   ;;  %v6071_v14 = vld [vmem:[%s7315_s0 + $0x4] ss:$8 sps:$4 sm:$0xff]  }
 0x406   : > { %v1788_v30 = vshrl.u32 %v1780_v22, 16  ;;  %v1804_v32 = vshrl.u32 %v1782_v21, 16  ;;  %v6074_v15 = vld [vmem:[%s7315_s0 + $0x14] ss:$8 sps:$4 sm:$0xff]   ;;  %v6078_v20 = vld [vmem:[%s7315_s0 + $0x30] ss:$8 sps:$4 sm:$0xff]  }
 0x407   : > { %5725 = vmatpush3.bf16.xpose.msra.mxu0 %v1793_v24  ;;  %5737 = vmatpush3.bf16.msra.mxu1 %v1801_v27  ;;  %v1797_v33 = vpack.i.b16 %v1796_v26, %v1795_v23  ;;  %v6083_v21 = vld [vmem:[%s7315_s0 + $0x44] ss:$8 sps:$4 sm:$0xff]   ;;  %v6081_v22 = vld [vmem:[%s7315_s0 + $0x40] ss:$8 sps:$4 sm:$0xff]   ;;  %v6086_v23 = vld [vmem:[%s7315_s0 + $0x54] ss:$8 sps:$4 sm:$0xff]  }
 0x408   : > { %5730 = vmatprep.subr.bf16.mxu0 %v6789_v40  ;;  %v1789_v34 = vpack.i.b16 %v1788_v30, %v1787_v29  ;;  %5742 = vmatprep.subr.bf16.mxu1 %v6789_v40  ;;  %v1805_v35 = vpack.i.b16 %v1804_v32, %v1803_v31  ;;  %v6084_v24 = vld [vmem:[%s7315_s0 + $0x50] ss:$8 sps:$4 sm:$0xff]   ;;  %v6089_v26 = vld [vmem:[%s7315_s0 + $0x64] ss:$8 sps:$4 sm:$0xff]   ;;  %v6087_v27 = vld [vmem:[%s7315_s0 + $0x60] ss:$8 sps:$4 sm:$0xff]  }
 0x409   : > { %v6090_v29 = vld [vmem:[%s7315_s0 + $0x70] ss:$8 sps:$4 sm:$0xff]   ;;  %v6095_v30 = vld [vmem:[%s7315_s0 + $0x84] ss:$8 sps:$4 sm:$0xff]   ;;  %v6093_v31 = vld [vmem:[%s7315_s0 + $0x80] ss:$8 sps:$4 sm:$0xff]  }
 0x40a   : > { %v6098_v32 = vld [vmem:[%s7315_s0 + $0x94] ss:$8 sps:$4 sm:$0xff]  }
 0x40e   : > { %5727 = vmatmul.mubr.bf16.vlgmr.msra.gmra.mrb[0].mxu0 %v1785_v28  ;;  %v6092_v28 = vld [vmem:[%s7315_s0 + $0x74] ss:$8 sps:$4 sm:$0xff]  }
 0x40f   : > { %5731 = vmatpush3.bf16.xpose.msra.mxu0 %v1797_v33  ;;  %5732 = vmatprep.mubr.msk.bf16.mxu0 %vm6790_vm0, %v6789_v40  ;;  %v6096_v33 = vld [vmem:[%s7315_s0 + $0x90] ss:$8 sps:$4 sm:$0xff]  }
 0x416   : > { %5733 = vmatmul.mubr.bf16.vlgmr.msra.gmra.mrb[4].mxu0 %v1789_v34  ;;  %v6101_v34 = vld [vmem:[%s7315_s0 + $0xa4] ss:$8 sps:$4 sm:$0xff]  }
 0x4e1   : > { %v1841_v36 = vpop.f32.mrb[0].mxu0 }
 0x4e2   : > { %v5728_v37 = vpop.f32.mrb[1].mxu0  ;;  %v1890_v38 = vsel %vm1889_vm1, %v1841_v36, -inf }
 0x4e3   : > { %1891 = vmax.xlane.f32.xlu0 %v1890_v38  ;;  %v1844_v39 = vpop.f32.mrb[2].mxu0  ;;  %v6102_v37 = vld [vmem:[%s7315_s0 + $0xb0] ss:$8 sps:$4 sm:$0xff]   ;;  %v6107_v38 = vld [vmem:[%s7315_s0 + $0xc4] ss:$8 sps:$4 sm:$0xff]  }
 0x4e4   : > { %v5729_v25 = vpop.f32.mrb[3].mxu0  ;;  %v1893_v41 = vsel %vm1889_vm1, %v1844_v39, -inf }
 0x4e5   : > { %1894 = vmax.xlane.f32.xlu1 %v1893_v41  ;;  %v6110_v25 = vld [vmem:[%s7315_s0 + $0xd4] ss:$8 sps:$4 sm:$0xff]   ;;  %v6108_v41 = vld [vmem:[%s7315_s0 + $0xd0] ss:$8 sps:$4 sm:$0xff]  }
 0x4e9   : > { %v1882_v42 = vpop.f32.mrb[4].mxu0 }
 0x4ea   : > { %v5734_v43 = vpop.f32.mrb[5].mxu0  ;;  %v1896_v44 = vsel %vm1889_vm1, %v1882_v42, -inf }
 0x4eb   : > { %1897 = vmax.xlane.f32.xlu0 %v1896_v44  ;;  %v1885_v45 = vpop.f32.mrb[6].mxu0  ;;  %v6111_v43 = vld [vmem:[%s7315_s0 + $0xe0] ss:$8 sps:$4 sm:$0xff]   ;;  %v6116_v44 = vld [vmem:[%s7315_s0 + $0xf4] ss:$8 sps:$4 sm:$0xff]  }
 0x4ec   : > { %v5735_v46 = vpop.f32.mrb[7].mxu0  ;;  %v1899_v47 = vsel %vm1889_vm1, %v1885_v45, -inf }
 0x4ed   : > { %1900 = vmax.xlane.f32.xlu1 %v1899_v47 }
 0x570   : > { %v1892_v48 = vpop.xlane.xlu0 %1891 }
 0x571   : > { %v1902_v49 = vsub.f32 %v1841_v36, %v1892_v48  ;;  %v6104_v36 = vld [vmem:[%s7315_s0 + $0xb4] ss:$8 sps:$4 sm:$0xff]  }
 0x572   : > { %v1895_v50 = vpop.xlane.xlu1 %1894 }
 0x573   : > { %v1906_v51 = vmul.f32 1.442695, %v1902_v49  ;;  %v1903_v52 = vsub.f32 %v1844_v39, %v1895_v50  ;;  %v6105_v39 = vld [vmem:[%s7315_s0 + $0xc0] ss:$8 sps:$4 sm:$0xff]  }
 0x575   : > { %6313 = vpow2.f32 %v1906_v51  ;;  %v1908_v53 = vmul.f32 1.442695, %v1903_v52 }
 0x577   : > { %6315 = vpow2.f32 %v1908_v53 }
 0x578   : > { %v1898_v54 = vpop.xlane.xlu0 %1897 }
 0x579   : > { %v1904_v55 = vsub.f32 %v1882_v42, %v1898_v54  ;;  %v6113_v42 = vld [vmem:[%s7315_s0 + $0xe4] ss:$8 sps:$4 sm:$0xff]  }
 0x57a   : > { %v1901_v56 = vpop.xlane.xlu1 %1900 }
 0x57b   : > { %v1910_v57 = vmul.f32 1.442695, %v1904_v55  ;;  %v1905_v58 = vsub.f32 %v1885_v45, %v1901_v56  ;;  %v6114_v45 = vld [vmem:[%s7315_s0 + $0xf0] ss:$8 sps:$4 sm:$0xff]  }
 0x57d   : > { %6317 = vpow2.f32 %v1910_v57  ;;  %v1912_v59 = vmul.f32 1.442695, %v1905_v58 }
 0x57f   : > { %v6314_v60 = vpop.eup %6313  ;;  %6319 = vpow2.f32 %v1912_v59 }
 0x580   : > { %v1914_v61 = vsel %vm1889_vm1, %v6314_v60, 0.0 }
 0x581   : > { %v6316_v62 = vpop.eup %6315  ;;  %1915 = vadd.xlane.f32.xlu0 %v1914_v61 }
 0x582   : > { %v1917_v4 = vsel %vm1889_vm1, %v6316_v62, 0.0  ;;  %v1926_v6 = vpack.c.bf16 %v6316_v62, %v6314_v60 }
 0x583   : > { %1918 = vadd.xlane.f32.xlu1 %v1917_v4 }
 0x584   : > { %5739 = vmatmul.mubr.msk.bf16.vlgmr.msra.gmra.mrb[12].mxu1 %vm1889_vm1, %v1926_v6 }
 0x585   : > { %5743 = vmatpush3.bf16.msra.mxu1 %v1805_v35  ;;  %5744 = vmatprep.mubr.msk.bf16.mxu1 %vm6790_vm0, %v6789_v40  ;;  %v6099_v35 = vld [vmem:[%s7315_s0 + $0xa0] ss:$8 sps:$4 sm:$0xff]   ;;  %s8289_s0 = sld [smem:[#allocation41_spill]] (!%p5646_p6) }
 0x586   : > { %2458 = vmatprep.subr.bf16.mxu1 %v6071_v14 }
 0x587   : > { %v6318_v7 = vpop.eup %6317 }
 0x588   : > { %v1920_v8 = vsel %vm1889_vm1, %v6318_v7, 0.0 }
 0x589   : > { %v6320_v9 = vpop.eup %6319  ;;  %1921 = vadd.xlane.f32.xlu0 %v1920_v8 }
 0x58a   : > { %v1923_v10 = vsel %vm1889_vm1, %v6320_v9, 0.0  ;;  %v1927_v11 = vpack.c.bf16 %v6320_v9, %v6318_v7 }
 0x58b   : > { %1924 = vadd.xlane.f32.xlu1 %v1923_v10 }
 0x58c   : > { %5745 = vmatmul.mubr.msk.bf16.vlgmr.msra.gmra.mrb[16].mxu1 %vm1889_vm1, %v1927_v11 }
 0x58d   : > { %2459 = vmatpush1.bf16.msra.mxu1 %v6069_v12 }
 0x58e   : > { %2460 = vmatprep.subr.bf16.mxu1 %v6074_v15 }
 0x591   : > { %2461 = vmatpush1.bf16.msra.mxu1 %v6072_v16 }
 0x592   : > { %2462 = vmatprep.subr.bf16.mxu1 %v6077_v17 }
 0x595   : > { %2463 = vmatpush1.bf16.msra.mxu1 %v6075_v18 }
 0x596   : > { %2464 = vmatprep.subr.bf16.mxu1 %v6080_v19 }
 0x599   : > { %2465 = vmatpush1.bf16.msra.mxu1 %v6078_v20 }
 0x59a   : > { %2466 = vmatprep.subr.bf16.mxu1 %v6083_v21 }
 0x59d   : > { %2467 = vmatpush1.bf16.msra.mxu1 %v6081_v22 }
 0x59e   : > { %2468 = vmatprep.subr.bf16.mxu1 %v6086_v23 }
 0x5a1   : > { %2469 = vmatpush1.bf16.msra.mxu1 %v6084_v24 }
 0x5a2   : > { %2470 = vmatprep.subr.bf16.mxu1 %v6089_v26 }
 0x5a5   : > { %2471 = vmatpush1.bf16.msra.mxu1 %v6087_v27 }
 0x5a6   : > { %2472 = vmatprep.subr.bf16.mxu1 %v6092_v28 }
 0x5a9   : > { %2473 = vmatpush1.bf16.msra.mxu1 %v6090_v29 }
 0x5aa   : > { %2474 = vmatprep.subr.bf16.mxu1 %v6095_v30 }
 0x5ad   : > { %2475 = vmatpush1.bf16.msra.mxu1 %v6093_v31 }
 0x5ae   : > { %2476 = vmatprep.subr.bf16.mxu1 %v6098_v32 }
 0x5b1   : > { %2477 = vmatpush1.bf16.msra.mxu1 %v6096_v33 }
 0x5b2   : > { %2478 = vmatprep.subr.bf16.mxu1 %v6101_v34 }
 0x5b5   : > { %2479 = vmatpush1.bf16.msra.mxu1 %v6099_v35 }
 0x5b6   : > { %2480 = vmatprep.subr.bf16.mxu1 %v6104_v36 }
 0x5b9   : > { %2481 = vmatpush1.bf16.msra.mxu1 %v6102_v37 }
 0x5ba   : > { %2482 = vmatprep.subr.bf16.mxu1 %v6107_v38 }
 0x5bd   : > { %2483 = vmatpush1.bf16.msra.mxu1 %v6105_v39 }
 0x5be   : > { %2484 = vmatprep.subr.bf16.mxu1 %v6110_v25 }
 0x5c1   : > { %2485 = vmatpush1.bf16.msra.mxu1 %v6108_v41 }
 0x5c2   : > { %2486 = vmatprep.subr.bf16.mxu1 %v6113_v42 }
 0x5c5   : > { %2487 = vmatpush1.bf16.msra.mxu1 %v6111_v43 }
 0x5c6   : > { %2488 = vmatprep.subr.bf16.mxu1 %v6116_v44 }
 0x5c9   : > { %2489 = vmatpush1.bf16.msra.mxu1 %v6114_v45 }
 0x60e   : > { %v1916_v46 = vpop.xlane.xlu0 %1915 }
 0x60f   : > { %6321 = vrcp.f32 %v1916_v46 }
 0x610   : > { %v1919_v47 = vpop.xlane.xlu1 %1918 }
 0x611   : > { %6323 = vrcp.f32 %v1919_v47 }
 0x616   : > { %v1922_v48 = vpop.xlane.xlu0 %1921 }
 0x617   : > { %6325 = vrcp.f32 %v1922_v48 }
 0x618   : > { %v1925_v49 = vpop.xlane.xlu1 %1924 }
 0x619   : > { %6327 = vrcp.f32 %v1925_v49  ;;  %v6322_v53 = vpop.eup %6321 }
 0x61b   : > { %v6324_v56 = vpop.eup %6323 }
 0x621   : > { %v6326_v57 = vpop.eup %6325 }
 0x623   : > { %v6328_v4 = vpop.eup %6327 }
 0x657   : > { %v1965_v50 = vpop.f32.mrb[12].mxu1 }
 0x658   : > { %v5740_v51 = vpop.f32.mrb[13].mxu1  ;;  %v2020_v55 = vmul.f32 %v6322_v53, %v1965_v50 }
 0x659   : > { %v1968_v52 = vpop.f32.mrb[14].mxu1 }
 0x65a   : > { %v5741_v54 = vpop.f32.mrb[15].mxu1  ;;  %v2024_v58 = vcombine.high %v2020_v55, %v6789_v40  ;;  %v2021_v59 = vmul.f32 %v6324_v56, %v1968_v52  ;;  %v2031_v7 = vrot.slane %v2020_v55, %v7483_v63 }
 0x65c   : > { %v2038_v12 = vrot.slane %v2024_v58, %v7483_v63  ;;  %v2090_v14 = vcombine.high %v2021_v59, %v6789_v40  ;;  %v2097_v19 = vrot.slane %v2021_v59, %v7483_v63 }
 0x65e   : > { %v2104_v26 = vrot.slane %v2090_v14, %v7483_v63 }
 0x65f   : > { %v2009_v60 = vpop.f32.mrb[16].mxu1 }
 0x660   : > { %v2022_v61 = vmul.f32 %v6326_v57, %v2009_v60  ;;  %v5746_v62 = vpop.f32.mrb[17].mxu1 }
 0x661   : > { %v2012_v6 = vpop.f32.mrb[18].mxu1 }
 0x662   : > { %v2039_v8 = vcombine.high %v2022_v61, %v6789_v40  ;;  %v2046_v9 = vrot.slane %v2022_v61, %v7483_v63  ;;  %v2023_v10 = vmul.f32 %v6328_v4, %v2012_v6  ;;  %v5747_v11 = vpop.f32.mrb[19].mxu1 }
 0x664   : > { %v2053_v15 = vrot.slane %v2039_v8, %v7483_v63  ;;  %v2054_v16 = vcombine.low %v2031_v7, %v2046_v9  ;;  %v2055_v17 = vcombine.high %v2031_v7, %v2046_v9  ;;  %v2105_v18 = vcombine.high %v2023_v10, %v6789_v40 }
 0x665   : > { %v2112_v20 = vrot.slane %v2023_v10, %v7483_v63 }
 0x666   : > { %v2062_v21 = vrot.slane %v2054_v16, %v7486_v13  ;;  %v2069_v22 = vrot.slane %v2055_v17, %v7486_v13  ;;  %v2070_v23 = vcombine.low %v2038_v12, %v2053_v15  ;;  %v2071_v24 = vcombine.high %v2038_v12, %v2053_v15  ;;  %v6365_v16 = vld [vmem:[#allocation2] sm:$0xff] }
 0x667   : > { %v2119_v27 = vrot.slane %v2105_v18, %v7483_v63  ;;  %v2120_v28 = vcombine.low %v2097_v19, %v2112_v20  ;;  %v2121_v29 = vcombine.high %v2097_v19, %v2112_v20  ;;  %v6366_v20 = vld [vmem:[#allocation2 + $0x8] sm:$0xff] }
 0x668   : > { %v2078_v30 = vrot.slane %v2070_v23, %v7486_v13  ;;  %v2085_v40 = vrot.slane %v2071_v24, %v7486_v13  ;;  %v2156_v31 = vcombine.low %v2062_v21, %v2069_v22  ;;  %v5354_v32 = vcombine.high %v2062_v21, %v2069_v22  ;;  %v6368_v23 = vld [vmem:[#allocation2 + $0x18] sm:$0xff] }
 0x669   : > { %v2128_v33 = vrot.slane %v2120_v28, %v7486_v13  ;;  %v2135_v34 = vrot.slane %v2121_v29, %v7486_v13  ;;  %v2136_v35 = vcombine.low %v2104_v26, %v2119_v27  ;;  %v2137_v36 = vcombine.high %v2104_v26, %v2119_v27  ;;  %v2563_v28 = vld [vmem:[%s7321_s5] sm:$0xff] }
 0x66a   : > { %v2163_v37 = vrot.slane %v2156_v31, %v7483_v63  ;;  %v2171_v38 = vrot.slane %v5354_v32, %v7483_v63  ;;  %v2172_v39 = vcombine.low %v2078_v30, %v2085_v40  ;;  %v5355_v25 = vcombine.high %v2078_v30, %v2085_v40  ;;  %v2567_v29 = vld [vmem:[%s7321_s5 + $0x20] sm:$0xff]  ;;  %v2564_v30 = vld [vmem:[%s7321_s5 + $0x8] sm:$0xff] }
 0x66b   : > { %v2144_v41 = vrot.slane %v2136_v35, %v7486_v13  ;;  %v2151_v42 = vrot.slane %v2137_v36, %v7486_v13  ;;  %v2206_v43 = vcombine.low %v2128_v33, %v2135_v34  ;;  %v5356_v44 = vcombine.high %v2128_v33, %v2135_v34  ;;  %v2568_v32 = vld [vmem:[%s7321_s5 + $0x28] sm:$0xff]  ;;  %v2571_v33 = vld [vmem:[%s7321_s5 + $0x40] sm:$0xff] }
 0x66c   : > { %v2179_v45 = vrot.slane %v2172_v39, %v7483_v63  ;;  %v2187_v46 = vrot.slane %v5355_v25, %v7483_v63  ;;  %v2188_v47 = vcombine.low %v2163_v37, %v2171_v38  ;;  %v5390_v40 = vcombine.low %v2563_v28, %v2567_v29  ;;  %v2575_v34 = vld [vmem:[%s7321_s5 + $0x60] sm:$0xff]  ;;  %v2572_v38 = vld [vmem:[%s7321_s5 + $0x48] sm:$0xff] }
 0x66d   : > { %v2213_v48 = vrot.slane %v2206_v43, %v7483_v63  ;;  %v2221_v49 = vrot.slane %v5356_v44, %v7483_v63  ;;  %v2222_v50 = vcombine.low %v2144_v41, %v2151_v42  ;;  %v5357_v51 = vcombine.high %v2144_v41, %v2151_v42  ;;  %v2576_v39 = vld [vmem:[%s7321_s5 + $0x68] sm:$0xff]  ;;  %v2579_v25 = vld [vmem:[%s7321_s5 + $0x80] sm:$0xff] }
 0x66e   : > { %v2196_v52 = vcombine.low %v2179_v45, %v2187_v46  ;;  %v2195_v56 = vrot.slane %v2188_v47, %v7486_v13  ;;  %v5391_v31 = vcombine.high %v2563_v28, %v2567_v29  ;;  %v5392_v35 = vcombine.low %v2564_v30, %v2568_v32  ;;  %v2583_v42 = vld [vmem:[%s7321_s5 + $0xa0] sm:$0xff]  ;;  %v2580_v43 = vld [vmem:[%s7321_s5 + $0x88] sm:$0xff] }
 0x66f   : > { %v2229_v53 = vrot.slane %v2222_v50, %v7483_v63  ;;  %v2237_v54 = vrot.slane %v5357_v51, %v7483_v63  ;;  %v2238_v55 = vcombine.low %v2213_v48, %v2221_v49  ;;  %v7601_v63 = vsub.s32 4, %v7381_v0  ;;  %v2584_v44 = vld [vmem:[%s7321_s5 + $0xa8] sm:$0xff]  ;;  %v2587_v49 = vld [vmem:[%s7321_s5 + $0xc0] sm:$0xff] }
 0x670   : > { %v2203_v57 = vrot.slane %v2196_v52, %v7486_v13  ;;  %v5393_v36 = vcombine.high %v2564_v30, %v2568_v32  ;;  %v5399_v37 = vcombine.high %v2571_v33, %v2575_v34  ;;  %3373 = vmatprep.subr.bf16.mxu0 %v5391_v31  ;;  %v5401_v41 = vcombine.high %v2572_v38, %v2576_v39  ;;  %v2591_v50 = vld [vmem:[%s7321_s5 + $0xe0] sm:$0xff]  ;;  %v2588_v51 = vld [vmem:[%s7321_s5 + $0xc8] sm:$0xff] }
 0x671   : > { %v2246_v58 = vcombine.low %v2229_v53, %v2237_v54  ;;  %v2245_v61 = vrot.slane %v2238_v55, %v7486_v13  ;;  %v2293_v9 = vrot.slane %v7390_v3, %v7601_v63  ;;  %v2297_v10 = vrot.slane %v7387_v2, %v7601_v63  ;;  %v6367_v2 = vld [vmem:[#allocation2 + $0x10] sm:$0xff]  ;;  %3374 = vmatpush1.bf16.msra.mxu0 %v5390_v40  ;;  %v2592_v52 = vld [vmem:[%s7321_s5 + $0xe8] sm:$0xff] }
 0x672   : > { %v2205_v59 = vcombine.high %v2195_v56, %v2203_v57  ;;  %v2204_v60 = vcombine.low %v2195_v56, %v2203_v57  ;;  %3416 = vmatprep.subr.bf16.mxu1 %v5393_v36  ;;  %v5398_v45 = vcombine.low %v2571_v33, %v2575_v34  ;;  %3375 = vmatprep.subr.bf16.mxu0 %v5399_v37  ;;  %v2595_v57 = vld [vmem:[%s7321_s5 + $0x100] sm:$0xff]  ;;  %v2620_v28 = vld [vmem:[%s7321_s5 + $0x1c8] sm:$0xff] }
 0x673   : > { %v2253_v62 = vrot.slane %v2246_v58, %v7486_v13  ;;  %v5400_v46 = vcombine.low %v2572_v38, %v2576_v39  ;;  %v5407_v47 = vcombine.high %v2579_v25, %v2583_v42  ;;  %v5409_v48 = vcombine.high %v2580_v43, %v2584_v44  ;;  %v2599_v58 = vld [vmem:[%s7321_s5 + $0x120] sm:$0xff]  ;;  %v2624_v29 = vld [vmem:[%s7321_s5 + $0x1e8] sm:$0xff] }
 0x674   : > { %v5406_v53 = vcombine.low %v2579_v25, %v2583_v42  ;;  %v5408_v54 = vcombine.low %v2580_v43, %v2584_v44  ;;  %v5415_v55 = vcombine.high %v2587_v49, %v2591_v50  ;;  %v5417_v56 = vcombine.high %v2588_v51, %v2592_v52  ;;  %v2627_v33 = vld [vmem:[%s7321_s5 + $0x200] sm:$0xff]  ;;  %v2632_v36 = vld [vmem:[%s7321_s5 + $0x228] sm:$0xff] }
 0x675   : > { %v2255_v4 = vcombine.high %v2245_v61, %v2253_v62  ;;  %v2254_v6 = vcombine.low %v2245_v61, %v2253_v62  ;;  %3376 = vmatpush1.bf16.msra.mxu0 %v5398_v45  ;;  %v5414_v61 = vcombine.low %v2587_v49, %v2591_v50  ;;  %v5416_v62 = vcombine.low %v2588_v51, %v2592_v52  ;;  %v2631_v34 = vld [vmem:[%s7321_s5 + $0x220] sm:$0xff]  ;;  %v2636_v43 = vld [vmem:[%s7321_s5 + $0x248] sm:$0xff] }
 0x676   : > { %3377 = vmatprep.subr.bf16.mxu0 %v5407_v47  ;;  %v5449_v32 = vcombine.high %v2620_v28, %v2624_v29  ;;  %v5448_v38 = vcombine.low %v2620_v28, %v2624_v29  ;;  %v5455_v39 = vcombine.high %v2627_v33, %v2631_v34  ;;  %v2639_v42 = vld [vmem:[%s7321_s5 + $0x260] sm:$0xff]  ;;  %v2640_v44 = vld [vmem:[%s7321_s5 + $0x268] sm:$0xff]  ;;  %v5454_v45 = vcombine.low %v2627_v33, %v2631_v34 }
 0x677   : > { %v2257_v7 = vpack.c.bf16 %v2255_v4, %v2205_v59  ;;  %v2256_v8 = vpack.c.bf16 %v2254_v6, %v2204_v60  ;;  %v2596_v59 = vld [vmem:[%s7321_s5 + $0x108] sm:$0xff]  ;;  %v5423_v4 = vcombine.high %v2595_v57, %v2599_v58  ;;  %v5464_v50 = vcombine.low %v2636_v43, %v2640_v44  ;;  %v2667_v33 = vld [vmem:[%s7321_s5 + $0x340] sm:$0xff] }
 0x678   : > { %v2600_v60 = vld [vmem:[%s7321_s5 + $0x128] sm:$0xff]  ;;  %v2671_v34 = vld [vmem:[%s7321_s5 + $0x360] sm:$0xff] }
 0x679   : > { %2490 = vmatprep.mubr.bf16.mxu1 %v2257_v7  ;;  %3378 = vmatpush1.bf16.msra.mxu0 %v5406_v53  ;;  %v5425_v6 = vcombine.high %v2596_v59, %v2600_v60  ;;  %v2603_v7 = vld [vmem:[%s7321_s5 + $0x140] sm:$0xff]  ;;  %v2660_v28 = vld [vmem:[%s7321_s5 + $0x308] sm:$0xff] }
 0x67a   : > { %2491 = vmatmul.mubr.bf16.vlgmr.msra.gmra.mrb[20].mxu1 %v2256_v8  ;;  %3379 = vmatprep.subr.bf16.mxu0 %v5415_v55  ;;  %v2607_v8 = vld [vmem:[%s7321_s5 + $0x160] sm:$0xff] }
 0x67b   : > { %3417 = vmatpush1.bf16.msra.mxu1 %v5392_v35  ;;  %v2628_v35 = vld [vmem:[%s7321_s5 + $0x208] sm:$0xff] }
 0x67c   : > { %3418 = vmatprep.subr.bf16.mxu1 %v5401_v41  ;;  %v5457_v25 = vcombine.high %v2628_v35, %v2632_v36  ;;  %v2635_v41 = vld [vmem:[%s7321_s5 + $0x240] sm:$0xff] }
 0x67d   : > { %3380 = vmatpush1.bf16.msra.mxu0 %v5414_v61  ;;  %v5463_v47 = vcombine.high %v2635_v41, %v2639_v42  ;;  %v5462_v49 = vcombine.low %v2635_v41, %v2639_v42  ;;  %v2675_v41 = vld [vmem:[%s7321_s5 + $0x380] sm:$0xff] }
 0x67e   : > { %3381 = vmatprep.subr.bf16.mxu0 %v5423_v4  ;;  %v2679_v42 = vld [vmem:[%s7321_s5 + $0x3a0] sm:$0xff] }
 0x67f   : > { %3419 = vmatpush1.bf16.msra.mxu1 %v5400_v46  ;;  %v5456_v46 = vcombine.low %v2628_v35, %v2632_v36  ;;  %v2668_v35 = vld [vmem:[%s7321_s5 + $0x348] sm:$0xff]  ;;  %v5495_v36 = vcombine.high %v2667_v33, %v2671_v34 }
 0x680   : > { %3420 = vmatprep.subr.bf16.mxu1 %v5409_v48  ;;  %v5465_v48 = vcombine.high %v2636_v43, %v2640_v44  ;;  %v2676_v43 = vld [vmem:[%s7321_s5 + $0x388] sm:$0xff]  ;;  %v5503_v44 = vcombine.high %v2675_v41, %v2679_v42 }
 0x683   : > { %3421 = vmatpush1.bf16.msra.mxu1 %v5408_v54 }
 0x684   : > { %3422 = vmatprep.subr.bf16.mxu1 %v5417_v56 }
 0x687   : > { %3423 = vmatpush1.bf16.msra.mxu1 %v5416_v62 }
 0x688   : > { %3424 = vmatprep.subr.bf16.mxu1 %v5425_v6 }
 0x74d   : > { %v2492_v11 = vpop.f32.mrb[20].mxu1 }
 0x74e   : > { %v2493_v12 = vadd.f32 %v2492_v11, %v2293_v9  ;;  %v2494_v14 = vpop.f32.mrb[21].mxu1  ;;  %v5422_v11 = vcombine.low %v2595_v57, %v2599_v58 }
 0x74f   : > { %v2495_v15 = vadd.f32 %v2494_v14, %v2297_v10  ;;  %v2496_v13 = vpop.f32.mrb[22].mxu1  ;;  %v5431_v14 = vcombine.high %v2603_v7, %v2607_v8 }
 0x750   : > { %v7607_v17 = vadd.f32 %v6365_v16, %v2493_v12  ;;  %v2497_v18 = vadd.f32 %v2496_v13, %v2293_v9  ;;  %v2498_v19 = vpop.f32.mrb[23].mxu1  ;;  %v2604_v9 = vld [vmem:[%s7321_s5 + $0x148] sm:$0xff]  ;;  %v5424_v12 = vcombine.low %v2596_v59, %v2600_v60  ;;  %v2611_v13 = vld [vmem:[%s7321_s5 + $0x180] sm:$0xff]  ;;  %3382 = vmatpush1.bf16.msra.mxu0 %v5422_v11 }
 0x751   : > { %v7609_v21 = vadd.f32 %v6366_v20, %v2495_v15  ;;  %v2499_v3 = vadd.f32 %v2498_v19, %v2297_v10  ;;  %v2608_v10 = vld [vmem:[%s7321_s5 + $0x168] sm:$0xff]  ;;  %v2615_v16 = vld [vmem:[%s7321_s5 + $0x1a0] sm:$0xff]  ;;  %v5430_v20 = vcombine.low %v2603_v7, %v2607_v8  ;;  %3383 = vmatprep.subr.bf16.mxu0 %v5431_v14 }
 0x752   : > { %v7611_v22 = vadd.f32 %v6367_v2, %v2497_v18  ;;  %v5433_v15 = vcombine.high %v2604_v9, %v2608_v10  ;;  %v2612_v18 = vld [vmem:[%s7321_s5 + $0x188] sm:$0xff]  ;;  %3425 = vmatpush1.bf16.msra.mxu1 %v5424_v12  ;;  %v5439_v2 = vcombine.high %v2611_v13, %v2615_v16  ;;  %v5438_v30 = vcombine.low %v2611_v13, %v2615_v16  ;;  %v2643_v7 = vld [vmem:[%s7321_s5 + $0x280] sm:$0xff] }
 0x753   : > { %v7613_v24 = vadd.f32 %v6368_v23, %v2499_v3  ;;  %v2505_v26 = vadd.f32 %v7609_v21, %v7607_v17  ;;  %v2616_v19 = vld [vmem:[%s7321_s5 + $0x1a8] sm:$0xff]  ;;  %v5432_v3 = vcombine.low %v2604_v9, %v2608_v10  ;;  %v2647_v8 = vld [vmem:[%s7321_s5 + $0x2a0] sm:$0xff] }
 0x754   : > { %3426 = vmatprep.subr.bf16.mxu1 %v5433_v15  ;;  %v5441_v23 = vcombine.high %v2612_v18, %v2616_v19  ;;  %3384 = vmatpush1.bf16.msra.mxu0 %v5430_v20  ;;  %v5440_v40 = vcombine.low %v2612_v18, %v2616_v19  ;;  %v2644_v9 = vld [vmem:[%s7321_s5 + $0x288] sm:$0xff]  ;;  %v5471_v10 = vcombine.high %v2643_v7, %v2647_v8  ;;  %v2651_v13 = vld [vmem:[%s7321_s5 + $0x2c0] sm:$0xff] }
 0x755   : > { %2506 = vadd.xlane.f32.xlu0 %v2505_v26  ;;  %v2508_v27 = vadd.f32 %v7613_v24, %v7611_v22  ;;  %v2619_v26 = vld [vmem:[%s7321_s5 + $0x1c0] sm:$0xff]  ;;  %3385 = vmatprep.subr.bf16.mxu0 %v5439_v2  ;;  %v2648_v11 = vld [vmem:[%s7321_s5 + $0x2a8] sm:$0xff]  ;;  %v5470_v12 = vcombine.low %v2643_v7, %v2647_v8  ;;  %v2570_v7 = vld [vmem:[%s7321_s5 + $0x38] sm:$0xff] }
 0x756   : > { %3427 = vmatpush1.bf16.msra.mxu1 %v5432_v3  ;;  %v5472_v14 = vcombine.low %v2644_v9, %v2648_v11  ;;  %v5473_v15 = vcombine.high %v2644_v9, %v2648_v11  ;;  %v2655_v16 = vld [vmem:[%s7321_s5 + $0x2e0] sm:$0xff]  ;;  %v2652_v18 = vld [vmem:[%s7321_s5 + $0x2c8] sm:$0xff] }
 0x757   : > { %2509 = vadd.xlane.f32.xlu1 %v2508_v27  ;;  %v2623_v27 = vld [vmem:[%s7321_s5 + $0x1e0] sm:$0xff]  ;;  %3428 = vmatprep.subr.bf16.mxu1 %v5441_v23  ;;  %v5479_v19 = vcombine.high %v2651_v13, %v2655_v16  ;;  %v2656_v20 = vld [vmem:[%s7321_s5 + $0x2e8] sm:$0xff]  ;;  %v5478_v3 = vcombine.low %v2651_v13, %v2655_v16 }
 0x758   : > { %v5447_v31 = vcombine.high %v2619_v26, %v2623_v27  ;;  %3386 = vmatpush1.bf16.msra.mxu0 %v5438_v30  ;;  %v5446_v37 = vcombine.low %v2619_v26, %v2623_v27  ;;  %v5480_v2 = vcombine.low %v2652_v18, %v2656_v20  ;;  %v5481_v23 = vcombine.high %v2652_v18, %v2656_v20  ;;  %v2659_v26 = vld [vmem:[%s7321_s5 + $0x300] sm:$0xff]  ;;  %v2664_v30 = vld [vmem:[%s7321_s5 + $0x328] sm:$0xff] }
 0x759   : > { %v2663_v27 = vld [vmem:[%s7321_s5 + $0x320] sm:$0xff]  ;;  %v7708_v18 = vsub.s32 2, %v7381_v0  ;;  %v6369_v20 = vld [vmem:[%s7307_s6 + $0x8] sm:$0xff] }
 0x75a   : > { %3429 = vmatpush1.bf16.msra.mxu1 %v5440_v40  ;;  %3387 = vmatprep.subr.bf16.mxu0 %v5447_v31  ;;  %v5487_v29 = vcombine.high %v2659_v26, %v2663_v27  ;;  %v5486_v40 = vcombine.low %v2659_v26, %v2663_v27  ;;  %v5488_v31 = vcombine.low %v2660_v28, %v2664_v30 }
 0x75b   : > { %3430 = vmatprep.subr.bf16.mxu1 %v5449_v32  ;;  %v5489_v32 = vcombine.high %v2660_v28, %v2664_v30 }
 0x75c   : > { %3388 = vmatpush1.bf16.msra.mxu0 %v5446_v37  ;;  %v2672_v37 = vld [vmem:[%s7321_s5 + $0x368] sm:$0xff] }
 0x75d   : > { %3389 = vmatprep.subr.bf16.mxu0 %v5455_v39  ;;  %v5496_v39 = vcombine.low %v2668_v35, %v2672_v37 }
 0x75e   : > { %3431 = vmatpush1.bf16.msra.mxu1 %v5448_v38  ;;  %v5494_v38 = vcombine.low %v2667_v33, %v2671_v34 }
 0x75f   : > { %3432 = vmatprep.subr.bf16.mxu1 %v5457_v25  ;;  %v5497_v25 = vcombine.high %v2668_v35, %v2672_v37 }
 0x760   : > { %3390 = vmatpush1.bf16.msra.mxu0 %v5454_v45  ;;  %v2680_v45 = vld [vmem:[%s7321_s5 + $0x3a8] sm:$0xff] }
 0x761   : > { %3391 = vmatprep.subr.bf16.mxu0 %v5463_v47  ;;  %v5504_v47 = vcombine.low %v2676_v43, %v2680_v45 }
 0x762   : > { %3433 = vmatpush1.bf16.msra.mxu1 %v5456_v46  ;;  %v5502_v46 = vcombine.low %v2675_v41, %v2679_v42  ;;  %v2574_v41 = vld [vmem:[%s7321_s5 + $0x58] sm:$0xff] }
 0x763   : > { %3434 = vmatprep.subr.bf16.mxu1 %v5465_v48  ;;  %v5505_v48 = vcombine.high %v2676_v43, %v2680_v45  ;;  %v2578_v42 = vld [vmem:[%s7321_s5 + $0x78] sm:$0xff] }
 0x764   : > { %3392 = vmatpush1.bf16.msra.mxu0 %v5462_v49  ;;  %v2683_v49 = vld [vmem:[%s7321_s5 + $0x3c0] sm:$0xff]  ;;  %v5405_v45 = vcombine.high %v2574_v41, %v2578_v42 }
 0x765   : > { %3393 = vmatprep.subr.bf16.mxu0 %v5471_v10 }
 0x766   : > { %3435 = vmatpush1.bf16.msra.mxu1 %v5464_v50  ;;  %v2687_v50 = vld [vmem:[%s7321_s5 + $0x3e0] sm:$0xff] }
 0x767   : > { %3436 = vmatprep.subr.bf16.mxu1 %v5473_v15 }
 0x768   : > { %3394 = vmatpush1.bf16.msra.mxu0 %v5470_v12 }
 0x769   : > { %3395 = vmatprep.subr.bf16.mxu0 %v5479_v19  ;;  %v7711_v19 = vsub.s32 3, %v7381_v0 }
 0x76a   : > { %3437 = vmatpush1.bf16.msra.mxu1 %v5472_v14 }
 0x76b   : > { %3438 = vmatprep.subr.bf16.mxu1 %v5481_v23  ;;  %v2556_v30 = vrot.slane %v6369_v20, %v7711_v19 }
 0x76c   : > { %3396 = vmatpush1.bf16.msra.mxu0 %v5478_v3  ;;  %v2544_v3 = vrot.slane %v6369_v20, %v7708_v18  ;;  %v2606_v20 = vld [vmem:[%s7321_s5 + $0x158] sm:$0xff] }
 0x76d   : > { %3397 = vmatprep.subr.bf16.mxu0 %v5487_v29 }
 0x76e   : > { %3439 = vmatpush1.bf16.msra.mxu1 %v5480_v2  ;;  %v6370_v2 = vld [vmem:[%s7307_s6] sm:$0xff] }
 0x76f   : > { %3440 = vmatprep.subr.bf16.mxu1 %v5489_v32  ;;  %v2540_v23 = vrot.slane %v6370_v2, %v7708_v18 }
 0x770   : > { %3398 = vmatpush1.bf16.msra.mxu0 %v5486_v40  ;;  %v2552_v40 = vrot.slane %v6370_v2, %v7711_v19 }
 0x771   : > { %3399 = vmatprep.subr.bf16.mxu0 %v5495_v36 }
 0x772   : > { %3441 = vmatpush1.bf16.msra.mxu1 %v5488_v31 }
 0x773   : > { %3442 = vmatprep.subr.bf16.mxu1 %v5497_v25  ;;  %v2577_v25 = vld [vmem:[%s7321_s5 + $0x70] sm:$0xff] }
 0x774   : > { %3400 = vmatpush1.bf16.msra.mxu0 %v5494_v38 }
 0x775   : > { %3401 = vmatprep.subr.bf16.mxu0 %v5503_v44  ;;  %v2581_v44 = vld [vmem:[%s7321_s5 + $0x90] sm:$0xff] }
 0x776   : > { %3443 = vmatpush1.bf16.msra.mxu1 %v5496_v39  ;;  %v2573_v39 = vld [vmem:[%s7321_s5 + $0x50] sm:$0xff] }
 0x777   : > { %3444 = vmatprep.subr.bf16.mxu1 %v5505_v48  ;;  %v2586_v48 = vld [vmem:[%s7321_s5 + $0xb8] sm:$0xff] }
 0x778   : > { %3402 = vmatpush1.bf16.msra.mxu0 %v5502_v46  ;;  %v2585_v46 = vld [vmem:[%s7321_s5 + $0xb0] sm:$0xff] }
 0x77a   : > { %3445 = vmatpush1.bf16.msra.mxu1 %v5504_v47  ;;  %v2582_v47 = vld [vmem:[%s7321_s5 + $0x98] sm:$0xff] }
 0x7e2   : > { %v2507_v51 = vpop.xlane.xlu0 %2506 }
 0x7e3   : > { %v2511_v52 = vmul.f32 0.00390625, %v2507_v51  ;;  %v2684_v51 = vld [vmem:[%s7321_s5 + $0x3c8] sm:$0xff] }
 0x7e4   : > { %v2510_v53 = vpop.xlane.xlu1 %2509 }
 0x7e5   : > { %v7660_v54 = vsub.f32 %v7607_v17, %v2511_v52  ;;  %v7663_v55 = vsub.f32 %v7609_v21, %v2511_v52  ;;  %v2512_v56 = vmul.f32 0.00390625, %v2510_v53  ;;  %v5510_v52 = vcombine.low %v2683_v49, %v2687_v50 }
 0x7e6   : > { %v5511_v53 = vcombine.high %v2683_v49, %v2687_v50  ;;  %v5402_v49 = vcombine.low %v2573_v39, %v2577_v25  ;;  %v5404_v50 = vcombine.low %v2574_v41, %v2578_v42  ;;  %v2629_v41 = vld [vmem:[%s7321_s5 + $0x210] sm:$0xff] }
 0x7e7   : > { %v7666_v57 = vsub.f32 %v7611_v22, %v2512_v56  ;;  %v7669_v58 = vsub.f32 %v7613_v24, %v2512_v56  ;;  %v2517_v59 = vmul.f32 %v7660_v54, %v7660_v54  ;;  %v2518_v60 = vmul.f32 %v7663_v55, %v7663_v55  ;;  %v2688_v56 = vld [vmem:[%s7321_s5 + $0x3e8] sm:$0xff]  ;;  %v2633_v42 = vld [vmem:[%s7321_s5 + $0x230] sm:$0xff] }
 0x7e8   : > { %3403 = vmatprep.subr.bf16.mxu0 %v5511_v53  ;;  %v2589_v53 = vld [vmem:[%s7321_s5 + $0xd0] sm:$0xff] }
 0x7e9   : > { %v2521_v61 = vadd.f32 %v2518_v60, %v2517_v59  ;;  %v2519_v62 = vmul.f32 %v7666_v57, %v7666_v57  ;;  %v2520_v4 = vmul.f32 %v7669_v58, %v7669_v58  ;;  %v5512_v59 = vcombine.low %v2684_v51, %v2688_v56  ;;  %3404 = vmatpush1.bf16.msra.mxu0 %v5510_v52 }
 0x7ea   : > { %v5513_v60 = vcombine.high %v2684_v51, %v2688_v56  ;;  %v5411_v51 = vcombine.high %v2581_v44, %v2585_v46  ;;  %v5413_v52 = vcombine.high %v2582_v47, %v2586_v48  ;;  %v2593_v56 = vld [vmem:[%s7321_s5 + $0xf0] sm:$0xff] }
 0x7eb   : > { %2522 = vadd.xlane.f32.xlu0 %v2521_v61  ;;  %v2524_v6 = vadd.f32 %v2520_v4, %v2519_v62  ;;  %v2565_v61 = vld [vmem:[%s7321_s5 + $0x10] sm:$0xff]  ;;  %v2566_v4 = vld [vmem:[%s7321_s5 + $0x18] sm:$0xff] }
 0x7ec   : > { %3446 = vmatprep.subr.bf16.mxu1 %v5513_v60  ;;  %v2569_v62 = vld [vmem:[%s7321_s5 + $0x30] sm:$0xff]  ;;  %v5396_v9 = vcombine.low %v2566_v4, %v2570_v7  ;;  %v5397_v10 = vcombine.high %v2566_v4, %v2570_v7  ;;  %v2594_v60 = vld [vmem:[%s7321_s5 + $0xf8] sm:$0xff]  ;;  %v5419_v4 = vcombine.high %v2589_v53, %v2593_v56 }
 0x7ed   : > { %2525 = vadd.xlane.f32.xlu1 %v2524_v6  ;;  %3447 = vmatpush1.bf16.msra.mxu1 %v5512_v59  ;;  %v5395_v6 = vcombine.high %v2565_v61, %v2569_v62  ;;  %v5394_v8 = vcombine.low %v2565_v61, %v2569_v62  ;;  %v2590_v59 = vld [vmem:[%s7321_s5 + $0xd8] sm:$0xff]  ;;  %v5410_v61 = vcombine.low %v2581_v44, %v2585_v46  ;;  %v2597_v7 = vld [vmem:[%s7321_s5 + $0x110] sm:$0xff] }
 0x7ee   : > { %3502 = vmatprep.subr.bf16.mxu1 %v5397_v10  ;;  %v5412_v62 = vcombine.low %v2582_v47, %v2586_v48  ;;  %v2602_v10 = vld [vmem:[%s7321_s5 + $0x138] sm:$0xff]  ;;  %v5459_v46 = vcombine.high %v2629_v41, %v2633_v42  ;;  %v2637_v48 = vld [vmem:[%s7321_s5 + $0x250] sm:$0xff] }
 0x7ef   : > { %3459 = vmatprep.subr.bf16.mxu0 %v5395_v6  ;;  %v5421_v6 = vcombine.high %v2590_v59, %v2594_v60  ;;  %v2634_v44 = vld [vmem:[%s7321_s5 + $0x238] sm:$0xff] }
 0x878   : > { %v2523_v11 = vpop.xlane.xlu0 %2522 }
 0x879   : > { %v2527_v12 = vmul.f32 0.00390625, %v2523_v11  ;;  %v5418_v11 = vcombine.low %v2589_v53, %v2593_v56 }
 0x87a   : > { %v2526_v14 = vpop.xlane.xlu1 %2525 }
 0x87b   : > { %v2529_v15 = vadd.f32 1e-05, %v2527_v12  ;;  %v2528_v13 = vmul.f32 0.00390625, %v2526_v14  ;;  %v5420_v12 = vcombine.low %v2590_v59, %v2594_v60  ;;  %v2645_v60 = vld [vmem:[%s7321_s5 + $0x290] sm:$0xff] }
 0x87d   : > { %6329 = vrsqrt.f32 %v2529_v15  ;;  %v2530_v16 = vadd.f32 1e-05, %v2528_v13  ;;  %v2605_v13 = vld [vmem:[%s7321_s5 + $0x150] sm:$0xff] }
 0x87f   : > { %6331 = vrsqrt.f32 %v2530_v16  ;;  %v2609_v16 = vld [vmem:[%s7321_s5 + $0x170] sm:$0xff] }
 0x887   : > { %v6330_v26 = vpop.eup %6329 }
 0x888   : > { %v2533_v27 = vmul.f32 %v6330_v26, %v7660_v54  ;;  %v2534_v28 = vmul.f32 %v6330_v26, %v7663_v55  ;;  %v5435_v26 = vcombine.high %v2605_v13, %v2609_v16 }
 0x889   : > { %v6332_v29 = vpop.eup %6331 }
 0x88a   : > { %v2535_v31 = vmul.f32 %v6332_v29, %v7666_v57  ;;  %v2536_v32 = vmul.f32 %v6332_v29, %v7669_v58  ;;  %v2546_v33 = vmul.f32 %v2544_v3, %v2534_v28  ;;  %v2545_v34 = vmul.f32 %v2540_v23, %v2533_v27  ;;  %v2613_v28 = vld [vmem:[%s7321_s5 + $0x190] sm:$0xff] }
 0x88b   : > { %v5403_v58 = vcombine.high %v2573_v39, %v2577_v25  ;;  %v2617_v29 = vld [vmem:[%s7321_s5 + $0x1b0] sm:$0xff] }
 0x88c   : > { %v2548_v35 = vmul.f32 %v2544_v3, %v2536_v32  ;;  %v2547_v36 = vmul.f32 %v2540_v23, %v2535_v31  ;;  %v2558_v54 = vadd.f32 %v2556_v30, %v2546_v33  ;;  %v2557_v37 = vadd.f32 %v2552_v40, %v2545_v34  ;;  %v2610_v3 = vld [vmem:[%s7321_s5 + $0x178] sm:$0xff] }
 0x88d   : > { %v5437_v27 = vcombine.high %v2606_v20, %v2610_v3  ;;  %v5434_v31 = vcombine.low %v2605_v13, %v2609_v16  ;;  %v5436_v32 = vcombine.low %v2606_v20, %v2610_v3  ;;  %v5443_v33 = vcombine.high %v2613_v28, %v2617_v29  ;;  %v2661_v3 = vld [vmem:[%s7321_s5 + $0x310] sm:$0xff] }
 0x88e   : > { %v2560_v55 = vadd.f32 %v2556_v30, %v2548_v35  ;;  %v2559_v38 = vadd.f32 %v2552_v40, %v2547_v36  ;;  %v2614_v30 = vld [vmem:[%s7321_s5 + $0x198] sm:$0xff]  ;;  %v2621_v35 = vld [vmem:[%s7321_s5 + $0x1d0] sm:$0xff] }
 0x88f   : > { %v2618_v40 = vld [vmem:[%s7321_s5 + $0x1b8] sm:$0xff]  ;;  %v2625_v36 = vld [vmem:[%s7321_s5 + $0x1f0] sm:$0xff] }
 0x890   : > { %v2562_v43 = vpack.c.bf16 %v2560_v55, %v2558_v54  ;;  %v7727_v57 = vpack.c.bf16 %v2559_v38, %v2557_v37  ;;  %v5445_v34 = vcombine.high %v2614_v30, %v2618_v40  ;;  %v2622_v54 = vld [vmem:[%s7321_s5 + $0x1d8] sm:$0xff]  ;;  %v5442_v37 = vcombine.low %v2613_v28, %v2617_v29 }
 0x891   : > { %v2626_v55 = vld [vmem:[%s7321_s5 + $0x1f8] sm:$0xff]  ;;  %v5444_v38 = vcombine.low %v2614_v30, %v2618_v40  ;;  %v5451_v39 = vcombine.high %v2621_v35, %v2625_v36  ;;  %v2669_v40 = vld [vmem:[%s7321_s5 + $0x350] sm:$0xff] }
 0x892   : > { %3405 = vmatprep.mubr.bf16.mxu0 %v2562_v43  ;;  %3448 = vmatprep.mubr.bf16.mxu1 %v2562_v43  ;;  %v5453_v25 = vcombine.high %v2622_v54, %v2626_v55 }
 0x893   : > { %3406 = vmatmul.mubr.bf16.vlgmr.msra.gmra.mrb[8].mxu0 %v7727_v57  ;;  %3449 = vmatmul.mubr.bf16.vlgmr.msra.gmra.mrb[24].mxu1 %v7727_v57 }
 0x894   : > { %3460 = vmatpush1.bf16.msra.mxu0 %v5394_v8  ;;  %3503 = vmatpush1.bf16.msra.mxu1 %v5396_v9  ;;  %v2601_v8 = vld [vmem:[%s7321_s5 + $0x130] sm:$0xff]  ;;  %v2598_v9 = vld [vmem:[%s7321_s5 + $0x118] sm:$0xff] }
 0x895   : > { %3491 = vmatprep.mubr.bf16.mxu0 %v2562_v43  ;;  %3534 = vmatprep.mubr.bf16.mxu1 %v2562_v43  ;;  %v5427_v14 = vcombine.high %v2597_v7, %v2601_v8  ;;  %v5429_v15 = vcombine.high %v2598_v9, %v2602_v10  ;;  %v5426_v2 = vcombine.low %v2597_v7, %v2601_v8  ;;  %v2630_v43 = vld [vmem:[%s7321_s5 + $0x218] sm:$0xff] }
 0x896   : > { %3461 = vmatprep.subr.bf16.mxu0 %v5403_v58  ;;  %3504 = vmatprep.subr.bf16.mxu1 %v5405_v45  ;;  %v5428_v23 = vcombine.low %v2598_v9, %v2602_v10  ;;  %v5450_v58 = vcombine.low %v2621_v35, %v2625_v36  ;;  %v5452_v45 = vcombine.low %v2622_v54, %v2626_v55  ;;  %v2653_v10 = vld [vmem:[%s7321_s5 + $0x2d0] sm:$0xff] }
 0x897   : > { %v5461_v47 = vcombine.high %v2630_v43, %v2634_v44  ;;  %v5460_v53 = vcombine.low %v2630_v43, %v2634_v44  ;;  %v2677_v55 = vld [vmem:[%s7321_s5 + $0x390] sm:$0xff] }
 0x898   : > { %3462 = vmatpush1.bf16.msra.mxu0 %v5402_v49  ;;  %3505 = vmatpush1.bf16.msra.mxu1 %v5404_v50  ;;  %v2641_v49 = vld [vmem:[%s7321_s5 + $0x270] sm:$0xff]  ;;  %v2638_v50 = vld [vmem:[%s7321_s5 + $0x258] sm:$0xff] }
 0x899   : > { %3463 = vmatprep.subr.bf16.mxu0 %v5411_v51  ;;  %3506 = vmatprep.subr.bf16.mxu1 %v5413_v52  ;;  %v2642_v51 = vld [vmem:[%s7321_s5 + $0x278] sm:$0xff]  ;;  %v5458_v52 = vcombine.low %v2629_v41, %v2633_v42  ;;  %v5467_v56 = vcombine.high %v2637_v48, %v2641_v49  ;;  %v2685_v44 = vld [vmem:[%s7321_s5 + $0x3d0] sm:$0xff] }
 0x89a   : > { %v5469_v59 = vcombine.high %v2638_v50, %v2642_v51  ;;  %v5468_v7 = vcombine.low %v2638_v50, %v2642_v51 }
 0x89c   : > { %3464 = vmatpush1.bf16.msra.mxu0 %v5410_v61  ;;  %3507 = vmatpush1.bf16.msra.mxu1 %v5412_v62  ;;  %v2649_v61 = vld [vmem:[%s7321_s5 + $0x2b0] sm:$0xff]  ;;  %v2646_v62 = vld [vmem:[%s7321_s5 + $0x298] sm:$0xff] }
 0x89d   : > { %3465 = vmatprep.subr.bf16.mxu0 %v5419_v4  ;;  %3508 = vmatprep.subr.bf16.mxu1 %v5421_v6  ;;  %v2650_v4 = vld [vmem:[%s7321_s5 + $0x2b8] sm:$0xff]  ;;  %v5466_v6 = vcombine.low %v2637_v48, %v2641_v49  ;;  %v5475_v8 = vcombine.high %v2645_v60, %v2649_v61 }
 0x89e   : > { %v5477_v9 = vcombine.high %v2646_v62, %v2650_v4  ;;  %v5476_v13 = vcombine.low %v2646_v62, %v2650_v4  ;;  %v6123_v62 = vld [vmem:[%s7329_s23 + $0x20] ss:$8 sps:$4 sm:$0xff]   ;;  %v6128_v4 = vld [vmem:[%s7329_s23 + $0x34] ss:$8 sps:$4 sm:$0xff]  }
 0x8a0   : > { %3466 = vmatpush1.bf16.msra.mxu0 %v5418_v11  ;;  %3509 = vmatpush1.bf16.msra.mxu1 %v5420_v12  ;;  %v2657_v11 = vld [vmem:[%s7321_s5 + $0x2f0] sm:$0xff]  ;;  %v2654_v12 = vld [vmem:[%s7321_s5 + $0x2d8] sm:$0xff] }
 0x8a1   : > { %3467 = vmatprep.subr.bf16.mxu0 %v5427_v14  ;;  %3510 = vmatprep.subr.bf16.mxu1 %v5429_v15  ;;  %v2658_v14 = vld [vmem:[%s7321_s5 + $0x2f8] sm:$0xff]  ;;  %v5474_v15 = vcombine.low %v2645_v60, %v2649_v61  ;;  %v5483_v16 = vcombine.high %v2653_v10, %v2657_v11  ;;  %v6120_v60 = vld [vmem:[%s7329_s23 + $0x10] ss:$8 sps:$4 sm:$0xff]  }
 0x8a2   : > { %v5485_v20 = vcombine.high %v2654_v12, %v2658_v14  ;;  %v5484_v28 = vcombine.low %v2654_v12, %v2658_v14  ;;  %v6125_v61 = vld [vmem:[%s7329_s23 + $0x24] ss:$8 sps:$4 sm:$0xff]   ;;  %v6140_v12 = vld [vmem:[%s7329_s23 + $0x74] ss:$8 sps:$4 sm:$0xff]   ;;  %v6138_v14 = vld [vmem:[%s7329_s23 + $0x70] ss:$8 sps:$4 sm:$0xff]  }
 0x8a4   : > { %3468 = vmatpush1.bf16.msra.mxu0 %v5426_v2  ;;  %3511 = vmatpush1.bf16.msra.mxu1 %v5428_v23  ;;  %v2665_v2 = vld [vmem:[%s7321_s5 + $0x330] sm:$0xff]  ;;  %v2662_v23 = vld [vmem:[%s7321_s5 + $0x318] sm:$0xff] }
 0x8a5   : > { %3469 = vmatprep.subr.bf16.mxu0 %v5435_v26  ;;  %3512 = vmatprep.subr.bf16.mxu1 %v5437_v27  ;;  %v2666_v26 = vld [vmem:[%s7321_s5 + $0x338] sm:$0xff]  ;;  %v5482_v27 = vcombine.low %v2653_v10, %v2657_v11  ;;  %v5491_v29 = vcombine.high %v2661_v3, %v2665_v2 }
 0x8a6   : > { %v5493_v30 = vcombine.high %v2662_v23, %v2666_v26  ;;  %v5492_v35 = vcombine.low %v2662_v23, %v2666_v26  ;;  %v6137_v10 = vld [vmem:[%s7329_s23 + $0x64] ss:$8 sps:$4 sm:$0xff]   ;;  %v6135_v11 = vld [vmem:[%s7329_s23 + $0x60] ss:$8 sps:$4 sm:$0xff]   ;;  %v6152_v23 = vld [vmem:[%s7329_s23 + $0xb4] ss:$8 sps:$4 sm:$0xff]  }
 0x8a7   : > { %v6150_v26 = vld [vmem:[%s7329_s23 + $0xb0] ss:$8 sps:$4 sm:$0xff]  }
 0x8a8   : > { %3470 = vmatpush1.bf16.msra.mxu0 %v5434_v31  ;;  %3513 = vmatpush1.bf16.msra.mxu1 %v5436_v32  ;;  %v2673_v31 = vld [vmem:[%s7321_s5 + $0x370] sm:$0xff]  ;;  %v2670_v32 = vld [vmem:[%s7321_s5 + $0x358] sm:$0xff] }
 0x8a9   : > { %3471 = vmatprep.subr.bf16.mxu0 %v5443_v33  ;;  %3514 = vmatprep.subr.bf16.mxu1 %v5445_v34  ;;  %v2674_v33 = vld [vmem:[%s7321_s5 + $0x378] sm:$0xff]  ;;  %v5490_v34 = vcombine.low %v2661_v3, %v2665_v2  ;;  %v5499_v36 = vcombine.high %v2669_v40, %v2673_v31 }
 0x8aa   : > { %v5501_v54 = vcombine.high %v2670_v32, %v2674_v33  ;;  %v5500_v41 = vcombine.low %v2670_v32, %v2674_v33  ;;  %v6149_v3 = vld [vmem:[%s7329_s23 + $0xa4] ss:$8 sps:$4 sm:$0xff]   ;;  %v6147_v2 = vld [vmem:[%s7329_s23 + $0xa0] ss:$8 sps:$4 sm:$0xff]   ;;  %v6164_v32 = vld [vmem:[%s7329_s23 + $0xf4] ss:$8 sps:$4 sm:$0xff]  }
 0x8ab   : > { %v6162_v33 = vld [vmem:[%s7329_s23 + $0xf0] ss:$8 sps:$4 sm:$0xff]  }
 0x8ac   : > { %3472 = vmatpush1.bf16.msra.mxu0 %v5442_v37  ;;  %3515 = vmatpush1.bf16.msra.mxu1 %v5444_v38  ;;  %v2681_v37 = vld [vmem:[%s7321_s5 + $0x3b0] sm:$0xff]  ;;  %v2678_v38 = vld [vmem:[%s7321_s5 + $0x398] sm:$0xff] }
 0x8ad   : > { %3473 = vmatprep.subr.bf16.mxu0 %v5451_v39  ;;  %3516 = vmatprep.subr.bf16.mxu1 %v5453_v25  ;;  %v2682_v39 = vld [vmem:[%s7321_s5 + $0x3b8] sm:$0xff]  ;;  %v5498_v25 = vcombine.low %v2669_v40, %v2673_v31  ;;  %v5507_v42 = vcombine.high %v2677_v55, %v2681_v37 }
 0x8ae   : > { %v5509_v43 = vcombine.high %v2678_v38, %v2682_v39  ;;  %v5508_v48 = vcombine.low %v2678_v38, %v2682_v39  ;;  %v6161_v40 = vld [vmem:[%s7329_s23 + $0xe4] ss:$8 sps:$4 sm:$0xff]   ;;  %v6159_v31 = vld [vmem:[%s7329_s23 + $0xe0] ss:$8 sps:$4 sm:$0xff]  }
 0x8b0   : > { %3474 = vmatpush1.bf16.msra.mxu0 %v5450_v58  ;;  %3517 = vmatpush1.bf16.msra.mxu1 %v5452_v45  ;;  %v2689_v58 = vld [vmem:[%s7321_s5 + $0x3f0] sm:$0xff]  ;;  %v2686_v45 = vld [vmem:[%s7321_s5 + $0x3d8] sm:$0xff] }
 0x8b1   : > { %3475 = vmatprep.subr.bf16.mxu0 %v5459_v46  ;;  %3518 = vmatprep.subr.bf16.mxu1 %v5461_v47  ;;  %v2690_v46 = vld [vmem:[%s7321_s5 + $0x3f8] sm:$0xff]  ;;  %v5506_v47 = vcombine.low %v2677_v55, %v2681_v37  ;;  %v5515_v49 = vcombine.high %v2685_v44, %v2689_v58  ;;  %v5514_v51 = vcombine.low %v2685_v44, %v2689_v58  ;;  %s8290_s5 = sld [smem:[#allocation43_spill]] (!%p5646_p6) }
 0x8b2   : > { %v5517_v50 = vcombine.high %v2686_v45, %v2690_v46 }
 0x8b4   : > { %3476 = vmatpush1.bf16.msra.mxu0 %v5458_v52  ;;  %3519 = vmatpush1.bf16.msra.mxu1 %v5460_v53  ;;  %v5516_v52 = vcombine.low %v2686_v45, %v2690_v46  ;;  %v6119_v53 = vld [vmem:[%s7329_s23 + $0x4] ss:$8 sps:$4 sm:$0xff]  }
 0x8b5   : > { %3477 = vmatprep.subr.bf16.mxu0 %v5467_v56  ;;  %3520 = vmatprep.subr.bf16.mxu1 %v5469_v59  ;;  %v6117_v56 = vld [vmem:[%s7329_s23] ss:$8 sps:$4 sm:$0xff]   ;;  %v6122_v59 = vld [vmem:[%s7329_s23 + $0x14] ss:$8 sps:$4 sm:$0xff]  }
 0x8b8   : > { %3478 = vmatpush1.bf16.msra.mxu0 %v5466_v6  ;;  %3521 = vmatpush1.bf16.msra.mxu1 %v5468_v7  ;;  %v6126_v6 = vld [vmem:[%s7329_s23 + $0x30] ss:$8 sps:$4 sm:$0xff]   ;;  %v6131_v7 = vld [vmem:[%s7329_s23 + $0x44] ss:$8 sps:$4 sm:$0xff]  }
 0x8b9   : > { %3479 = vmatprep.subr.bf16.mxu0 %v5475_v8  ;;  %3522 = vmatprep.subr.bf16.mxu1 %v5477_v9  ;;  %v6134_v8 = vld [vmem:[%s7329_s23 + $0x54] ss:$8 sps:$4 sm:$0xff]   ;;  %v6132_v9 = vld [vmem:[%s7329_s23 + $0x50] ss:$8 sps:$4 sm:$0xff]  }
 0x8bc   : > { %3480 = vmatpush1.bf16.msra.mxu0 %v5474_v15  ;;  %3523 = vmatpush1.bf16.msra.mxu1 %v5476_v13  ;;  %v6143_v15 = vld [vmem:[%s7329_s23 + $0x84] ss:$8 sps:$4 sm:$0xff]   ;;  %v6141_v13 = vld [vmem:[%s7329_s23 + $0x80] ss:$8 sps:$4 sm:$0xff]  }
 0x8bd   : > { %3481 = vmatprep.subr.bf16.mxu0 %v5483_v16  ;;  %3524 = vmatprep.subr.bf16.mxu1 %v5485_v20  ;;  %v6146_v16 = vld [vmem:[%s7329_s23 + $0x94] ss:$8 sps:$4 sm:$0xff]   ;;  %v6144_v20 = vld [vmem:[%s7329_s23 + $0x90] ss:$8 sps:$4 sm:$0xff]  }
 0x8c0   : > { %3482 = vmatpush1.bf16.msra.mxu0 %v5482_v27  ;;  %3525 = vmatpush1.bf16.msra.mxu1 %v5484_v28  ;;  %v6155_v27 = vld [vmem:[%s7329_s23 + $0xc4] ss:$8 sps:$4 sm:$0xff]   ;;  %v6153_v28 = vld [vmem:[%s7329_s23 + $0xc0] ss:$8 sps:$4 sm:$0xff]  }
 0x8c1   : > { %3483 = vmatprep.subr.bf16.mxu0 %v5491_v29  ;;  %3526 = vmatprep.subr.bf16.mxu1 %v5493_v30  ;;  %v6158_v29 = vld [vmem:[%s7329_s23 + $0xd4] ss:$8 sps:$4 sm:$0xff]   ;;  %v6156_v30 = vld [vmem:[%s7329_s23 + $0xd0] ss:$8 sps:$4 sm:$0xff]  }
 0x8c4   : > { %3484 = vmatpush1.bf16.msra.mxu0 %v5490_v34  ;;  %3527 = vmatpush1.bf16.msra.mxu1 %v5492_v35  ;;  %v6167_v34 = vld [vmem:[%s7329_s23 + $0x104] ss:$8 sps:$4 sm:$0xff]   ;;  %v7823_v35 = vld [vmem:[%s7323_s16] sm:$0xff] }
 0x8c5   : > { %3485 = vmatprep.subr.bf16.mxu0 %v5499_v36  ;;  %3528 = vmatprep.subr.bf16.mxu1 %v5501_v54  ;;  %v2696_v36 = vrot.slane %v7823_v35, %v7384_v1  ;;  %v2704_v54 = vrot.slane %v7823_v35, %v7708_v18  ;;  %v2700_v55 = vrot.slane %v7823_v35, %v7393_v5 }
 0x8c6   : > { %v2708_v37 = vrot.slane %v7823_v35, %v7711_v19 }
 0x8c8   : > { %3486 = vmatpush1.bf16.msra.mxu0 %v5498_v25  ;;  %3529 = vmatpush1.bf16.msra.mxu1 %v5500_v41 }
 0x8c9   : > { %3487 = vmatprep.subr.bf16.mxu0 %v5507_v42  ;;  %3530 = vmatprep.subr.bf16.mxu1 %v5509_v43 }
 0x8cc   : > { %3488 = vmatpush1.bf16.msra.mxu0 %v5506_v47  ;;  %3531 = vmatpush1.bf16.msra.mxu1 %v5508_v48 }
 0x8cd   : > { %3489 = vmatprep.subr.bf16.mxu0 %v5515_v49  ;;  %3532 = vmatprep.subr.bf16.mxu1 %v5517_v50 }
 0x8d0   : > { %3490 = vmatpush1.bf16.msra.mxu0 %v5514_v51  ;;  %3533 = vmatpush1.bf16.msra.mxu1 %v5516_v52 }
 0x8d1   : > { %4473 = vmatprep.subr.bf16.mxu0 %v6119_v53 }
 0x8d3   : > { %3492 = vmatmul.mubr.bf16.vlgmr.msra.gmra.mrb[12].mxu0 %v7727_v57  ;;  %3535 = vmatmul.mubr.bf16.vlgmr.msra.gmra.mrb[28].mxu1 %v7727_v57  ;;  %v6129_v57 = vld [vmem:[%s7329_s23 + $0x40] ss:$8 sps:$4 sm:$0xff]  }
 0x8d4   : > { %4474 = vmatpush1.bf16.msra.mxu0 %v6117_v56 }
 0x8d5   : > { %4475 = vmatprep.subr.bf16.mxu0 %v6122_v59 }
 0x8d8   : > { %4476 = vmatpush1.bf16.msra.mxu0 %v6120_v60 }
 0x8d9   : > { %4477 = vmatprep.subr.bf16.mxu0 %v6125_v61 }
 0x8dc   : > { %4478 = vmatpush1.bf16.msra.mxu0 %v6123_v62 }
 0x8dd   : > { %4479 = vmatprep.subr.bf16.mxu0 %v6128_v4 }
 0x8e0   : > { %4480 = vmatpush1.bf16.msra.mxu0 %v6126_v6 }
 0x8e1   : > { %4481 = vmatprep.subr.bf16.mxu0 %v6131_v7 }
 0x8e4   : > { %4482 = vmatpush1.bf16.msra.mxu0 %v6129_v57 }
 0x8e5   : > { %4483 = vmatprep.subr.bf16.mxu0 %v6134_v8 }
 0x8e8   : > { %4484 = vmatpush1.bf16.msra.mxu0 %v6132_v9 }
 0x8e9   : > { %4485 = vmatprep.subr.bf16.mxu0 %v6137_v10 }
 0x8ec   : > { %4486 = vmatpush1.bf16.msra.mxu0 %v6135_v11 }
 0x8ed   : > { %4487 = vmatprep.subr.bf16.mxu0 %v6140_v12 }
 0x8f0   : > { %4488 = vmatpush1.bf16.msra.mxu0 %v6138_v14 }
 0x8f1   : > { %4489 = vmatprep.subr.bf16.mxu0 %v6143_v15 }
 0x8f4   : > { %4490 = vmatpush1.bf16.msra.mxu0 %v6141_v13 }
 0x8f5   : > { %4491 = vmatprep.subr.bf16.mxu0 %v6146_v16 }
 0x8f8   : > { %4492 = vmatpush1.bf16.msra.mxu0 %v6144_v20 }
 0x8f9   : > { %4493 = vmatprep.subr.bf16.mxu0 %v6149_v3 }
 0x8fc   : > { %4494 = vmatpush1.bf16.msra.mxu0 %v6147_v2 }
 0x8fd   : > { %4495 = vmatprep.subr.bf16.mxu0 %v6152_v23 }
 0x900   : > { %4496 = vmatpush1.bf16.msra.mxu0 %v6150_v26 }
 0x901   : > { %4497 = vmatprep.subr.bf16.mxu0 %v6155_v27 }
 0x904   : > { %4498 = vmatpush1.bf16.msra.mxu0 %v6153_v28 }
 0x905   : > { %4499 = vmatprep.subr.bf16.mxu0 %v6158_v29 }
 0x908   : > { %4500 = vmatpush1.bf16.msra.mxu0 %v6156_v30 }
 0x909   : > { %4501 = vmatprep.subr.bf16.mxu0 %v6161_v40 }
 0x90c   : > { %4502 = vmatpush1.bf16.msra.mxu0 %v6159_v31 }
 0x90d   : > { %4503 = vmatprep.subr.bf16.mxu0 %v6164_v32 }
 0x910   : > { %4504 = vmatpush1.bf16.msra.mxu0 %v6162_v33 }
 0x911   : > { %4516 = vmatprep.subr.bf16.mxu0 %v6167_v34 }
 0x966   : > { %v3407_v38 = vpop.f32.mrb[8].mxu0  ;;  %v3450_v39 = vpop.f32.mrb[24].mxu1 }
 0x967   : > { %v7833_v25 = vadd.f32 %v3407_v38, %v2696_v36  ;;  %v7835_v41 = vadd.f32 %v3450_v39, %v2704_v54  ;;  %v3409_v42 = vpop.f32.mrb[9].mxu0  ;;  %v3452_v43 = vpop.f32.mrb[25].mxu1 }
 0x968   : > { %v7837_v44 = vadd.f32 %v3409_v42, %v2700_v55  ;;  %v7839_v58 = vadd.f32 %v3452_v43, %v2708_v37  ;;  %v3411_v45 = vpop.f32.mrb[10].mxu0  ;;  %v3454_v18 = vpop.f32.mrb[26].mxu1 }
 0x969   : > { %v3561_v46 = vmul.f32 %v7833_v25, %v7833_v25  ;;  %v3563_v19 = vmul.f32 %v7835_v41, %v7835_v41  ;;  %v3413_v47 = vpop.f32.mrb[11].mxu0  ;;  %v3456_v48 = vpop.f32.mrb[27].mxu1  ;;  %v3412_v51 = vadd.f32 %v3411_v45, %v2696_v36  ;;  %v3455_v52 = vadd.f32 %v3454_v18, %v2704_v54 }
 0x96a   : > { %v3562_v49 = vmul.f32 %v7837_v44, %v7837_v44  ;;  %v3564_v50 = vmul.f32 %v7839_v58, %v7839_v58  ;;  %v3414_v59 = vadd.f32 %v3413_v47, %v2700_v55  ;;  %v7851_v60 = vadd.f32 %v3456_v48, %v2708_v37 }
 0x96b   : > { %v3577_v53 = vmul.f32 %v3561_v46, %v7833_v25  ;;  %v3579_v56 = vmul.f32 %v3563_v19, %v7835_v41  ;;  %v3569_v4 = vmul.f32 %v3412_v51, %v3412_v51  ;;  %v3571_v57 = vmul.f32 %v3455_v52, %v3455_v52 }
 0x96c   : > { %v3578_v61 = vmul.f32 %v3562_v49, %v7837_v44  ;;  %v3580_v62 = vmul.f32 %v3564_v50, %v7839_v58  ;;  %v3570_v11 = vmul.f32 %v3414_v59, %v3414_v59  ;;  %v3572_v13 = vmul.f32 %v7851_v60, %v7851_v60 }
 0x96d   : > { %v3593_v6 = vmul.f32 0.044715, %v3577_v53  ;;  %v3595_v7 = vmul.f32 0.044715, %v3579_v56  ;;  %v3585_v10 = vmul.f32 %v3569_v4, %v3412_v51  ;;  %v3587_v15 = vmul.f32 %v3571_v57, %v3455_v52 }
 0x96e   : > { %v3594_v8 = vmul.f32 0.044715, %v3578_v61  ;;  %v3596_v9 = vmul.f32 0.044715, %v3580_v62  ;;  %v3586_v2 = vmul.f32 %v3570_v11, %v3414_v59  ;;  %v3588_v28 = vmul.f32 %v3572_v13, %v7851_v60 }
 0x96f   : > { %v3609_v12 = vadd.f32 %v3593_v6, %v7833_v25  ;;  %v3611_v14 = vadd.f32 %v3595_v7, %v7835_v41  ;;  %v3601_v3 = vmul.f32 0.044715, %v3585_v10  ;;  %v3603_v27 = vmul.f32 0.044715, %v3587_v15 }
 0x970   : > { %v3610_v16 = vadd.f32 %v3594_v8, %v7837_v44  ;;  %v3612_v20 = vadd.f32 %v3596_v9, %v7839_v58  ;;  %v3602_v31 = vmul.f32 0.044715, %v3586_v2  ;;  %v3604_v33 = vmul.f32 0.044715, %v3588_v28  ;;  %v6168_v2 = vld [vmem:[%s7329_s23 + $0x110] ss:$8 sps:$4 sm:$0xff]  }
 0x971   : > { %v3625_v23 = vmul.f32 0.7978846, %v3609_v12  ;;  %v3627_v26 = vmul.f32 0.7978846, %v3611_v14  ;;  %v3617_v40 = vadd.f32 %v3601_v3, %v3412_v51  ;;  %v3619_v32 = vadd.f32 %v3603_v27, %v3455_v52  ;;  %v6170_v3 = vld [vmem:[%s7329_s23 + $0x114] ss:$8 sps:$4 sm:$0xff]  }
 0x972   : > { %v3626_v29 = vmul.f32 0.7978846, %v3610_v16  ;;  %v3628_v30 = vmul.f32 0.7978846, %v3612_v20  ;;  %v3618_v36 = vadd.f32 %v3602_v31, %v3414_v59  ;;  %v3620_v55 = vadd.f32 %v3604_v33, %v7851_v60  ;;  %v6176_v27 = vld [vmem:[%s7329_s23 + $0x134] ss:$8 sps:$4 sm:$0xff]  }
 0x973   : > { %6333 = vtanh.f32 %v3625_v23  ;;  %v3633_v34 = vmul.f32 0.7978846, %v3617_v40  ;;  %v3635_v54 = vmul.f32 0.7978846, %v3619_v32  ;;  %v3545_v19 = vmul.f32 0.5, %v7833_v25 }
 0x974   : > { %6335 = vtanh.f32 %v3627_v26  ;;  %v3634_v37 = vmul.f32 0.7978846, %v3618_v36  ;;  %v3636_v38 = vmul.f32 0.7978846, %v3620_v55  ;;  %v3547_v47 = vmul.f32 0.5, %v7835_v41 }
 0x975   : > { %6337 = vtanh.f32 %v3626_v29  ;;  %v3553_v50 = vmul.f32 0.5, %v3412_v51  ;;  %v3555_v53 = vmul.f32 0.5, %v3455_v52  ;;  %v3546_v4 = vmul.f32 0.5, %v7837_v44  ;;  %v6173_v23 = vld [vmem:[%s7329_s23 + $0x124] ss:$8 sps:$4 sm:$0xff]  }
 0x976   : > { %6339 = vtanh.f32 %v3628_v30  ;;  %v3554_v6 = vmul.f32 0.5, %v3414_v59  ;;  %v3548_v41 = vmul.f32 0.5, %v7839_v58  ;;  %v3556_v11 = vmul.f32 0.5, %v7851_v60  ;;  %v6165_v60 = vld [vmem:[%s7329_s23 + $0x100] ss:$8 sps:$4 sm:$0xff]  }
 0x977   : > { %6341 = vtanh.f32 %v3633_v34  ;;  %v6171_v26 = vld [vmem:[%s7329_s23 + $0x120] ss:$8 sps:$4 sm:$0xff]   ;;  %v6174_v28 = vld [vmem:[%s7329_s23 + $0x130] ss:$8 sps:$4 sm:$0xff]   ;;  %v6179_v29 = vld [vmem:[%s7329_s23 + $0x144] ss:$8 sps:$4 sm:$0xff]  }
 0x978   : > { %6343 = vtanh.f32 %v3635_v54  ;;  %v6177_v30 = vld [vmem:[%s7329_s23 + $0x140] ss:$8 sps:$4 sm:$0xff]   ;;  %v6182_v40 = vld [vmem:[%s7329_s23 + $0x154] ss:$8 sps:$4 sm:$0xff]   ;;  %v6180_v31 = vld [vmem:[%s7329_s23 + $0x150] ss:$8 sps:$4 sm:$0xff]  }
 0x979   : > { %6345 = vtanh.f32 %v3634_v37  ;;  %v6185_v32 = vld [vmem:[%s7329_s23 + $0x164] ss:$8 sps:$4 sm:$0xff]   ;;  %v2719_v33 = vsub.s32 6, %v7381_v0  ;;  %v6183_v34 = vld [vmem:[%s7329_s23 + $0x160] ss:$8 sps:$4 sm:$0xff]   ;;  %v7889_v36 = vsub.s32 5, %v7381_v0  ;;  %v2712_v37 = vrot.slane %v7823_v35, %v7601_v63 }
 0x97a   : > { %6347 = vtanh.f32 %v3636_v38  ;;  %v2723_v54 = vsub.s32 7, %v7381_v0  ;;  %v6188_v55 = vld [vmem:[%s7329_s23 + $0x174] ss:$8 sps:$4 sm:$0xff]  }
 0x97b   : > { %v2720_v38 = vrot.slane %v7823_v35, %v2719_v33  ;;  %v6195_v33 = vld [vmem:[%s7329_s23 + $0x1a0] ss:$8 sps:$4 sm:$0xff]  }
 0x97d   : > { %v6334_v39 = vpop.eup %6333 }
 0x97e   : > { %v6336_v42 = vpop.eup %6335  ;;  %v3657_v18 = vadd.f32 1.0, %v6334_v39  ;;  %v6186_v39 = vld [vmem:[%s7329_s23 + $0x170] ss:$8 sps:$4 sm:$0xff]  }
 0x97f   : > { %v6338_v43 = vpop.eup %6337  ;;  %v3659_v48 = vadd.f32 1.0, %v6336_v42  ;;  %v2716_v42 = vrot.slane %v7823_v35, %v7889_v36 }
 0x980   : > { %v6340_v45 = vpop.eup %6339  ;;  %v3658_v56 = vadd.f32 1.0, %v6338_v43  ;;  %v3673_v10 = vmul.f32 %v3657_v18, %v3545_v19  ;;  %v2724_v43 = vrot.slane %v7823_v35, %v2723_v54 }
 0x981   : > { %v6342_v46 = vpop.eup %6341  ;;  %v3660_v7 = vadd.f32 1.0, %v6340_v45  ;;  %v7868_v52 = vmul.f32 %v3659_v48, %v3547_v47  ;;  %v6191_v45 = vld [vmem:[%s7329_s23 + $0x184] ss:$8 sps:$4 sm:$0xff]  }
 0x982   : > { %v6344_v49 = vpop.eup %6343  ;;  %v3665_v61 = vadd.f32 1.0, %v6342_v46  ;;  %v3674_v44 = vmul.f32 %v3658_v56, %v3546_v4  ;;  %v6189_v56 = vld [vmem:[%s7329_s23 + $0x180] ss:$8 sps:$4 sm:$0xff]  }
 0x983   : > { %v6346_v62 = vpop.eup %6345  ;;  %v3667_v57 = vadd.f32 1.0, %v6344_v49  ;;  %v3676_v15 = vmul.f32 %v3660_v7, %v3548_v41 }
 0x984   : > { %v6348_v8 = vpop.eup %6347  ;;  %v3666_v9 = vadd.f32 1.0, %v6346_v62  ;;  %v3681_v25 = vmul.f32 %v3665_v61, %v3553_v50 }
 0x985   : > { %v3668_v51 = vadd.f32 1.0, %v6348_v8  ;;  %v7870_v12 = vmul.f32 %v3667_v57, %v3555_v53 }
 0x986   : > { %v3682_v59 = vmul.f32 %v3666_v9, %v3554_v6  ;;  %v3689_v14 = vpack.c.bf16 %v3681_v25, %v3673_v10  ;;  %v6194_v6 = vld [vmem:[%s7329_s23 + $0x194] ss:$8 sps:$4 sm:$0xff]  }
 0x987   : > { %v3684_v13 = vmul.f32 %v3668_v51, %v3556_v11  ;;  %v3691_v16 = vpack.c.bf16 %v7870_v12, %v7868_v52  ;;  %v6227_v52 = vld [vmem:[%s7329_s23 + $0x244] ss:$8 sps:$4 sm:$0xff]   ;;  %v6225_v12 = vld [vmem:[%s7329_s23 + $0x240] ss:$8 sps:$4 sm:$0xff]  }
 0x988   : > { %v3690_v58 = vpack.c.bf16 %v3682_v59, %v3674_v44 }
 0x989   : > { %v3692_v20 = vpack.c.bf16 %v3684_v13, %v3676_v15 }
 0x98a   : > { %4505 = vmatprep.mubr.bf16.mxu0 %v3690_v58 }
 0x98b   : > { %4506 = vmatmul.mubr.bf16.vlgmr.msra.gmra.mrb[16].mxu0 %v3689_v14  ;;  %v6192_v14 = vld [vmem:[%s7329_s23 + $0x190] ss:$8 sps:$4 sm:$0xff]  }
 0x98c   : > { %4517 = vmatpush1.bf16.msra.mxu0 %v6165_v60  ;;  %4548 = vmatprep.mubr.bf16.mxu0 %v3692_v20  ;;  %v6197_v60 = vld [vmem:[%s7329_s23 + $0x1a4] ss:$8 sps:$4 sm:$0xff]  }
 0x98d   : > { %4518 = vmatprep.subr.bf16.mxu0 %v6170_v3 }
 0x990   : > { %4519 = vmatpush1.bf16.msra.mxu0 %v6168_v2 }
 0x991   : > { %4520 = vmatprep.subr.bf16.mxu0 %v6173_v23 }
 0x994   : > { %4521 = vmatpush1.bf16.msra.mxu0 %v6171_v26 }
 0x995   : > { %4522 = vmatprep.subr.bf16.mxu0 %v6176_v27 }
 0x998   : > { %4523 = vmatpush1.bf16.msra.mxu0 %v6174_v28 }
 0x999   : > { %4524 = vmatprep.subr.bf16.mxu0 %v6179_v29 }
 0x99c   : > { %4525 = vmatpush1.bf16.msra.mxu0 %v6177_v30 }
 0x99d   : > { %4526 = vmatprep.subr.bf16.mxu0 %v6182_v40 }
 0x9a0   : > { %4527 = vmatpush1.bf16.msra.mxu0 %v6180_v31 }
 0x9a1   : > { %4528 = vmatprep.subr.bf16.mxu0 %v6185_v32 }
 0x9a4   : > { %4529 = vmatpush1.bf16.msra.mxu0 %v6183_v34  ;;  %v6200_v34 = vld [vmem:[%s7329_s23 + $0x1b4] ss:$8 sps:$4 sm:$0xff]  }
 0x9a5   : > { %4530 = vmatprep.subr.bf16.mxu0 %v6188_v55 }
 0x9a6   : > { %v3493_v18 = vpop.f32.mrb[12].mxu0  ;;  %v3536_v46 = vpop.f32.mrb[28].mxu1 }
 0x9a7   : > { %v7901_v0 = vadd.f32 %v3493_v18, %v2712_v37  ;;  %v7903_v19 = vadd.f32 %v3536_v46, %v2720_v38  ;;  %v3495_v63 = vpop.f32.mrb[13].mxu0  ;;  %v3538_v47 = vpop.f32.mrb[29].mxu1 }
 0x9a8   : > { %4531 = vmatpush1.bf16.msra.mxu0 %v6186_v39  ;;  %v7905_v48 = vadd.f32 %v3495_v63, %v2716_v42  ;;  %v7907_v49 = vadd.f32 %v3538_v47, %v2724_v43  ;;  %v3497_v50 = vpop.f32.mrb[14].mxu0  ;;  %v3540_v53 = vpop.f32.mrb[30].mxu1 }
 0x9a9   : > { %v3565_v35 = vmul.f32 %v7901_v0, %v7901_v0  ;;  %v3567_v61 = vmul.f32 %v7903_v19, %v7903_v19  ;;  %4532 = vmatprep.subr.bf16.mxu0 %v6191_v45  ;;  %v3499_v62 = vpop.f32.mrb[15].mxu0  ;;  %v3542_v4 = vpop.f32.mrb[31].mxu1  ;;  %v7919_v8 = vadd.f32 %v3497_v50, %v2712_v37  ;;  %v7921_v9 = vadd.f32 %v3540_v53, %v2720_v38  ;;  %v6198_v50 = vld [vmem:[%s7329_s23 + $0x1b0] ss:$8 sps:$4 sm:$0xff]  }
 0x9aa   : > { %v3566_v7 = vmul.f32 %v7905_v48, %v7905_v48  ;;  %v3568_v57 = vmul.f32 %v7907_v49, %v7907_v49  ;;  %v7925_v41 = vadd.f32 %v3499_v62, %v2716_v42  ;;  %v7927_v11 = vadd.f32 %v3542_v4, %v2724_v43  ;;  %v6201_v4 = vld [vmem:[%s7329_s23 + $0x1c0] ss:$8 sps:$4 sm:$0xff]  }
 0x9ab   : > { %v3581_v10 = vmul.f32 %v3565_v35, %v7901_v0  ;;  %v3583_v25 = vmul.f32 %v3567_v61, %v7903_v19  ;;  %v3573_v59 = vmul.f32 %v7919_v8, %v7919_v8  ;;  %v3575_v58 = vmul.f32 %v7921_v9, %v7921_v9  ;;  %v6203_v35 = vld [vmem:[%s7329_s23 + $0x1c4] ss:$8 sps:$4 sm:$0xff]  }
 0x9ac   : > { %v3582_v51 = vmul.f32 %v3566_v7, %v7905_v48  ;;  %v3584_v44 = vmul.f32 %v3568_v57, %v7907_v49  ;;  %4533 = vmatpush1.bf16.msra.mxu0 %v6189_v56  ;;  %v3574_v23 = vmul.f32 %v7925_v41, %v7925_v41  ;;  %v3576_v29 = vmul.f32 %v7927_v11, %v7927_v11  ;;  %v6204_v7 = vld [vmem:[%s7329_s23 + $0x1d0] ss:$8 sps:$4 sm:$0xff]  }
 0x9ad   : > { %v3597_v15 = vmul.f32 0.044715, %v3581_v10  ;;  %v3599_v13 = vmul.f32 0.044715, %v3583_v25  ;;  %4534 = vmatprep.subr.bf16.mxu0 %v6194_v6  ;;  %v3589_v2 = vmul.f32 %v3573_v59, %v7919_v8  ;;  %v3591_v28 = vmul.f32 %v3575_v58, %v7921_v9  ;;  %v6206_v6 = vld [vmem:[%s7329_s23 + $0x1d4] ss:$8 sps:$4 sm:$0xff]  }
 0x9ae   : > { %v3598_v20 = vmul.f32 0.044715, %v3582_v51  ;;  %v3600_v3 = vmul.f32 0.044715, %v3584_v44  ;;  %v3590_v32 = vmul.f32 %v3574_v23, %v7925_v41  ;;  %v3592_v38 = vmul.f32 %v3576_v29, %v7927_v11  ;;  %v6209_v10 = vld [vmem:[%s7329_s23 + $0x1e4] ss:$8 sps:$4 sm:$0xff]  }
 0x9af   : > { %v3613_v26 = vadd.f32 %v3597_v15, %v7901_v0  ;;  %v3615_v27 = vadd.f32 %v3599_v13, %v7903_v19  ;;  %v3605_v31 = vmul.f32 0.044715, %v3589_v2  ;;  %v3607_v37 = vmul.f32 0.044715, %v3591_v28  ;;  %v6207_v59 = vld [vmem:[%s7329_s23 + $0x1e0] ss:$8 sps:$4 sm:$0xff]  }
 0x9b0   : > { %v3614_v30 = vadd.f32 %v3598_v20, %v7905_v48  ;;  %v3616_v40 = vadd.f32 %v3600_v3, %v7907_v49  ;;  %4535 = vmatpush1.bf16.msra.mxu0 %v6192_v14  ;;  %v3606_v45 = vmul.f32 0.044715, %v3590_v32  ;;  %v3608_v46 = vmul.f32 0.044715, %v3592_v38 }
 0x9b1   : > { %v3629_v54 = vmul.f32 0.7978846, %v3613_v26  ;;  %v3631_v55 = vmul.f32 0.7978846, %v3615_v27  ;;  %4536 = vmatprep.subr.bf16.mxu0 %v6197_v60  ;;  %v3621_v43 = vadd.f32 %v3605_v31, %v7919_v8  ;;  %v3623_v18 = vadd.f32 %v3607_v37, %v7921_v9  ;;  %v6212_v60 = vld [vmem:[%s7329_s23 + $0x1f4] ss:$8 sps:$4 sm:$0xff]  }
 0x9b2   : > { %v3630_v39 = vmul.f32 0.7978846, %v3614_v30  ;;  %v3632_v42 = vmul.f32 0.7978846, %v3616_v40  ;;  %v3622_v47 = vadd.f32 %v3606_v45, %v7925_v41  ;;  %v3624_v56 = vadd.f32 %v3608_v46, %v7927_v11  ;;  %v6210_v31 = vld [vmem:[%s7329_s23 + $0x1f0] ss:$8 sps:$4 sm:$0xff]  }
 0x9b3   : > { %6349 = vtanh.f32 %v3629_v54  ;;  %v3637_v63 = vmul.f32 0.7978846, %v3621_v43  ;;  %v3639_v53 = vmul.f32 0.7978846, %v3623_v18  ;;  %v3549_v13 = vmul.f32 0.5, %v7901_v0 }
 0x9b4   : > { %6351 = vtanh.f32 %v3631_v55  ;;  %4537 = vmatpush1.bf16.msra.mxu0 %v6195_v33  ;;  %v3638_v61 = vmul.f32 0.7978846, %v3622_v47  ;;  %v3640_v62 = vmul.f32 0.7978846, %v3624_v56  ;;  %v3551_v58 = vmul.f32 0.5, %v7903_v19 }
 0x9b5   : > { %6353 = vtanh.f32 %v3630_v39  ;;  %4538 = vmatprep.subr.bf16.mxu0 %v6200_v34  ;;  %v3557_v2 = vmul.f32 0.5, %v7919_v8  ;;  %v3559_v23 = vmul.f32 0.5, %v7921_v9  ;;  %v3550_v29 = vmul.f32 0.5, %v7905_v48  ;;  %v6215_v34 = vld [vmem:[%s7329_s23 + $0x204] ss:$8 sps:$4 sm:$0xff]  }
 0x9b6   : > { %6355 = vtanh.f32 %v3632_v42  ;;  %v3558_v30 = vmul.f32 0.5, %v7925_v41  ;;  %v3552_v9 = vmul.f32 0.5, %v7907_v49  ;;  %v3560_v48 = vmul.f32 0.5, %v7927_v11  ;;  %v6213_v43 = vld [vmem:[%s7329_s23 + $0x200] ss:$8 sps:$4 sm:$0xff]  }
 0x9b7   : > { %6357 = vtanh.f32 %v3637_v63  ;;  %v6218_v18 = vld [vmem:[%s7329_s23 + $0x214] ss:$8 sps:$4 sm:$0xff]   ;;  %v6216_v63 = vld [vmem:[%s7329_s23 + $0x210] ss:$8 sps:$4 sm:$0xff]   ;;  %v6221_v47 = vld [vmem:[%s7329_s23 + $0x224] ss:$8 sps:$4 sm:$0xff]  }
 0x9b8   : > { %6359 = vtanh.f32 %v3639_v53  ;;  %4539 = vmatpush1.bf16.msra.mxu0 %v6198_v50  ;;  %v6219_v50 = vld [vmem:[%s7329_s23 + $0x220] ss:$8 sps:$4 sm:$0xff]   ;;  %v6224_v53 = vld [vmem:[%s7329_s23 + $0x234] ss:$8 sps:$4 sm:$0xff]   ;;  %v6222_v56 = vld [vmem:[%s7329_s23 + $0x230] ss:$8 sps:$4 sm:$0xff]  }
 0x9b9   : > { %6361 = vtanh.f32 %v3638_v61  ;;  %4540 = vmatprep.subr.bf16.mxu0 %v6203_v35  ;;  %v6228_v35 = vld [vmem:[%s7329_s23 + $0x250] ss:$8 sps:$4 sm:$0xff]   ;;  %v6233_v61 = vld [vmem:[%s7329_s23 + $0x264] ss:$8 sps:$4 sm:$0xff]  }
 0x9ba   : > { %6363 = vtanh.f32 %v3640_v62  ;;  %v6231_v62 = vld [vmem:[%s7329_s23 + $0x260] ss:$8 sps:$4 sm:$0xff]  }
 0x9bc   : > { %4541 = vmatpush1.bf16.msra.mxu0 %v6201_v4  ;;  %v6236_v4 = vld [vmem:[%s7329_s23 + $0x274] ss:$8 sps:$4 sm:$0xff]  }
 0x9bd   : > { %v6350_v57 = vpop.eup %6349  ;;  %4542 = vmatprep.subr.bf16.mxu0 %v6206_v6  ;;  %v6234_v6 = vld [vmem:[%s7329_s23 + $0x270] ss:$8 sps:$4 sm:$0xff]  }
 0x9be   : > { %v6352_v25 = vpop.eup %6351  ;;  %v3661_v14 = vadd.f32 1.0, %v6350_v57  ;;  %v6237_v57 = vld [vmem:[%s7329_s23 + $0x280] ss:$8 sps:$4 sm:$0xff]  }
 0x9bf   : > { %v6354_v51 = vpop.eup %6353  ;;  %v3663_v20 = vadd.f32 1.0, %v6352_v25  ;;  %v6240_v25 = vld [vmem:[%s7329_s23 + $0x290] ss:$8 sps:$4 sm:$0xff]  }
 0x9c0   : > { %v6356_v44 = vpop.eup %6355  ;;  %4543 = vmatpush1.bf16.msra.mxu0 %v6204_v7  ;;  %v3662_v26 = vadd.f32 1.0, %v6354_v51  ;;  %v7970_v33 = vmul.f32 %v3661_v14, %v3549_v13  ;;  %v6239_v7 = vld [vmem:[%s7329_s23 + $0x284] ss:$8 sps:$4 sm:$0xff]   ;;  %v6246_v14 = vld [vmem:[%s7329_s23 + $0x2b0] ss:$8 sps:$4 sm:$0xff]  }
 0x9c1   : > { %v6358_v15 = vpop.eup %6357  ;;  %4544 = vmatprep.subr.bf16.mxu0 %v6209_v10  ;;  %v3664_v0 = vadd.f32 1.0, %v6356_v44  ;;  %v7977_v41 = vmul.f32 %v3663_v20, %v3551_v58  ;;  %v6242_v10 = vld [vmem:[%s7329_s23 + $0x294] ss:$8 sps:$4 sm:$0xff]   ;;  %v6245_v51 = vld [vmem:[%s7329_s23 + $0x2a4] ss:$8 sps:$4 sm:$0xff]  }
 0x9c2   : > { %v6360_v3 = vpop.eup %6359  ;;  %v3669_v27 = vadd.f32 1.0, %v6358_v15  ;;  %v3678_v37 = vmul.f32 %v3662_v26, %v3550_v29  ;;  %v6243_v44 = vld [vmem:[%s7329_s23 + $0x2a0] ss:$8 sps:$4 sm:$0xff]   ;;  %v6251_v15 = vld [vmem:[%s7329_s23 + $0x2c4] ss:$8 sps:$4 sm:$0xff]  }
 0x9c3   : > { %v6362_v28 = vpop.eup %6361  ;;  %v3671_v40 = vadd.f32 1.0, %v6360_v3  ;;  %v7983_v42 = vmul.f32 %v3664_v0, %v3552_v9  ;;  %v6249_v13 = vld [vmem:[%s7329_s23 + $0x2c0] ss:$8 sps:$4 sm:$0xff]   ;;  %v6254_v58 = vld [vmem:[%s7329_s23 + $0x2d4] ss:$8 sps:$4 sm:$0xff]  }
 0x9c4   : > { %v6364_v19 = vpop.eup %6363  ;;  %4545 = vmatpush1.bf16.msra.mxu0 %v6207_v59  ;;  %v3670_v32 = vadd.f32 1.0, %v6362_v28  ;;  %v7972_v8 = vmul.f32 %v3669_v27, %v3557_v2  ;;  %v6248_v59 = vld [vmem:[%s7329_s23 + $0x2b4] ss:$8 sps:$4 sm:$0xff]   ;;  %v6257_v20 = vld [vmem:[%s7329_s23 + $0x2e4] ss:$8 sps:$4 sm:$0xff]  }
 0x9c5   : > { %4546 = vmatprep.subr.bf16.mxu0 %v6212_v60  ;;  %v3672_v54 = vadd.f32 1.0, %v6364_v19  ;;  %v7979_v55 = vmul.f32 %v3671_v40, %v3559_v23  ;;  %v6252_v60 = vld [vmem:[%s7329_s23 + $0x2d0] ss:$8 sps:$4 sm:$0xff]   ;;  %v6255_v3 = vld [vmem:[%s7329_s23 + $0x2e0] ss:$8 sps:$4 sm:$0xff]  }
 0x9c6   : > { %v3686_v38 = vmul.f32 %v3670_v32, %v3558_v30  ;;  %v3693_v39 = vpack.c.bf16 %v7972_v8, %v7970_v33  ;;  %v6260_v2 = vld [vmem:[%s7329_s23 + $0x2f4] ss:$8 sps:$4 sm:$0xff]   ;;  %v6258_v23 = vld [vmem:[%s7329_s23 + $0x2f0] ss:$8 sps:$4 sm:$0xff]   ;;  %v6263_v26 = vld [vmem:[%s7329_s23 + $0x304] ss:$8 sps:$4 sm:$0xff]  }
 0x9c7   : > { %v7985_v49 = vmul.f32 %v3672_v54, %v3560_v48  ;;  %v3695_v11 = vpack.c.bf16 %v7979_v55, %v7977_v41  ;;  %v6261_v27 = vld [vmem:[%s7329_s23 + $0x300] ss:$8 sps:$4 sm:$0xff]   ;;  %v6266_v28 = vld [vmem:[%s7329_s23 + $0x314] ss:$8 sps:$4 sm:$0xff]   ;;  %v6264_v29 = vld [vmem:[%s7329_s23 + $0x310] ss:$8 sps:$4 sm:$0xff]  }
 0x9c8   : > { %4547 = vmatpush1.bf16.msra.mxu0 %v6210_v31  ;;  %v3694_v45 = vpack.c.bf16 %v3686_v38, %v3678_v37  ;;  %v6269_v30 = vld [vmem:[%s7329_s23 + $0x324] ss:$8 sps:$4 sm:$0xff]   ;;  %v6267_v0 = vld [vmem:[%s7329_s23 + $0x320] ss:$8 sps:$4 sm:$0xff]   ;;  %v6272_v40 = vld [vmem:[%s7329_s23 + $0x334] ss:$8 sps:$4 sm:$0xff]  }
 0x9c9   : > { %4559 = vmatprep.subr.bf16.mxu0 %v6215_v34  ;;  %v3696_v46 = vpack.c.bf16 %v7985_v49, %v7983_v42  ;;  %v6270_v19 = vld [vmem:[%s7329_s23 + $0x330] ss:$8 sps:$4 sm:$0xff]   ;;  %v6275_v31 = vld [vmem:[%s7329_s23 + $0x344] ss:$8 sps:$4 sm:$0xff]   ;;  %v6273_v32 = vld [vmem:[%s7329_s23 + $0x340] ss:$8 sps:$4 sm:$0xff]  }
 0x9ca   : > { %v6278_v33 = vld [vmem:[%s7329_s23 + $0x354] ss:$8 sps:$4 sm:$0xff]   ;;  %v6276_v8 = vld [vmem:[%s7329_s23 + $0x350] ss:$8 sps:$4 sm:$0xff]   ;;  %v6281_v9 = vld [vmem:[%s7329_s23 + $0x364] ss:$8 sps:$4 sm:$0xff]  }
 0x9cb   : > { %4549 = vmatmul.mubr.bf16.vlgmr.msra.gmra.mrb[16].mxu0 %v3691_v16  ;;  %v6230_v16 = vld [vmem:[%s7329_s23 + $0x254] ss:$8 sps:$4 sm:$0xff]   ;;  %v6279_v34 = vld [vmem:[%s7329_s23 + $0x360] ss:$8 sps:$4 sm:$0xff]   ;;  %v6282_v54 = vld [vmem:[%s7329_s23 + $0x370] ss:$8 sps:$4 sm:$0xff]  }
 0x9cc   : > { %4560 = vmatpush1.bf16.msra.mxu0 %v6213_v43  ;;  %4591 = vmatprep.mubr.bf16.mxu0 %v3694_v45  ;;  %v6284_v48 = vld [vmem:[%s7329_s23 + $0x374] ss:$8 sps:$4 sm:$0xff]   ;;  %v6287_v37 = vld [vmem:[%s7329_s23 + $0x384] ss:$8 sps:$4 sm:$0xff]   ;;  %v6285_v38 = vld [vmem:[%s7329_s23 + $0x380] ss:$8 sps:$4 sm:$0xff]  }
 0x9cd   : > { %4561 = vmatprep.subr.bf16.mxu0 %v6218_v18  ;;  %v6288_v42 = vld [vmem:[%s7329_s23 + $0x390] ss:$8 sps:$4 sm:$0xff]   ;;  %v6293_v49 = vld [vmem:[%s7329_s23 + $0x3a4] ss:$8 sps:$4 sm:$0xff]   ;;  %v6291_v43 = vld [vmem:[%s7329_s23 + $0x3a0] ss:$8 sps:$4 sm:$0xff]  }
 0x9ce   : > { %v6296_v45 = vld [vmem:[%s7329_s23 + $0x3b4] ss:$8 sps:$4 sm:$0xff]   ;;  %v6294_v18 = vld [vmem:[%s7329_s23 + $0x3b0] ss:$8 sps:$4 sm:$0xff]  }
 0x9d0   : > { %4562 = vmatpush1.bf16.msra.mxu0 %v6216_v63  ;;  %v6297_v63 = vld [vmem:[%s7329_s23 + $0x3c0] ss:$8 sps:$4 sm:$0xff]  }
 0x9d1   : > { %4563 = vmatprep.subr.bf16.mxu0 %v6221_v47  ;;  %v6302_v47 = vld [vmem:[%s7329_s23 + $0x3d4] ss:$8 sps:$4 sm:$0xff]  }
 0x9d4   : > { %4564 = vmatpush1.bf16.msra.mxu0 %v6219_v50  ;;  %v6300_v50 = vld [vmem:[%s7329_s23 + $0x3d0] ss:$8 sps:$4 sm:$0xff]  }
 0x9d5   : > { %4565 = vmatprep.subr.bf16.mxu0 %v6224_v53  ;;  %v6305_v53 = vld [vmem:[%s7329_s23 + $0x3e4] ss:$8 sps:$4 sm:$0xff]  }
 0x9d8   : > { %4566 = vmatpush1.bf16.msra.mxu0 %v6222_v56  ;;  %v6303_v56 = vld [vmem:[%s7329_s23 + $0x3e0] ss:$8 sps:$4 sm:$0xff]  }
 0x9d9   : > { %4567 = vmatprep.subr.bf16.mxu0 %v6227_v52  ;;  %v6308_v52 = vld [vmem:[%s7329_s23 + $0x3f4] ss:$8 sps:$4 sm:$0xff]  }
 0x9dc   : > { %4568 = vmatpush1.bf16.msra.mxu0 %v6225_v12  ;;  %v6306_v12 = vld [vmem:[%s7329_s23 + $0x3f0] ss:$8 sps:$4 sm:$0xff]  }
 0x9dd   : > { %4569 = vmatprep.subr.bf16.mxu0 %v6230_v16  ;;  %v6371_v16 = vld [vmem:[%s7307_s6] sm:$0xff] }
 0x9e0   : > { %4570 = vmatpush1.bf16.msra.mxu0 %v6228_v35  ;;  %v3828_v35 = vrot.slane %v6371_v16, %v7889_v36  ;;  %v4657_v16 = vld [vmem:[%s8288_s9] sm:$0x3] (!%p5646_p6) }
 0x9e1   : > { %4571 = vmatprep.subr.bf16.mxu0 %v6233_v61  ;;  %v6372_v61 = vld [vmem:[%s7307_s6 + $0x8] sm:$0xff] }
 0x9e4   : > { %4572 = vmatpush1.bf16.msra.mxu0 %v6231_v62  ;;  %v3832_v62 = vrot.slane %v6372_v61, %v7889_v36  ;;  %v4717_v61 = vrot.slane (!%p5646_p6), %v4657_v16, %v7384_v1 }
 0x9e5   : > { %4573 = vmatprep.subr.bf16.mxu0 %v6236_v4 }
 0x9e8   : > { %4574 = vmatpush1.bf16.msra.mxu0 %v6234_v6 }
 0x9e9   : > { %4575 = vmatprep.subr.bf16.mxu0 %v6239_v7 }
 0x9ec   : > { %4576 = vmatpush1.bf16.msra.mxu0 %v6237_v57 }
 0x9ed   : > { %4577 = vmatprep.subr.bf16.mxu0 %v6242_v10 }
 0x9f0   : > { %4578 = vmatpush1.bf16.msra.mxu0 %v6240_v25 }
 0x9f1   : > { %4579 = vmatprep.subr.bf16.mxu0 %v6245_v51 }
 0x9f4   : > { %4580 = vmatpush1.bf16.msra.mxu0 %v6243_v44 }
 0x9f5   : > { %4581 = vmatprep.subr.bf16.mxu0 %v6248_v59 }
 0x9f8   : > { %4582 = vmatpush1.bf16.msra.mxu0 %v6246_v14 }
 0x9f9   : > { %4583 = vmatprep.subr.bf16.mxu0 %v6251_v15 }
 0x9fc   : > { %4584 = vmatpush1.bf16.msra.mxu0 %v6249_v13  ;;  %v6374_v13 = vld [vmem:[#allocation15] sm:$0xff] (!%p5646_p6)  }
 0x9fd   : > { %4585 = vmatprep.subr.bf16.mxu0 %v6254_v58  ;;  %v6375_v58 = vld [vmem:[#allocation15 + $0x48] sm:$0xff] (!%p5646_p6)  }
 0xa00   : > { %4586 = vmatpush1.bf16.msra.mxu0 %v6252_v60 }
 0xa01   : > { %4587 = vmatprep.subr.bf16.mxu0 %v6257_v20 }
 0xa04   : > { %4588 = vmatpush1.bf16.msra.mxu0 %v6255_v3 }
 0xa05   : > { %4589 = vmatprep.subr.bf16.mxu0 %v6260_v2 }
 0xa08   : > { %4590 = vmatpush1.bf16.msra.mxu0 %v6258_v23 }
 0xa09   : > { %4602 = vmatprep.subr.bf16.mxu0 %v6263_v26 }
 0xa0b   : > { %4592 = vmatmul.mubr.bf16.vlgmr.msra.gmra.mrb[16].mxu0 %v3693_v39  ;;  %v6290_v39 = vld [vmem:[%s7329_s23 + $0x394] ss:$8 sps:$4 sm:$0xff]  }
 0xa0c   : > { %4603 = vmatpush1.bf16.msra.mxu0 %v6261_v27  ;;  %4634 = vmatprep.mubr.bf16.mxu0 %v3696_v46  ;;  %v6299_v46 = vld [vmem:[%s7329_s23 + $0x3c4] ss:$8 sps:$4 sm:$0xff]  }
 0xa0d   : > { %4604 = vmatprep.subr.bf16.mxu0 %v6266_v28 }
 0xa10   : > { %4605 = vmatpush1.bf16.msra.mxu0 %v6264_v29 }
 0xa11   : > { %4606 = vmatprep.subr.bf16.mxu0 %v6269_v30 }
 0xa14   : > { %4607 = vmatpush1.bf16.msra.mxu0 %v6267_v0 }
 0xa15   : > { %4608 = vmatprep.subr.bf16.mxu0 %v6272_v40 }
 0xa18   : > { %4609 = vmatpush1.bf16.msra.mxu0 %v6270_v19 }
 0xa19   : > { %4610 = vmatprep.subr.bf16.mxu0 %v6275_v31 }
 0xa1c   : > { %4611 = vmatpush1.bf16.msra.mxu0 %v6273_v32 }
 0xa1d   : > { %4612 = vmatprep.subr.bf16.mxu0 %v6278_v33 }
 0xa20   : > { %4613 = vmatpush1.bf16.msra.mxu0 %v6276_v8 }
 0xa21   : > { %4614 = vmatprep.subr.bf16.mxu0 %v6281_v9 }
 0xa24   : > { %4615 = vmatpush1.bf16.msra.mxu0 %v6279_v34  ;;  %v6376_v34 = vld [vmem:[#allocation15 + $0x8] sm:$0xff] (!%p5646_p6)  }
 0xa25   : > { %4616 = vmatprep.subr.bf16.mxu0 %v6284_v48  ;;  %v6377_v48 = vld [vmem:[#allocation15 + $0x50] sm:$0xff] (!%p5646_p6)  }
 0xa28   : > { %4617 = vmatpush1.bf16.msra.mxu0 %v6282_v54  ;;  %v6378_v54 = vld [vmem:[#allocation15 + $0x10] sm:$0xff] (!%p5646_p6)  }
 0xa29   : > { %4618 = vmatprep.subr.bf16.mxu0 %v6287_v37  ;;  %v6379_v37 = vld [vmem:[#allocation15 + $0x58] sm:$0xff] (!%p5646_p6)  }
 0xa2c   : > { %4619 = vmatpush1.bf16.msra.mxu0 %v6285_v38  ;;  %v6380_v38 = vld [vmem:[#allocation15 + $0x18] sm:$0xff] (!%p5646_p6)  }
 0xa2d   : > { %4620 = vmatprep.subr.bf16.mxu0 %v6290_v39  ;;  %v6381_v39 = vld [vmem:[#allocation15 + $0x60] sm:$0xff] (!%p5646_p6)  }
 0xa30   : > { %4621 = vmatpush1.bf16.msra.mxu0 %v6288_v42  ;;  %v6382_v42 = vld [vmem:[#allocation15 + $0x20] sm:$0xff] (!%p5646_p6)  }
 0xa31   : > { %4622 = vmatprep.subr.bf16.mxu0 %v6293_v49  ;;  %v6383_v49 = vld [vmem:[#allocation15 + $0x68] sm:$0xff] (!%p5646_p6)  }
 0xa34   : > { %4623 = vmatpush1.bf16.msra.mxu0 %v6291_v43  ;;  %v6384_v43 = vld [vmem:[#allocation15 + $0x28] sm:$0xff] (!%p5646_p6)  }
 0xa35   : > { %4624 = vmatprep.subr.bf16.mxu0 %v6296_v45  ;;  %v6385_v45 = vld [vmem:[#allocation15 + $0x70] sm:$0xff] (!%p5646_p6)  }
 0xa38   : > { %4625 = vmatpush1.bf16.msra.mxu0 %v6294_v18  ;;  %v6386_v18 = vld [vmem:[#allocation15 + $0x30] sm:$0xff] (!%p5646_p6)  }
 0xa39   : > { %4626 = vmatprep.subr.bf16.mxu0 %v6299_v46  ;;  %v6387_v46 = vld [vmem:[#allocation15 + $0x78] sm:$0xff] (!%p5646_p6)  }
 0xa3c   : > { %4627 = vmatpush1.bf16.msra.mxu0 %v6297_v63  ;;  %v6388_v63 = vld [vmem:[#allocation15 + $0x38] sm:$0xff] (!%p5646_p6)  }
 0xa3d   : > { %4628 = vmatprep.subr.bf16.mxu0 %v6302_v47 }
 0xa40   : > { %4629 = vmatpush1.bf16.msra.mxu0 %v6300_v50 }
 0xa41   : > { %4630 = vmatprep.subr.bf16.mxu0 %v6305_v53 }
 0xa44   : > { %4631 = vmatpush1.bf16.msra.mxu0 %v6303_v56 }
 0xa45   : > { %4632 = vmatprep.subr.bf16.mxu0 %v6308_v52 }
 0xa48   : > { %4633 = vmatpush1.bf16.msra.mxu0 %v6306_v12 }
 0xa4b   : > { %4635 = vmatmul.mubr.bf16.vlgmr.msra.gmra.mrb[16].mxu0 %v3695_v11 }
 0xb1e   : > { %v4636_v4 = vpop.f32.mrb[16].mxu0 }
 0xb1f   : > { %v5748_v6 = vadd.f32 %v4636_v4, %v3828_v35  ;;  %v4638_v7 = vpop.f32.mrb[17].mxu0 }
 0xb20   : > { %v5749_v57 = vadd.f32 %v4638_v7, %v3832_v62  ;;  %v4640_v10 = vpop.f32.mrb[18].mxu0  ;;  %4656 = sbr.rel (%p5646_p6) target bundleno = 3396 (0xd44), region = 104 }
 0xb21   : > { %v4645_v25 = vadd.f32 %v5748_v6, %v7607_v17  ;;  %v5750_v51 = vadd.f32 %v4640_v10, %v3828_v35  ;;  %v4642_v44 = vpop.f32.mrb[19].mxu0  ;;  %v4658_v35 = vld [vmem:[%s8289_s0] sm:$0x3] (!%p5646_p6) }
 0xb22   : > { %v4646_v59 = vadd.f32 %v5749_v57, %v7609_v21  ;;  %v5751_v14 = vadd.f32 %v4642_v44, %v3832_v62  ;;  %v4721_v62 = vrot.slane (!%p5646_p6), %v4657_v16, %v7393_v5  ;;  %v4730_v7 = vrot.slane (!%p5646_p6), %v4658_v35, %v7384_v1 }
 0xb23   : > { %4649 = vst [vmem:[#allocation2] sm:$0xff] %v4645_v25  ;;  %v4647_v41 = vadd.f32 %v5750_v51, %v7611_v22  ;;  %v4891_v21 = vsel (!%p5646_p6), %vm4890_vm3, %v4645_v25, 0.0  ;;  %v4734_v57 = vrot.slane (!%p5646_p6), %v4658_v35, %v7393_v5 }
 0xb24   : > { %4650 = vst [vmem:[#allocation2 + $0x8] sm:$0xff] %v4646_v59  ;;  %v4648_v55 = vadd.f32 %v5751_v14, %v7613_v24  ;;  %v4892_v11 = vsel (!%p5646_p6), %vm4890_vm3, %v4646_v59, 0.0  ;;  %v6373_v24 = vld [vmem:[#allocation15 + $0x40] sm:$0xff] (!%p5646_p6)  }
 0xb25   : > { %4651 = vst [vmem:[#allocation2 + $0x10] sm:$0xff] %v4647_v41  ;;  %v4693_v17 = vsel (!%p5646_p6), %vm4692_vm2, %v4647_v41, 0.0  ;;  %v4893_v22 = vadd.f32 (!%p5646_p6), %v4892_v11, %v4891_v21  ;;  %5680 = vmatprep.subr.bf16.mxu0 (!%p5646_p6), %v6373_v24  ;;  %5702 = vmatprep.subr.bf16.mxu1 (!%p5646_p6), %v6373_v24 }
 0xb26   : > { %4652 = vst [vmem:[#allocation2 + $0x18] sm:$0xff] %v4648_v55  ;;  %v4694_v36 = vsel (!%p5646_p6), %vm4692_vm2, %v4648_v55, 0.0  ;;  %5681 = vmatpush3.bf16.msra.mxu0 (!%p5646_p6), %v6374_v13  ;;  %5703 = vmatpush3.bf16.msra.mxu1 (!%p5646_p6), %v6374_v13 }
 0xb27   : > { %v4695_v15 = vadd.f32 %v4694_v36, %v4693_v17  ;;  %5682 = vmatprep.subr.bf16.mxu0 %v6375_v58  ;;  %5704 = vmatprep.subr.bf16.mxu1 %v6375_v58 }
 0xb29   : > { %4696 = vadd.xlane.f32.xlu0 %v4695_v15 }
 0xb2a   : > { %5683 = vmatpush3.bf16.msra.mxu0 %v6376_v34  ;;  %5705 = vmatpush3.bf16.msra.mxu1 %v6376_v34 }
 0xb2b   : > { %5684 = vmatprep.subr.bf16.mxu0 %v6377_v48  ;;  %5706 = vmatprep.subr.bf16.mxu1 %v6377_v48 }
 0xb2d   : > { %4894 = vadd.xlane.f32.xlu0 %v4893_v22 }
 0xb2e   : > { %5685 = vmatpush3.bf16.msra.mxu0 %v6378_v54  ;;  %5707 = vmatpush3.bf16.msra.mxu1 %v6378_v54 }
 0xb2f   : > { %5686 = vmatprep.subr.bf16.mxu0 %v6379_v37  ;;  %5708 = vmatprep.subr.bf16.mxu1 %v6379_v37 }
 0xb32   : > { %5687 = vmatpush3.bf16.msra.mxu0 %v6380_v38  ;;  %5709 = vmatpush3.bf16.msra.mxu1 %v6380_v38 }
 0xb33   : > { %5688 = vmatprep.subr.bf16.mxu0 %v6381_v39  ;;  %5710 = vmatprep.subr.bf16.mxu1 %v6381_v39 }
 0xb36   : > { %5689 = vmatpush3.bf16.msra.mxu0 %v6382_v42  ;;  %5711 = vmatpush3.bf16.msra.mxu1 %v6382_v42 }
 0xb37   : > { %5690 = vmatprep.subr.bf16.mxu0 %v6383_v49  ;;  %5712 = vmatprep.subr.bf16.mxu1 %v6383_v49 }
 0xb3a   : > { %5691 = vmatpush3.bf16.msra.mxu0 %v6384_v43  ;;  %5713 = vmatpush3.bf16.msra.mxu1 %v6384_v43 }
 0xb3b   : > { %5692 = vmatprep.subr.bf16.mxu0 %v6385_v45  ;;  %5714 = vmatprep.subr.bf16.mxu1 %v6385_v45 }
 0xb3e   : > { %5693 = vmatpush3.bf16.msra.mxu0 %v6386_v18  ;;  %5715 = vmatpush3.bf16.msra.mxu1 %v6386_v18 }
 0xb3f   : > { %5694 = vmatprep.subr.bf16.mxu0 %v6387_v46  ;;  %5716 = vmatprep.subr.bf16.mxu1 %v6387_v46 }
 0xb42   : > { %5695 = vmatpush3.bf16.msra.mxu0 %v6388_v63  ;;  %5717 = vmatpush3.bf16.msra.mxu1 %v6388_v63 }
 0xbb6   : > { %v4697_v60 = vpop.xlane.xlu0 %4696 }
 0xbb7   : > { %v4698_v20 = vmul.f32 0.00390625, %v4697_v60  ;;  %v4691_v60 = vld [vmem:[%s8290_s5] sm:$0x1] }
 0xbb9   : > { %v8079_v3 = vsub.f32 %v4647_v41, %v4698_v20  ;;  %v8081_v2 = vsub.f32 %v4648_v55, %v4698_v20 }
 0xbba   : > { %v4895_v23 = vpop.xlane.xlu0 %4894 }
 0xbbb   : > { %v4896_v26 = vmul.f32 0.00390625, %v4895_v23  ;;  %v4701_v27 = vmul.f32 %v8079_v3, %v8079_v3  ;;  %v4702_v28 = vmul.f32 %v8081_v2, %v8081_v2 }
 0xbbd   : > { %v8087_v29 = vsub.f32 %v4645_v25, %v4896_v26  ;;  %v8089_v30 = vsub.f32 %v4646_v59, %v4896_v26  ;;  %v4703_v0 = vsel %vm4692_vm2, %v4701_v27, 0.0  ;;  %v4704_v40 = vsel %vm4692_vm2, %v4702_v28, 0.0 }
 0xbbe   : > { %v4705_v19 = vadd.f32 %v4704_v40, %v4703_v0 }
 0xbbf   : > { %v4899_v31 = vmul.f32 %v8087_v29, %v8087_v29  ;;  %v4900_v32 = vmul.f32 %v8089_v30, %v8089_v30 }
 0xbc0   : > { %4706 = vadd.xlane.f32.xlu1 %v4705_v19 }
 0xbc1   : > { %v4901_v33 = vsel %vm4890_vm3, %v4899_v31, 0.0  ;;  %v4902_v8 = vsel %vm4890_vm3, %v4900_v32, 0.0 }
 0xbc2   : > { %v4903_v9 = vadd.f32 %v4902_v8, %v4901_v33 }
 0xbc4   : > { %4904 = vadd.xlane.f32.xlu1 %v4903_v9 }
 0xc4d   : > { %v4707_v47 = vpop.xlane.xlu1 %4706 }
 0xc4e   : > { %v4708_v50 = vmul.f32 0.00390625, %v4707_v47 }
 0xc50   : > { %v4709_v53 = vadd.f32 1e-05, %v4708_v50 }
 0xc51   : > { %v4905_v56 = vpop.xlane.xlu1 %4904 }
 0xc52   : > { %6389 = vrsqrt.f32 %v4709_v53  ;;  %v4906_v52 = vmul.f32 0.00390625, %v4905_v56 }
 0xc54   : > { %v4907_v12 = vadd.f32 1e-05, %v4906_v52 }
 0xc56   : > { %6391 = vrsqrt.f32 %v4907_v12 }
 0xc5c   : > { %v6390_v4 = vpop.eup %6389 }
 0xc5d   : > { %v4712_v6 = vmul.f32 %v6390_v4, %v8081_v2  ;;  %v4711_v10 = vmul.f32 %v6390_v4, %v8079_v3  ;;  %v4745_v3 = vrot.slane %v4691_v60, %v7384_v1 }
 0xc5f   : > { %v4725_v25 = vmul.f32 %v4721_v62, %v4712_v6  ;;  %v4724_v51 = vmul.f32 %v4717_v61, %v4711_v10 }
 0xc60   : > { %v6392_v44 = vpop.eup %6391 }
 0xc61   : > { %v4738_v59 = vadd.f32 %v4734_v57, %v4725_v25  ;;  %v4737_v14 = vadd.f32 %v4730_v7, %v4724_v51  ;;  %v4910_v41 = vmul.f32 %v6392_v44, %v8089_v30  ;;  %v4909_v55 = vmul.f32 %v6392_v44, %v8087_v29 }
 0xc63   : > { %v4740_v17 = vpack.c.bf16 %v4738_v59, %v4738_v59  ;;  %v4739_v36 = vpack.c.bf16 %v4737_v14, %v4737_v14  ;;  %v4912_v21 = vmul.f32 %v4910_v41, %v4721_v62  ;;  %v4911_v11 = vmul.f32 %v4909_v55, %v4717_v61 }
 0xc65   : > { %v4750_v15 = vrot.slane %v4740_v17, 1  ;;  %v4749_v22 = vrot.slane %v4739_v36, 1  ;;  %v4914_v24 = vadd.f32 %v4912_v21, %v4734_v57  ;;  %v4913_v13 = vadd.f32 %v4911_v11, %v4730_v7 }
 0xc67   : > { %4881 = vmatprep.mubr.bf16.mxu0 %v4750_v15  ;;  %v4916_v5 = vpack.c.bf16 %v4914_v24, %v4914_v24  ;;  %v4915_v58 = vpack.c.bf16 %v4913_v13, %v4913_v13 }
 0xc68   : > { %4882 = vmatmul.mubr.bf16.vlgmr.msra.gmra.mrb[0].mxu0 %v4749_v22 }
 0xc69   : > { %4949 = vmatprep.mubr.bf16.mxu1 %v4916_v5 }
 0xc6a   : > { %4950 = vmatmul.mubr.bf16.vlgmr.msra.gmra.mrb[0].mxu1 %v4915_v58 }
 0xd3b   : > { %v5696_v20 = vpop.f32.mrb[0].mxu0 }
 0xd3c   : > { %v5697_v2 = vpop.f32.mrb[1].mxu0 }
 0xd3d   : > { %v5698_v23 = vadd.f32 %v5697_v2, %v5696_v20  ;;  %v5699_v26 = vpop.f32.mrb[2].mxu0  ;;  %v5718_v27 = vpop.f32.mrb[0].mxu1 }
 0xd3e   : > { %v5700_v28 = vpop.f32.mrb[3].mxu0  ;;  %v5719_v29 = vpop.f32.mrb[1].mxu1 }
 0xd3f   : > { %v4884_v30 = vadd.f32 %v5698_v23, %v4745_v3  ;;  %v5720_v0 = vadd.f32 %v5719_v29, %v5718_v27  ;;  %v5721_v40 = vpop.f32.mrb[2].mxu1 }
 0xd40   : > { %v5722_v19 = vpop.f32.mrb[3].mxu1 }
 0xd41   : > { %4889 = vst [vmem:[%s7340_s10] sm:$0x3f] %v4884_v30  ;;  %v4952_v31 = vadd.f32 %v5720_v0, %v4691_v60 }
 0xd43   : > { %4957 = vst [vmem:[%s691_s11] sm:$0x1] %v4952_v31 }
 0xd44 PF: > { %s8291_s2 = sld [smem:[#allocation26_spill]]  ;;  %s4978_s20 = sshll.u32 %s691_s11, 4  ;;  %s4979_s20 = int_to_ptr.vmem [resolvable:$true] %s4978_s20 }
 0xd45   : > { %s8292_s28 = sld [smem:[#allocation45_spill]]  ;;  %s4963_s15 = scalar_lea.sflag [#allocation5], %s7295_s7 }
 0xd46   : > { %s6631_s4 = scalar_lea.vmem %s4979_s20, 16  ;;  %p8294_p7 = scmp.ne.s32.totalorder %s8261_s1, 0 }
 0xd47   : > { %p6632_p5 = scmp.ne.s32.totalorder %s4979_s20, %s6631_s4  ;;  %s6794_s10 = smov [#allocation17]  }
 0xd48   : > { %s6635_s14 = sshll.u32 %s6794_s10, 4  ;;  %s6636_s14 = int_to_ptr.vmem [resolvable:$false] %s6635_s14 }
 0xd49   : > { %p6633_p10 = pnand %p6632_p5, %p8294_p7  ;;  %s6637_s6 = scalar_lea.vmem %s6636_s14, 32 }
 0xd4a   : > { %s5663_s16 = sshll.u32 %s8291_s2, 4  ;;  %p6638_p11 = scmp.lt.s32.totalorder %s4979_s20, %s6636_s14 }
 0xd4b   : > { %s8293_s18 = smov %s8292_s28  ;;  %s8124_s21 = scalar_lea.hbm %s8292_s28, %s5663_s16 }
 0xd4c   : > { %p6634_p13 = pneg %p6633_p10  ;;  %p6639_p4 = scmp.lt.s32.totalorder %s6637_s6, %s6631_s4 }
 0xd4e   : > { %p6640_p8 = por %p6639_p4, %p6638_p11 }
 0xd50   : > { %p6641_p3 = pnand %p6640_p8, %p6634_p13 }
 0xd52   : > { %6644 = shalt.err (!%p6641_p3)
}
 0xd53   : > { %s6645_s7 = scalar_lea.hbm %s8124_s21, 16  ;;  %s6649_s12 = scalar_lea.hbm %s8293_s18, 32 }
 0xd54   : > { %p6646_p0 = scmp.ne.s32.totalorder %s8124_s21, %s6645_s7  ;;  %p6650_p2 = scmp.lt.u32.totalorder %s8124_s21, %s8293_s18 }
 0xd55   : > { %p6651_p9 = scmp.lt.u32.totalorder %s6649_s12, %s6645_s7  ;;  %p6653_p5 = scmp.lt.u32.totalorder %s6645_s7, %s8124_s21 }
 0xd56   : > { %p6647_p12 = pnand %p6646_p0, %p8294_p7 }
 0xd57   : > { %p6652_p6 = por %p6651_p9, %p6650_p2 }
 0xd58   : > { %p6648_p1 = pneg %p6647_p12 }
 0xd59   : > { %p6654_p10 = por %p6653_p5, %p6652_p6 }
 0xd5b   : > { %p6655_p13 = pnand %p6654_p10, %p6648_p1 }
 0xd5d   : > { %6658 = shalt.err (!%p6655_p13)
}
 0xd5e   : > { %5785 = dma.vmem_to_hbm [thread:$0]  (%p8294_p7), %s4979_s20, 16, %s8124_s21, %s4963_s15  }
 0xd5f PF: > { %s8295_s19 = sld [smem:[#allocation30_spill]]  ;;  %p5820_p11 = scmp.ge.s32.totalorder %s6769_s13, 2 }
 0xd60   : > { %s4997_s30 = sand.u32 1, %s6741_s24  }
 0xd61   : > { %s4998_s5 = scalar_lea.sflag [#allocation5], %s4997_s30 }
 0xd65   : > { %p8296_p4 = scmp.ne.s32.totalorder %s8295_s19, 0 }
 0xd67   : > { %p5814_p8 = pnand %p5820_p11, %p8296_p4 }
 0xd69   : > { %6724 = dma.done.wait (!%p5814_p8), %s4998_s5, 16  }
 0xd6a   : > { %6726 = vsyncadd (!%p5814_p8), %s4998_s5, 4294967280  ;;  %s39_s13 = sadd.s32 1, %s6769_s13   ;;  %s8297_s2 = sld [smem:[#allocation24_spill]] }
 0xd6b   : > { %p36_p3 = scmp.ge.s32.totalorder %s39_s13, 6   ;;  %s8298_s23 = sld [smem:[#allocation29_spill]] }
 0xd6c   : > { %s8299_s1 = sld [smem:[#allocation32_spill]]  ;;  %s8300_s28 = sld [smem:[#allocation27_spill]] }
 0xd6d   : > { %s8301_s16 = sld [smem:[#allocation28_spill]]  ;;  %s8302_s30 = sld [smem:[#allocation31_spill]] }
 0xd6e   : > { %s8303_s21 = smov %s6733_s22  ;;  %s8305_s24 = smov %s6745_s25 }
 0xd6f   : > { %s8306_s25 = smov %s6749_s26  ;;  %s8308_s27 = smov %s6761_s29 }
 0xd70   : > { %s8304_s22 = smov %s8297_s2  ;;  %38 = sbr.rel (!%p36_p3) target bundleno = 30 (0x1e), region = 205 }
 0xd72   : > { %s8307_s26 = smov %s8299_s1 }
 0xd73   : > { %s8309_s29 = smov %s8301_s16 }
 0xd77   :  { %5002 = vsyncpa [#allocation4], 1 }
 0xd78   :  { %5004 = vsyncpa [#allocation4 + $0x1], 1 }
 0xd79   :  { %5005 = vsyncpa [#allocation7], 1 }
 0xd7a   :  { %5007 = vsyncpa [#allocation7 + $0x1], 1 }
 0xd7b   :  { %5008 = vsyncpa [#allocation10], 1 }
 0xd7c   :  { %5010 = vsyncpa [#allocation10 + $0x1], 1 }
 0xd7d   :  { %5011 = vsyncpa [#allocation13], 1 }
 0xd7e   :  { %5013 = vsyncpa [#allocation13 + $0x1], 1 }
 0xd7f   :  { %5014 = vsyncpa [#allocation16], 1 }
 0xd80   :  { %5015 = vsyncpa [#allocation5], 1 }
 0xd81   :  { %5017 = vsyncpa [#allocation5 + $0x1], 1 }

</bundles_post_ra>
